<compile_context>
chip_gen: v6e
topology: v6e:2x2x1
jax: 0.10.0
libtpu: 0.0.40
codegen_flags: <defaults>
</compile_context>

<pallas_src>
import jax
import jax.numpy as jnp
from jax.experimental import pallas as pl
from jax.experimental.pallas import tpu as pltpu


# ----------------------------------------------------------------------------
# Kernel 1 (one-shot prep): Chebyshev support stack + node-adaptive weight/bias
# projections for ALL layers, fused into a single pallas_call.
#   supports = cheb_stack(softmax(relu(E E^T)) * mask)        -> (K*N, N) flat
#   proj     = E @ concat([gw_l, gb_l, uw_l, ub_l ...], cols) -> (N, total_cols)
# ----------------------------------------------------------------------------
def prep_all(node_emb, s_mask, pools, cheb_k, normalize=False):
    N, D = node_emb.shape
    P = pools.shape[1]

    def kernel(emb_ref, mask_ref, pools_ref, sup_ref, proj_ref):
        e = emb_ref[...]                                             # (N, D)
        a = jax.lax.dot_general(e, e, (((1,), (1,)), ((), ())),
                                preferred_element_type=jnp.float32)  # E @ E^T
        a = jnp.maximum(a, 0.0)                                      # relu
        a = a - jnp.max(a, axis=1, keepdims=True)                    # softmax dim=1
        ea = jnp.exp(a)
        s = ea / jnp.sum(ea, axis=1, keepdims=True)
        s = s * mask_ref[...]                                        # apply_s_mask
        if normalize:                                                # static bool
            s2 = s - jnp.max(s, axis=1, keepdims=True)
            es = jnp.exp(s2)
            s = es / jnp.sum(es, axis=1, keepdims=True)
        rows = jax.lax.broadcasted_iota(jnp.int32, (N, N), 0)
        cols = jax.lax.broadcasted_iota(jnp.int32, (N, N), 1)
        terms = [(rows == cols).astype(jnp.float32), s]              # [I, S]
        for _ in range(2, cheb_k):                                   # Chebyshev
            terms.append(2.0 * jnp.dot(s, terms[-1],
                                       preferred_element_type=jnp.float32)
                         - terms[-2])
        for k in range(cheb_k):
            sup_ref[k * N:(k + 1) * N, :] = terms[k]                 # pre-flattened
        # all layers' weight/bias projections in one MXU matmul
        proj_ref[...] = jnp.dot(e, pools_ref[...],
                                preferred_element_type=jnp.float32)

    return pl.pallas_call(
        kernel,
        out_shape=(jax.ShapeDtypeStruct((cheb_k * N, N), jnp.float32),
                   jax.ShapeDtypeStruct((N, P), jnp.float32)),
        grid=(1,),
        in_specs=[pl.BlockSpec((N, D), lambda i: (0, 0)),
                  pl.BlockSpec((N, N), lambda i: (0, 0)),
                  pl.BlockSpec((D, P), lambda i: (0, 0))],
        out_specs=(pl.BlockSpec((cheb_k * N, N), lambda i: (0, 0)),
                   pl.BlockSpec((N, P), lambda i: (0, 0))),
    )(node_emb, s_mask, pools)


# ----------------------------------------------------------------------------
# Kernel 2: one AGCRN layer.  grid=(T,), hidden state lives in a persistent
# VMEM scratch, activations lane-flat (N, B*C) with b-major columns.
#
# Per timestep:
#   - 3 graph aggregations, each one (K*N, N) @ (N, B*C) MXU matmul,
#   - 3 batched (batch = node) dots with fused weights:
#       x-path  : (N, B, K*Ci) @ (N, K*Ci, 3H)  -> gate(2H) + candidate(H) + bias
#       h-path  : (N, B, K*H)  @ (N, K*H, 2H)   -> gate contribution
#       zs-path : (N, B, K*H)  @ (N, K*H, H)    -> candidate contribution
#   - GRU update, single lane-flat (N, B*H) store for state + output.
# ----------------------------------------------------------------------------
def make_cell_kernel(N, B, Ci, H, K):
    def bdot(a, w):
        # batched (batch = node) MXU matmul: (N,B,J) @ (N,J,O) -> (N,B,O)
        return jax.lax.dot_general(
            a, w, dimension_numbers=(((2,), (1,)), ((0,), (0,))),
            preferred_element_type=jnp.float32)

    def kernel(x_ref, init_ref, sup_ref, wx_ref, whg_ref, whu_ref, b_ref,
               out_ref, state_scr):
        @pl.when(pl.program_id(0) == 0)
        def _():
            state_scr[...] = init_ref[...]

        sup = sup_ref[...]                     # (K*N, N)
        x_flat = x_ref[...]                    # (N, B*Ci), b-major lane-flat
        st_flat = state_scr[...]               # (N, B*H)

        def gather3(flat, c):
            # (K*N, B*c) lane-flat -> (N, B, K*c), last axis k-major / ch-minor
            pieces = []
            for k in range(K):
                blk = flat[k * N:(k + 1) * N, :]
                pieces.append(jnp.stack(
                    [blk[:, b * c:(b + 1) * c] for b in range(B)], axis=1))
            return jnp.concatenate(pieces, axis=-1)

        def split_b(flat, c):
            # (N, B*c) -> (N, B, c)
            return jnp.stack([flat[:, b * c:(b + 1) * c] for b in range(B)],
                             axis=1)

        def flatten_b(a3):
            # (N, B, c) -> (N, B*c)
            return jnp.concatenate([a3[:, b, :] for b in range(B)], axis=1)

        # graph aggregation: one matmul per piece covers all K and all B
        agg_x = jnp.dot(sup, x_flat, preferred_element_type=jnp.float32)
        agg_h = jnp.dot(sup, st_flat, preferred_element_type=jnp.float32)

        ax = gather3(agg_x, Ci)                # (N, B, K*Ci)
        ah = gather3(agg_h, H)                 # (N, B, K*H)
        state3 = split_b(st_flat, H)           # (N, B, H)

        # x-path contribution to [z, r, candidate] plus both biases: one dot
        bias = jax.lax.broadcast_in_dim(b_ref[...], (N, B, 3 * H), (0, 2))
        xc = bdot(ax, wx_ref[...]) + bias      # (N, B, 3H)

        # --- gate: z, r ---
        zr = xc[:, :, :2 * H] + bdot(ah, whg_ref[...])
        zr = 1.0 / (1.0 + jnp.exp(-zr))        # sigmoid       (N, B, 2H)
        z = zr[:, :, :H]
        r = zr[:, :, H:]

        # --- candidate ---
        zs_flat = flatten_b(z * state3)        # (N, B*H)
        agg_c = jnp.dot(sup, zs_flat, preferred_element_type=jnp.float32)
        ac = gather3(agg_c, H)                 # (N, B, K*H)
        hc = jnp.tanh(xc[:, :, 2 * H:] + bdot(ac, whu_ref[...]))

        # --- GRU update ---
        h = r * state3 + (1.0 - r) * hc        # (N, B, H)
        h_flat = flatten_b(h)                  # (N, B*H)
        state_scr[...] = h_flat
        out_ref[...] = h_flat

    return kernel


def run_layer(x_flat, init_flat, sup_flat, wx, whg, whu, bcat,
              *, B, hidden, cheb_k):
    T, N, BC = x_flat.shape
    Ci = BC // B
    H, K = hidden, cheb_k
    kernel = make_cell_kernel(N, B, Ci, H, K)

    def const(shape):
        nd = len(shape)
        return pl.BlockSpec(shape, lambda t, _n=nd: (0,) * _n)

    return pl.pallas_call(
        kernel,
        out_shape=jax.ShapeDtypeStruct((T, N, B * H), jnp.float32),
        grid_spec=pltpu.PrefetchScalarGridSpec(
            num_scalar_prefetch=0,
            grid=(T,),
            in_specs=[
                pl.BlockSpec((None, N, BC), lambda t: (t, 0, 0)),    # x_t
                const((N, B * H)),          # initial state (lane-flat)
                const((K * N, N)),          # Chebyshev supports, pre-flattened
                const(wx.shape),            # (N, K*Ci, 3H) fused x-path weights
                const(whg.shape),           # (N, K*H, 2H)  gate h-path weights
                const(whu.shape),           # (N, K*H, H)   cand zs-path weights
                const(bcat.shape),          # (N, 3H)       fused bias
            ],
            out_specs=pl.BlockSpec((None, N, B * H), lambda t: (t, 0, 0)),
            scratch_shapes=[pltpu.VMEM((N, B * H), jnp.float32)],   # state
        ),
        compiler_params=pltpu.CompilerParams(
            dimension_semantics=("arbitrary",)),
    )(x_flat, init_flat, sup_flat, wx, whg, whu, bcat)


# ----------------------------------------------------------------------------
# AVWDCRNN forward (wrapper / glue)
# ----------------------------------------------------------------------------
def avwdcrnn_forward(x, init_state, node_emb, s_mask, params, cheb_k, hidden,
                     normalize=False):
    """x: (B, T, N, dim_in); init_state: (L, B, N, H).
    Returns ((B, T, N, H), [ (B, N, H) per layer ])."""
    B, T, N, Ci0 = x.shape
    D = node_emb.shape[1]
    H, K = hidden, cheb_k

    # one-shot fused prep: supports + every layer's parameter projections
    chunks, metas = [], []
    for li, p in enumerate(params):
        ci = Ci0 if li == 0 else H
        metas.append(ci)
        for key in ("gw", "gb", "uw", "ub"):
            chunks.append(p[key].reshape(D, -1))
    pools = jnp.concatenate(chunks, axis=1)
    sup_flat, proj = prep_all(node_emb, s_mask, pools, K, normalize)

    # split the projection back into per-layer fused tensors (tiny, one-time)
    layer_params = []
    off = 0
    for ci in metas:
        cin = ci + H
        ng, nu = K * cin * 2 * H, K * cin * H
        w_g = proj[:, off:off + ng].reshape(N, K, cin, 2 * H); off += ng
        b_g = proj[:, off:off + 2 * H]; off += 2 * H
        w_u = proj[:, off:off + nu].reshape(N, K, cin, H); off += nu
        b_u = proj[:, off:off + H]; off += H
        # fused x-path weight: contributions of x to gate(2H) and candidate(H)
        wx = jnp.concatenate(
            [w_g[:, :, :ci, :].reshape(N, K * ci, 2 * H),
             w_u[:, :, :ci, :].reshape(N, K * ci, H)], axis=-1)   # (N, K*ci, 3H)
        whg = w_g[:, :, ci:, :].reshape(N, K * H, 2 * H)          # (N, K*H, 2H)
        whu = w_u[:, :, ci:, :].reshape(N, K * H, H)              # (N, K*H, H)
        bcat = jnp.concatenate([b_g, b_u], axis=-1)               # (N, 3H)
        layer_params.append((wx, whg, whu, bcat))

    # time-major / node-major / lane-flat activations; layers chain transpose-free
    cur = jnp.transpose(x, (1, 2, 0, 3)).reshape(T, N, B * Ci0)
    hiddens = []
    for li, (wx, whg, whu, bcat) in enumerate(layer_params):
        init_flat = jnp.transpose(init_state[li], (1, 0, 2)).reshape(N, B * H)
        cur = run_layer(cur, init_flat, sup_flat, wx, whg, whu, bcat,
                        B=B, hidden=H, cheb_k=K)             # (T, N, B*H)
        hiddens.append(jnp.transpose(cur[-1].reshape(N, B, H), (1, 0, 2)))

    out = jnp.transpose(cur.reshape(T, N, B, H), (2, 0, 1, 3))   # (B, T, N, H)
    return out, hiddens


# ----------------------------------------------------------------------------
# Pure-JAX reference (mirrors the PyTorch module) for validation
# ----------------------------------------------------------------------------
def _ref_avwgcn(x, E, s_mask, wpool, bpool, cheb_k, normalize):
    N = E.shape[0]
    supports = jax.nn.softmax(jax.nn.relu(E @ E.T), axis=1)
    supports = supports * s_mask
    if normalize:
        supports = jax.nn.softmax(supports, axis=1)
    terms = [jnp.eye(N, dtype=jnp.float32), supports]
    for _ in range(2, cheb_k):
        terms.append(2.0 * supports @ terms[-1] - terms[-2])
    S = jnp.stack(terms, 0)
    W = jnp.einsum("nd,dkio->nkio", E, wpool)
    b = E @ bpool
    xg = jnp.einsum("knm,bmc->bknc", S, x)
    xg = jnp.transpose(xg, (0, 2, 1, 3))
    return jnp.einsum("bnki,nkio->bno", xg, W) + b


def _ref_cell(x, state, E, s_mask, gw, gb, uw, ub, cheb_k, normalize, H):
    cat = jnp.concatenate([x, state], axis=-1)
    zr = jax.nn.sigmoid(_ref_avwgcn(cat, E, s_mask, gw, gb, cheb_k, normalize))
    z, r = zr[..., :H], zr[..., H:]
    cand = jnp.concatenate([x, z * state], axis=-1)
    hc = jnp.tanh(_ref_avwgcn(cand, E, s_mask, uw, ub, cheb_k, normalize))
    return r * state + (1.0 - r) * hc


def _ref_forward(x, init_state, E, s_mask, params, cheb_k, normalize, H):
    B, T, N, _ = x.shape
    current = x
    hiddens = []
    for li, p in enumerate(params):
        state = init_state[li]
        states = []
        for t in range(T):
            state = _ref_cell(current[:, t], state, E, s_mask,
                              p["gw"], p["gb"], p["uw"], p["ub"],
                              cheb_k, normalize, H)
            states.append(state)
        hiddens.append(state)
        current = jnp.stack(states, axis=1)
    return current, hiddens


# ----------------------------------------------------------------------------
if __name__ == "__main__":
    B, T, N = 2, 8, 16             # batch, seq, nodes
    DIM_IN, H, K, D = 2, 32, 3, 8  # dim_in, dim_out(hidden), cheb_k, embed_dim
    NUM_LAYERS = 2
    NORMALIZE = False

    key = jax.random.PRNGKey(0)
    keys = jax.random.split(key, 3 + 4 * NUM_LAYERS)
    x = jax.random.normal(keys[0], (B, T, N, DIM_IN), jnp.float32)
    node_emb = jax.random.normal(keys[1], (N, D), jnp.float32)
    s_mask = (jax.random.uniform(keys[2], (N, N)) > 0.2).astype(jnp.float32)
    init_state = jnp.zeros((NUM_LAYERS, B, N, H), jnp.float32)

    params = []
    ki = 3
    for li in range(NUM_LAYERS):
        ci = DIM_IN if li == 0 else H
        gw = 0.1 * jax.random.normal(keys[ki], (D, K, ci + H, 2 * H), jnp.float32); ki += 1
        gb = 0.1 * jax.random.normal(keys[ki], (D, 2 * H), jnp.float32); ki += 1
        uw = 0.1 * jax.random.normal(keys[ki], (D, K, ci + H, H), jnp.float32); ki += 1
        ub = 0.1 * jax.random.normal(keys[ki], (D, H), jnp.float32); ki += 1
        params.append(dict(gw=gw, gb=gb, uw=uw, ub=ub))

    out, hiddens = avwdcrnn_forward(x, init_state, node_emb, s_mask, params,
                                    K, H, normalize=NORMALIZE)
    jax.block_until_ready(out)

    ref_out, ref_hid = _ref_forward(x, init_state, node_emb, s_mask, params,
                                    K, NORMALIZE, H)
    assert out.shape == (B, T, N, H)
    assert jnp.allclose(out, ref_out, atol=1e-3, rtol=1e-3), \
        float(jnp.max(jnp.abs(out - ref_out)))
    for a, b in zip(hiddens, ref_hid):
        assert jnp.allclose(a, b, atol=1e-3, rtol=1e-3)

    print("KERNEL_OK")
</pallas_src>

<mosaic_0001>
module attributes {stable_mosaic.version = 11 : i64} {
  func.func @kernel(%arg0: i32, %arg1: memref<16x8xf32, #tpu.memory_space<vmem>>, %arg2: memref<16x16xf32, #tpu.memory_space<vmem>>, %arg3: memref<8x28416xf32, #tpu.memory_space<vmem>>, %arg4: memref<48x16xf32, #tpu.memory_space<vmem>>, %arg5: memref<16x28416xf32, #tpu.memory_space<vmem>>) attributes {dimension_semantics = [#tpu.dimension_semantics<arbitrary>], iteration_bounds = array<i64: 1>, scalar_prefetch = 0 : i64, scratch_operands = 0 : i64, tpu.core_type = #tpu.core_type<tc>, window_params = [{pipeline_mode = #tpu.pipeline_mode<synchronous>, transform_indices = @transform_0, window_bounds = array<i64: 16, 8>}, {pipeline_mode = #tpu.pipeline_mode<synchronous>, transform_indices = @transform_1, window_bounds = array<i64: 16, 16>}, {pipeline_mode = #tpu.pipeline_mode<synchronous>, transform_indices = @transform_2, window_bounds = array<i64: 8, 28416>}, {pipeline_mode = #tpu.pipeline_mode<synchronous>, transform_indices = @transform_3, window_bounds = array<i64: 48, 16>}, {pipeline_mode = #tpu.pipeline_mode<synchronous>, transform_indices = @transform_4, window_bounds = array<i64: 16, 28416>}]} {
    %c0 = arith.constant 0 : index
    %c0_0 = arith.constant 0 : index
    %0 = vector.load %arg1[%c0, %c0_0] : memref<16x8xf32, #tpu.memory_space<vmem>>, vector<16x8xf32>
    %cst = arith.constant dense<0.000000e+00> : vector<16x16xf32>
    %1 = tpu.matmul %0, %0, %cst {dimension_numbers = #tpu.dot_dimension_numbers<[1], [1], [0], [0], [0, 0, 1, 0], [], []>} : vector<16x8xf32>, vector<16x8xf32>, vector<16x16xf32> -> vector<16x16xf32>
    %cst_1 = arith.constant 0.000000e+00 : f32
    %2 = vector.broadcast %cst_1 : f32 to vector<16x16xf32>
    %3 = arith.maximumf %1, %2 : vector<16x16xf32>
    %cst_2 = arith.constant dense<0xFF800000> : vector<16xf32>
    %4 = vector.multi_reduction <maximumf>, %3, %cst_2 [1] : vector<16x16xf32> to vector<16xf32>
    %5 = vector.shape_cast %4 : vector<16xf32> to vector<16x1xf32>
    %6 = vector.broadcast %5 : vector<16x1xf32> to vector<16x16xf32>
    %7 = arith.subf %3, %6 : vector<16x16xf32>
    %8 = math.exp %7 : vector<16x16xf32>
    %cst_3 = arith.constant dense<0.000000e+00> : vector<16xf32>
    %9 = vector.multi_reduction <add>, %8, %cst_3 [1] : vector<16x16xf32> to vector<16xf32>
    %10 = vector.shape_cast %9 : vector<16xf32> to vector<16x1xf32>
    %11 = vector.broadcast %10 : vector<16x1xf32> to vector<16x16xf32>
    %12 = arith.divf %8, %11 : vector<16x16xf32>
    %c0_4 = arith.constant 0 : index
    %c0_5 = arith.constant 0 : index
    %13 = vector.load %arg2[%c0_4, %c0_5] : memref<16x16xf32, #tpu.memory_space<vmem>>, vector<16x16xf32>
    %14 = arith.mulf %12, %13 : vector<16x16xf32>
    %15 = tpu.iota {dimensions = array<i32: 0>} : vector<16x16xi32>
    %16 = tpu.iota {dimensions = array<i32: 1>} : vector<16x16xi32>
    %17 = arith.cmpi eq, %15, %16 : vector<16x16xi32>
    %18 = arith.extui %17 : vector<16x16xi1> to vector<16x16xi32>
    %19 = arith.sitofp %18 : vector<16x16xi32> to vector<16x16xf32>
    %cst_6 = arith.constant dense<0.000000e+00> : vector<16x16xf32>
    %20 = tpu.matmul %14, %14, %cst_6 {dimension_numbers = #tpu.dot_dimension_numbers<[1], [0], [0], [1], [0, 0, 1, 1], [], []>} : vector<16x16xf32>, vector<16x16xf32>, vector<16x16xf32> -> vector<16x16xf32>
    %cst_7 = arith.constant 2.000000e+00 : f32
    %21 = vector.broadcast %cst_7 : f32 to vector<16x16xf32>
    %22 = arith.mulf %21, %20 : vector<16x16xf32>
    %23 = arith.subf %22, %19 : vector<16x16xf32>
    %c0_8 = arith.constant 0 : index
    %c0_9 = arith.constant 0 : index
    %24 = vector.load %arg4[%c0_8, %c0_9] : memref<48x16xf32, #tpu.memory_space<vmem>>, vector<16x16xf32>
    tpu.vector_store %arg4[%c0_8, %c0_9], %19 {strides = array<i32>} : memref<48x16xf32, #tpu.memory_space<vmem>>, vector<16x16xf32>,
    %c16 = arith.constant 16 : index
    %c0_10 = arith.constant 0 : index
    %25 = vector.load %arg4[%c16, %c0_10] : memref<48x16xf32, #tpu.memory_space<vmem>>, vector<16x16xf32>
    tpu.vector_store %arg4[%c16, %c0_10], %14 {strides = array<i32>} : memref<48x16xf32, #tpu.memory_space<vmem>>, vector<16x16xf32>,
    %c32 = arith.constant 32 : index
    %c0_11 = arith.constant 0 : index
    %26 = vector.load %arg4[%c32, %c0_11] : memref<48x16xf32, #tpu.memory_space<vmem>>, vector<16x16xf32>
    tpu.vector_store %arg4[%c32, %c0_11], %23 {strides = array<i32>} : memref<48x16xf32, #tpu.memory_space<vmem>>, vector<16x16xf32>,
    %c0_12 = arith.constant 0 : index
    %c0_13 = arith.constant 0 : index
    %27 = vector.load %arg3[%c0_12, %c0_13] : memref<8x28416xf32, #tpu.memory_space<vmem>>, vector<8x28416xf32>
    %cst_14 = arith.constant dense<0.000000e+00> : vector<16x28416xf32>
    %28 = tpu.matmul %0, %27, %cst_14 {dimension_numbers = #tpu.dot_dimension_numbers<[1], [0], [0], [1], [0, 0, 1, 1], [], []>} : vector<16x8xf32>, vector<8x28416xf32>, vector<16x28416xf32> -> vector<16x28416xf32>
    %c0_15 = arith.constant 0 : index
    %c0_16 = arith.constant 0 : index
    %29 = vector.load %arg5[%c0_15, %c0_16] : memref<16x28416xf32, #tpu.memory_space<vmem>>, vector<16x28416xf32>
    tpu.vector_store %arg5[%c0_15, %c0_16], %28 {strides = array<i32>} : memref<16x28416xf32, #tpu.memory_space<vmem>>, vector<16x28416xf32>,
    return
  }
  func.func @transform_0(%arg0: i32) -> (i32, i32) {
    %c0_i32 = arith.constant 0 : i32
    %c0_i32_0 = arith.constant 0 : i32
    %c0_i32_1 = arith.constant 0 : i32
    return %c0_i32, %c0_i32_0 : i32, i32
  }
  func.func @transform_1(%arg0: i32) -> (i32, i32) {
    %c0_i32 = arith.constant 0 : i32
    %c0_i32_0 = arith.constant 0 : i32
    %c0_i32_1 = arith.constant 0 : i32
    return %c0_i32, %c0_i32_0 : i32, i32
  }
  func.func @transform_2(%arg0: i32) -> (i32, i32) {
    %c0_i32 = arith.constant 0 : i32
    %c0_i32_0 = arith.constant 0 : i32
    %c0_i32_1 = arith.constant 0 : i32
    return %c0_i32, %c0_i32_0 : i32, i32
  }
  func.func @transform_3(%arg0: i32) -> (i32, i32) {
    %c0_i32 = arith.constant 0 : i32
    %c0_i32_0 = arith.constant 0 : i32
    %c0_i32_1 = arith.constant 0 : i32
    return %c0_i32, %c0_i32_0 : i32, i32
  }
  func.func @transform_4(%arg0: i32) -> (i32, i32) {
    %c0_i32 = arith.constant 0 : i32
    %c0_i32_0 = arith.constant 0 : i32
    %c0_i32_1 = arith.constant 0 : i32
    return %c0_i32, %c0_i32_0 : i32, i32
  }
}

</mosaic_0001>

<bundles_post_ra>
// kernel: tpu_custom_call.1
= control target key start
LH: loop header
LB: loop body
LE: loop exit
PB: predicated region body
PF: predicated region fallthrough
CT: control target
= control target key end

     0   :  { %10 = vsyncpa [#allocation3], 0  ;;  %s10634_s0 = inlined_call_operand.vmem [shape: f32[16,8], index: 0, kind: input, shape index: {}]   ;;  %s10635_s1 = inlined_call_operand.hbm [shape: f32[16,16], index: 1, kind: input, shape index: {}]   ;;  %s10636_s2 = inlined_call_operand.hbm [shape: f32[8,28416], index: 2, kind: input, shape index: {}]   ;;  %s10637_s3 = inlined_call_operand.vmem [shape: f32[48,16], index: 3, kind: output, shape index: {0}]   ;;  %s10638_s4 = inlined_call_operand.hbm [shape: f32[16,28416], index: 4, kind: output, shape index: {1}]  }
   0x1   :  { %11 = vsyncpa [#allocation6], 0 }
   0x2   :  { %12 = vsyncpa [#allocation4], 0  ;;  %s9833_s15 = smov [#allocation2]  }
   0x3   :  { %s20_s16 = sshll.u32 %s9833_s15, 4  ;;  %s21_s16 = int_to_ptr.vmem [resolvable:$true] %s20_s16 }
   0x4   :  { %s9775_s17 = scalar_lea.vmem %s21_s16, 256  ;;  %p9780_p1 = scmp.lt.s32.totalorder %s21_s16, %s21_s16 }
   0x5   :  { %p9776_p0 = scmp.ne.s32.totalorder %s21_s16, %s9775_s17  ;;  %p9781_p2 = scmp.lt.s32.totalorder %s9775_s17, %s9775_s17 }
   0x7   :  { %p9782_p3 = por %p9781_p2, %p9780_p1 }
   0x9   :  { %p9783_p4 = pnand %p9782_p3, %p9776_p0 }
   0xb   :  { %9786 = shalt.err (!%p9783_p4)
}
   0xc   :  { %s9834_s18 = smov 128   ;;  %s9835_s19 = smov 8  }
   0xd   :  { %26 = dma.hbm_to_vmem [thread:$0]  %s10635_s1, 256, %s21_s16, [#allocation3], %s9834_s18, %s9834_s18, %s9835_s19  }
   0xe   :  { %s9836_s22 = smov [#allocation5]  }
   0xf   :  { %s33_s23 = sshll.u32 %s9836_s22, 4  ;;  %s34_s23 = int_to_ptr.vmem [resolvable:$true] %s33_s23 }
  0x10   :  { %s9795_s24 = scalar_lea.vmem %s34_s23, 28416  ;;  %p9800_p6 = scmp.lt.s32.totalorder %s34_s23, %s34_s23 }
  0x11   :  { %p9796_p5 = scmp.ne.s32.totalorder %s34_s23, %s9795_s24  ;;  %p9801_p7 = scmp.lt.s32.totalorder %s9795_s24, %s9795_s24 }
  0x13   :  { %p9802_p8 = por %p9801_p7, %p9800_p6 }
  0x15   :  { %p9803_p9 = pnand %p9802_p8, %p9796_p5 }
  0x17   :  { %9806 = shalt.err (!%p9803_p9)
}
  0x18   :  { %36 = dma.hbm_to_vmem [thread:$0]  %s10636_s2, 28416, %s34_s23, [#allocation6]  }
  0x19   :  { %9827 = dma.done.wait [#allocation3], 256  }
  0x1a   :  { %9828 = vsyncadd [#allocation3], 4294967040 }
  0x1b   :  { %9829 = dma.done.wait [#allocation6], 28416  }
  0x1c   :  { %9830 = vsyncadd [#allocation6], 4294938880  ;;  %vm45_vm0 = vcmask 64512   ;;  %v9875_v0 = vld [vmem:[%s10634_s0 + $0x8] sm:$0xff]  ;;  %v9880_v1 = vld [vmem:[%s10634_s0] sm:$0xff]  ;;  %vm129_vm1 = vcmask 130048  }
  0x1d   :  { %9731 = vmatprep.subr.msk.mxu0 %vm45_vm0, %v9875_v0  ;;  %9735 = vmatprep.mubr.msk.f32.mxu0 %vm45_vm0, %v9880_v1  ;;  %v9837_v18 = vmov 0.0   ;;  %v261_v19 = vld [vmem:[#allocation5 + $0x18] sm:$0xff]  ;;  %v260_v20 = vld [vmem:[#allocation5 + $0x10] sm:$0xff]  ;;  %v259_v61 = vld [vmem:[#allocation5 + $0x8] sm:$0xff] }
  0x1e   :  { %9732 = vmatpush3.xpose.msk.msra.mxu0 %vm45_vm0, %v9875_v0  ;;  %v265_v21 = vld [vmem:[#allocation5 + $0x38] sm:$0xff]  ;;  %v264_v22 = vld [vmem:[#allocation5 + $0x30] sm:$0xff]  ;;  %v258_v62 = vld [vmem:[#allocation5] sm:$0xff] }
  0x1f   :  { %9733 = vmatprep.subr.msk.mxu0 %vm45_vm0, %v9880_v1  ;;  %v269_v23 = vld [vmem:[#allocation5 + $0x58] sm:$0xff]  ;;  %v268_v24 = vld [vmem:[#allocation5 + $0x50] sm:$0xff]  ;;  %v263_v63 = vld [vmem:[#allocation5 + $0x28] sm:$0xff] }
  0x20   :  { %v273_v25 = vld [vmem:[#allocation5 + $0x78] sm:$0xff]  ;;  %v272_v26 = vld [vmem:[#allocation5 + $0x70] sm:$0xff] }
  0x21   :  { %v277_v27 = vld [vmem:[#allocation5 + $0x98] sm:$0xff]  ;;  %v276_v28 = vld [vmem:[#allocation5 + $0x90] sm:$0xff] }
  0x22   :  { %9734 = vmatpush3.xpose.msk.msra.mxu0 %vm45_vm0, %v9880_v1  ;;  %v281_v29 = vld [vmem:[#allocation5 + $0xb8] sm:$0xff]  ;;  %v280_v30 = vld [vmem:[#allocation5 + $0xb0] sm:$0xff] }
  0x23   :  { %587 = vmatprep.subr.mxu0 %v261_v19  ;;  %v285_v31 = vld [vmem:[#allocation5 + $0xd8] sm:$0xff]  ;;  %v284_v32 = vld [vmem:[#allocation5 + $0xd0] sm:$0xff]  ;;  %v278_v19 = vld [vmem:[#allocation5 + $0xa0] sm:$0xff] }
  0x24   :  { %v289_v33 = vld [vmem:[#allocation5 + $0xf8] sm:$0xff]  ;;  %v288_v34 = vld [vmem:[#allocation5 + $0xf0] sm:$0xff] }
  0x25   :  { %9736 = vmatmul.mubr.msk.f32.vlgmr.msra.gmra.mxu0 %vm45_vm0, %v9875_v0  ;;  %v293_v35 = vld [vmem:[#allocation5 + $0x118] sm:$0xff]  ;;  %v292_v36 = vld [vmem:[#allocation5 + $0x110] sm:$0xff] }
  0x26   :  { %621 = vmatprep.mubr.f32.mxu0 %v9837_v18  ;;  %588 = vmatpush1.msra.mxu0 %v260_v20  ;;  %v297_v37 = vld [vmem:[#allocation5 + $0x138] sm:$0xff]  ;;  %v296_v38 = vld [vmem:[#allocation5 + $0x130] sm:$0xff]  ;;  %v283_v20 = vld [vmem:[#allocation5 + $0xc8] sm:$0xff] }
  0x27   :  { %741 = vmatprep.subr.mxu0 %v265_v21  ;;  %v301_v39 = vld [vmem:[#allocation5 + $0x158] sm:$0xff]  ;;  %v300_v40 = vld [vmem:[#allocation5 + $0x150] sm:$0xff] }
  0x28   :  { %v305_v41 = vld [vmem:[#allocation5 + $0x178] sm:$0xff]  ;;  %v304_v42 = vld [vmem:[#allocation5 + $0x170] sm:$0xff] }
  0x29   :  { %9503 = vmatmul.mubr.msk.f32.vlgmr.msra.gmra.mxu0 %vm45_vm0, %v9880_v1  ;;  %v309_v43 = vld [vmem:[#allocation5 + $0x198] sm:$0xff]  ;;  %v308_v44 = vld [vmem:[#allocation5 + $0x190] sm:$0xff] }
  0x2a   :  { %627 = vmatprep.mubr.f32.mxu0 %v9837_v18  ;;  %742 = vmatpush1.msra.mxu0 %v264_v22  ;;  %v313_v47 = vld [vmem:[#allocation5 + $0x1b8] sm:$0xff]  ;;  %v312_v48 = vld [vmem:[#allocation5 + $0x1b0] sm:$0xff] }
  0x2b   :  { %895 = vmatprep.subr.mxu0 %v269_v23  ;;  %v317_v49 = vld [vmem:[#allocation5 + $0x1d8] sm:$0xff]  ;;  %v316_v50 = vld [vmem:[#allocation5 + $0x1d0] sm:$0xff]  ;;  %v282_v23 = vld [vmem:[#allocation5 + $0xc0] sm:$0xff] }
  0x2c   :  { %v153_v52 = vld [vmem:[#allocation2 + $0x8] sm:$0xff]  ;;  %v152_v56 = vld [vmem:[#allocation2] sm:$0xff] }
  0x2d   :  { %9504 = vmatmul.mubr.msk.f32.gmra.mxu0 %vm45_vm0, %v9875_v0  ;;  %v321_v59 = vld [vmem:[#allocation5 + $0x1f8] sm:$0xff]  ;;  %v320_v60 = vld [vmem:[#allocation5 + $0x1f0] sm:$0xff] }
  0x2e   :  { %775 = vmatprep.mubr.f32.mxu0 %v9837_v18  ;;  %v341_v21 = vld [vmem:[#allocation5 + $0x298] sm:$0xff]  ;;  %v340_v22 = vld [vmem:[#allocation5 + $0x290] sm:$0xff] }
  0x31   :  { %9507 = vmatmul.mubr.msk.f32.vlgmr.msra.gmra.mxu0 %vm45_vm0, %v9880_v1 }
  0x32   :  { %781 = vmatprep.mubr.f32.mxu0 %v9837_v18  ;;  %896 = vmatpush1.msra.mxu0 %v268_v24  ;;  %v287_v24 = vld [vmem:[#allocation5 + $0xe8] sm:$0xff] }
  0x33   :  { %1049 = vmatprep.subr.mxu0 %v273_v25  ;;  %v345_v25 = vld [vmem:[#allocation5 + $0x2b8] sm:$0xff] }
  0x35   :  { %9508 = vmatmul.mubr.msk.f32.gmra.mxu0 %vm45_vm0, %v9875_v0 }
  0x36   :  { %929 = vmatprep.mubr.f32.mxu0 %v9837_v18 }
  0x39   :  { %9511 = vmatmul.mubr.msk.f32.vlgmr.msra.gmra.mxu0 %vm45_vm0, %v9880_v1 }
  0x3a   :  { %935 = vmatprep.mubr.f32.mxu0 %v9837_v18  ;;  %1050 = vmatpush1.msra.mxu0 %v272_v26  ;;  %v344_v26 = vld [vmem:[#allocation5 + $0x2b0] sm:$0xff] }
  0x3b   :  { %1203 = vmatprep.subr.mxu0 %v277_v27  ;;  %v286_v27 = vld [vmem:[#allocation5 + $0xe0] sm:$0xff] }
  0x3d   :  { %9512 = vmatmul.mubr.msk.f32.gmra.mxu0 %vm45_vm0, %v9875_v0 }
  0x3e   :  { %1083 = vmatprep.mubr.f32.mxu0 %v9837_v18 }
  0x41   :  { %9515 = vmatmul.mubr.msk.f32.vlgmr.msra.gmra.mxu0 %vm45_vm0, %v9880_v1 }
  0x42   :  { %1089 = vmatprep.mubr.f32.mxu0 %v9837_v18  ;;  %1204 = vmatpush1.msra.mxu0 %v276_v28  ;;  %v291_v28 = vld [vmem:[#allocation5 + $0x108] sm:$0xff] }
  0x43   :  { %1357 = vmatprep.subr.mxu0 %v281_v29  ;;  %v349_v29 = vld [vmem:[#allocation5 + $0x2d8] sm:$0xff] }
  0x45   :  { %9516 = vmatmul.mubr.msk.f32.gmra.mxu0 %vm45_vm0, %v9875_v0 }
  0x46   :  { %1237 = vmatprep.mubr.f32.mxu0 %v9837_v18 }
  0x49   :  { %9519 = vmatmul.mubr.msk.f32.vlgmr.msra.gmra.mxu0 %vm45_vm0, %v9880_v1 }
  0x4a   :  { %1243 = vmatprep.mubr.f32.mxu0 %v9837_v18  ;;  %1358 = vmatpush1.msra.mxu0 %v280_v30  ;;  %v348_v30 = vld [vmem:[#allocation5 + $0x2d0] sm:$0xff] }
  0x4b   :  { %1511 = vmatprep.subr.mxu0 %v285_v31  ;;  %v290_v31 = vld [vmem:[#allocation5 + $0x100] sm:$0xff] }
  0x4d   :  { %9520 = vmatmul.mubr.msk.f32.gmra.mxu0 %vm45_vm0, %v9875_v0 }
  0x4e   :  { %1391 = vmatprep.mubr.f32.mxu0 %v9837_v18 }
  0x51   :  { %9523 = vmatmul.mubr.msk.f32.vlgmr.msra.gmra.mxu0 %vm45_vm0, %v9880_v1 }
  0x52   :  { %1397 = vmatprep.mubr.f32.mxu0 %v9837_v18  ;;  %1512 = vmatpush1.msra.mxu0 %v284_v32  ;;  %v295_v32 = vld [vmem:[#allocation5 + $0x128] sm:$0xff] }
  0x53   :  { %1665 = vmatprep.subr.mxu0 %v289_v33  ;;  %v156_v33 = vlaneseq }
  0x55   :  { %9524 = vmatmul.mubr.msk.f32.gmra.mxu0 %vm45_vm0, %v9875_v0 }
  0x56   :  { %1545 = vmatprep.mubr.f32.mxu0 %v9837_v18 }
  0x59   :  { %9527 = vmatmul.mubr.msk.f32.vlgmr.msra.gmra.mxu0 %vm45_vm0, %v9880_v1 }
  0x5a   :  { %1551 = vmatprep.mubr.f32.mxu0 %v9837_v18  ;;  %1666 = vmatpush1.msra.mxu0 %v288_v34  ;;  %v353_v34 = vld [vmem:[#allocation5 + $0x2f8] sm:$0xff] }
  0x5b   :  { %1819 = vmatprep.subr.mxu0 %v293_v35  ;;  %v352_v35 = vld [vmem:[#allocation5 + $0x2f0] sm:$0xff] }
  0x5d   :  { %9528 = vmatmul.mubr.msk.f32.gmra.mxu0 %vm45_vm0, %v9875_v0 }
  0x5e   :  { %1699 = vmatprep.mubr.f32.mxu0 %v9837_v18 }
  0x61   :  { %9531 = vmatmul.mubr.msk.f32.vlgmr.msra.gmra.mxu0 %vm45_vm0, %v9880_v1 }
  0x62   :  { %1705 = vmatprep.mubr.f32.mxu0 %v9837_v18  ;;  %1820 = vmatpush1.msra.mxu0 %v292_v36  ;;  %v157_v36 = vshrl.u32 %v156_v33, 7 }
  0x63   :  { %1973 = vmatprep.subr.mxu0 %v297_v37  ;;  %v160_v37 = vand.u32 127, %v156_v33  ;;  %v327_v33 = vld [vmem:[#allocation5 + $0x228] sm:$0xff] }
  0x65   :  { %9532 = vmatmul.mubr.msk.f32.gmra.mxu0 %vm45_vm0, %v9875_v0  ;;  %vm161_vm3 = vcmp.eq.s32.totalorder %v157_v36, %v160_v37 }
  0x66   :  { %1853 = vmatprep.mubr.f32.mxu0 %v9837_v18 }
  0x69   :  { %9535 = vmatmul.mubr.msk.f32.vlgmr.msra.gmra.mxu0 %vm45_vm0, %v9880_v1 }
  0x6a   :  { %1859 = vmatprep.mubr.f32.mxu0 %v9837_v18  ;;  %1974 = vmatpush1.msra.mxu0 %v296_v38  ;;  %v158_v38 = vadd.s32 8, %v157_v36 }
  0x6b   :  { %2127 = vmatprep.subr.mxu0 %v301_v39  ;;  %v294_v39 = vld [vmem:[#allocation5 + $0x120] sm:$0xff] }
  0x6c   :  { %vm162_vm2 = vcmp.eq.s32.totalorder %v158_v38, %v160_v37  ;;  %v384_v37 = vld [vmem:[#allocation5 + $0x3f0] sm:$0xff] }
  0x6d   :  { %9536 = vmatmul.mubr.msk.f32.gmra.mxu0 %vm45_vm0, %v9875_v0 }
  0x6e   :  { %2007 = vmatprep.mubr.f32.mxu0 %v9837_v18 }
  0x71   :  { %9539 = vmatmul.mubr.msk.f32.vlgmr.msra.gmra.mxu0 %vm45_vm0, %v9880_v1 }
  0x72   :  { %2013 = vmatprep.mubr.f32.mxu0 %v9837_v18  ;;  %2128 = vmatpush1.msra.mxu0 %v300_v40  ;;  %v10104_v40 = vsel %vm162_vm2, 1.0, %v9837_v18 }
  0x73   :  { %2281 = vmatprep.subr.mxu0 %v305_v41  ;;  %v299_v41 = vld [vmem:[#allocation5 + $0x148] sm:$0xff]  ;;  %253 = vst.msk [vmem:[%s10637_s3 + $0x8] sm:$0xff] %vm129_vm1, %v10104_v40 }
  0x75   :  { %9540 = vmatmul.mubr.msk.f32.gmra.mxu0 %vm45_vm0, %v9875_v0 }
  0x76   :  { %2161 = vmatprep.mubr.f32.mxu0 %v9837_v18 }
  0x79   :  { %9543 = vmatmul.mubr.msk.f32.vlgmr.msra.gmra.mxu0 %vm45_vm0, %v9880_v1 }
  0x7a   :  { %2167 = vmatprep.mubr.f32.mxu0 %v9837_v18  ;;  %2282 = vmatpush1.msra.mxu0 %v304_v42  ;;  %v10115_v42 = vsel %vm161_vm3, 1.0, %v9837_v18 }
  0x7b   :  { %2435 = vmatprep.subr.mxu0 %v309_v43  ;;  %252 = vst.msk [vmem:[%s10637_s3] sm:$0xff] %vm129_vm1, %v10115_v42  ;;  %v357_v43 = vld [vmem:[#allocation5 + $0x318] sm:$0xff] }
  0x7d   :  { %9544 = vmatmul.mubr.msk.f32.gmra.mxu0 %vm45_vm0, %v9875_v0 }
  0x7e   :  { %2315 = vmatprep.mubr.f32.mxu0 %v9837_v18 }
  0x81   :  { %9547 = vmatmul.mubr.msk.f32.vlgmr.msra.gmra.mxu0 %vm45_vm0, %v9880_v1 }
  0x82   :  { %2321 = vmatprep.mubr.f32.mxu0 %v9837_v18  ;;  %2436 = vmatpush1.msra.mxu0 %v308_v44  ;;  %v356_v44 = vld [vmem:[#allocation5 + $0x310] sm:$0xff] }
  0x83   :  { %2589 = vmatprep.subr.mxu0 %v313_v47  ;;  %v303_v47 = vld [vmem:[#allocation5 + $0x168] sm:$0xff] }
  0x85   :  { %9548 = vmatmul.mubr.msk.f32.gmra.mxu0 %vm45_vm0, %v9875_v0 }
  0x86   :  { %2469 = vmatprep.mubr.f32.mxu0 %v9837_v18 }
  0x89   :  { %9551 = vmatmul.mubr.msk.f32.vlgmr.msra.gmra.mxu0 %vm45_vm0, %v9880_v1 }
  0x8a   :  { %2475 = vmatprep.mubr.f32.mxu0 %v9837_v18  ;;  %2590 = vmatpush1.msra.mxu0 %v312_v48 }
  0x8b   :  { %2743 = vmatprep.subr.mxu0 %v317_v49  ;;  %v361_v49 = vld [vmem:[#allocation5 + $0x338] sm:$0xff] }
  0x8d   :  { %9552 = vmatmul.mubr.msk.f32.gmra.mxu0 %vm45_vm0, %v9875_v0 }
  0x8e   :  { %2623 = vmatprep.mubr.f32.mxu0 %v9837_v18 }
  0x91   :  { %9555 = vmatmul.mubr.msk.f32.vlgmr.msra.gmra.mxu0 %vm45_vm0, %v9880_v1 }
  0x92   :  { %2629 = vmatprep.mubr.f32.mxu0 %v9837_v18  ;;  %2744 = vmatpush1.msra.mxu0 %v316_v50  ;;  %v360_v50 = vld [vmem:[#allocation5 + $0x330] sm:$0xff] }
  0x93   :  { %2897 = vmatprep.subr.mxu0 %v321_v59 }
  0x95   :  { %9556 = vmatmul.mubr.msk.f32.gmra.mxu0 %vm45_vm0, %v9875_v0 }
  0x96   :  { %2777 = vmatprep.mubr.f32.mxu0 %v9837_v18 }
  0x99   :  { %9559 = vmatmul.mubr.msk.f32.vlgmr.msra.gmra.mxu0 %vm45_vm0, %v9880_v1 }
  0x9a   :  { %2783 = vmatprep.mubr.f32.mxu0 %v9837_v18  ;;  %2898 = vmatpush1.msra.mxu0 %v320_v60 }
  0x9d   :  { %9560 = vmatmul.mubr.msk.f32.gmra.mxu0 %vm45_vm0, %v9875_v0 }
  0x9e   :  { %2931 = vmatprep.mubr.f32.mxu0 %v9837_v18 }
  0xa1   :  { %9563 = vmatmul.mubr.msk.f32.vlgmr.msra.gmra.mxu0 %vm45_vm0, %v9880_v1 }
  0xa2   :  { %2937 = vmatprep.mubr.f32.mxu0 %v9837_v18 }
  0xa5   :  { %9564 = vmatmul.mubr.msk.f32.gmra.mxu0 %vm45_vm0, %v9875_v0 }
  0xa6   :  { %3085 = vmatprep.mubr.f32.mxu0 %v9837_v18 }
  0xe5   :  { %v9737_v2 = vpop.f32.mrf.mxu0 }
  0xe6   :  { %v128_v3 = vmax.f32 %v9737_v2, 0.0  ;;  %v262_v2 = vld [vmem:[#allocation5 + $0x20] sm:$0xff] }
  0xe7   :  { %v118_v4 = vpop.f32.mrf.mxu0 }
  0xe8   :  { %v127_v5 = vmax.f32 %v118_v4, 0.0  ;;  %v133_v6 = vsel %vm129_vm1, %v128_v3, -inf  ;;  %v325_v4 = vld [vmem:[#allocation5 + $0x218] sm:$0xff] }
  0xe9   :  { %134 = vmax.xlane.f32.xlu0 %v133_v6  ;;  %3051 = vmatprep.subr.mxu0 %v325_v4  ;;  %v266_v6 = vld [vmem:[#allocation5 + $0x40] sm:$0xff]  ;;  %v368_v4 = vld [vmem:[#allocation5 + $0x370] sm:$0xff] }
  0xea   :  { %v130_v7 = vsel %vm129_vm1, %v127_v5, -inf }
  0xed   :  { %131 = vmax.xlane.f32.xlu0 %v130_v7  ;;  %v271_v7 = vld [vmem:[#allocation5 + $0x68] sm:$0xff] }
 0x172   :  { %v135_v8 = vpop.xlane.xlu0 %134 }
 0x173   :  { %v137_v9 = vsub.f32 %v128_v3, %v135_v8  ;;  %v267_v3 = vld [vmem:[#allocation5 + $0x48] sm:$0xff]  ;;  %v329_v8 = vld [vmem:[#allocation5 + $0x238] sm:$0xff] }
 0x175   :  { %v140_v10 = vmul.f32 1.442695, %v137_v9  ;;  %v328_v9 = vld [vmem:[#allocation5 + $0x230] sm:$0xff] }
 0x176   :  { %v132_v11 = vpop.xlane.xlu0 %131 }
 0x177   :  { %9753 = vpow2.f32 %v140_v10  ;;  %v136_v12 = vsub.f32 %v127_v5, %v132_v11  ;;  %v324_v5 = vld [vmem:[#allocation5 + $0x210] sm:$0xff]  ;;  %v270_v10 = vld [vmem:[#allocation5 + $0x60] sm:$0xff]  ;;  %v275_v11 = vld [vmem:[#allocation5 + $0x88] sm:$0xff] }
 0x178   :  { %3052 = vmatpush1.msra.mxu0 %v324_v5 }
 0x179   :  { %v138_v13 = vmul.f32 1.442695, %v136_v12  ;;  %9567 = vmatmul.mubr.msk.f32.vlgmr.msra.gmra.mxu0 %vm45_vm0, %v9880_v1  ;;  %3205 = vmatprep.subr.mxu0 %v329_v8  ;;  %v333_v12 = vld [vmem:[#allocation5 + $0x258] sm:$0xff]  ;;  %v315_v8 = vld [vmem:[#allocation5 + $0x1c8] sm:$0xff] }
 0x17a   :  { %3091 = vmatprep.mubr.f32.mxu0 %v9837_v18  ;;  %3206 = vmatpush1.msra.mxu0 %v328_v9 }
 0x17b   :  { %9755 = vpow2.f32 %v138_v13  ;;  %v332_v13 = vld [vmem:[#allocation5 + $0x250] sm:$0xff]  ;;  %3359 = vmatprep.subr.mxu0 %v333_v12 }
 0x17c   :  { %v372_v12 = vld [vmem:[#allocation5 + $0x390] sm:$0xff] }
 0x17d   :  { %9568 = vmatmul.mubr.msk.f32.gmra.mxu0 %vm45_vm0, %v9875_v0 }
 0x17e   :  { %3239 = vmatprep.mubr.f32.mxu0 %v9837_v18 }
 0x181   :  { %9571 = vmatmul.mubr.msk.f32.vlgmr.msra.gmra.mxu0 %vm45_vm0, %v9880_v1 }
 0x182   :  { %3245 = vmatprep.mubr.f32.mxu0 %v9837_v18  ;;  %3360 = vmatpush1.msra.mxu0 %v332_v13 }
 0x184   :  { %v9896_v14 = vpop.eup %9753 }
 0x185   :  { %v145_v15 = vsel %vm129_vm1, %v9896_v14, 0.0  ;;  %9572 = vmatmul.mubr.msk.f32.gmra.mxu0 %vm45_vm0, %v9875_v0 }
 0x186   :  { %146 = vadd.xlane.f32.xlu1 %v145_v15  ;;  %v279_v15 = vld [vmem:[#allocation5 + $0xa8] sm:$0xff]  ;;  %3393 = vmatprep.mubr.f32.mxu0 %v9837_v18 }
 0x188   :  { %v9900_v16 = vpop.eup %9755 }
 0x189   :  { %v142_v17 = vsel %vm129_vm1, %v9900_v16, 0.0  ;;  %9575 = vmatmul.mubr.msk.f32.vlgmr.msra.gmra.mxu0 %vm45_vm0, %v9880_v1 }
 0x18a   :  { %143 = vadd.xlane.f32.xlu1 %v142_v17  ;;  %v336_v17 = vld [vmem:[#allocation5 + $0x270] sm:$0xff]  ;;  %3399 = vmatprep.mubr.f32.mxu0 %v9837_v18 }
 0x18d   :  { %9576 = vmatmul.mubr.msk.f32.gmra.mxu0 %vm45_vm0, %v9875_v0 }
 0x18e   :  { %3547 = vmatprep.mubr.f32.mxu0 %v9837_v18 }
 0x20f   :  { %v147_v45 = vpop.xlane.xlu1 %146 }
 0x210   :  { %9757 = vrcp.f32 %v147_v45  ;;  %v298_v45 = vld [vmem:[#allocation5 + $0x140] sm:$0xff] }
 0x213   :  { %v144_v46 = vpop.xlane.xlu1 %143 }
 0x214   :  { %9759 = vrcp.f32 %v144_v46  ;;  %v623_v46 = vpop.f32.mrf.mxu0 }
 0x215   :  { %9029 = vst [vmem:[#allocation7 + $0x10] sm:$0xff] %v623_v46 }
 0x216   :  { %v625_v48 = vpop.f32.mrf.mxu0 }
 0x217   :  { %9030 = vst [vmem:[#allocation7 + $0x18] sm:$0xff] %v625_v48  ;;  %v10230_v48 = vld [vmem:[%s10634_s0 + $0x8] sm:$0xff] }
 0x21d   :  { %v9758_v51 = vpop.eup %9757 }
 0x21e   :  { %v151_v53 = vmul.f32 %v9758_v51, %v9896_v14  ;;  %v274_v14 = vld [vmem:[#allocation5 + $0x80] sm:$0xff]  ;;  %v629_v51 = vpop.f32.mrf.mxu0 }
 0x21f   :  { %9251 = vst [vmem:[#allocation7 + $0x700] sm:$0xff] %v629_v51  ;;  %v335_v51 = vld [vmem:[#allocation5 + $0x268] sm:$0xff] }
 0x220   :  { %v155_v54 = vmul.f32 %v153_v52, %v151_v53  ;;  %v631_v52 = vpop.f32.mrf.mxu0  ;;  %v302_v53 = vld [vmem:[#allocation5 + $0x160] sm:$0xff] }
 0x221   :  { %v9760_v55 = vpop.eup %9759  ;;  %9252 = vst [vmem:[#allocation7 + $0x708] sm:$0xff] %v631_v52 }
 0x222   :  { %9738 = vmatprep.subr.mxu1 %v155_v54  ;;  %255 = vst.msk [vmem:[%s10637_s3 + $0x18] sm:$0xff] %vm129_vm1, %v155_v54  ;;  %v149_v57 = vmul.f32 %v9760_v55, %v9900_v16  ;;  %v337_v16 = vld [vmem:[#allocation5 + $0x278] sm:$0xff]  ;;  %v777_v55 = vpop.f32.mrf.mxu0 }
 0x223   :  { %9739 = vmatpush3.msra.mxu1 %v155_v54  ;;  %3513 = vmatprep.subr.mxu0 %v337_v16  ;;  %9033 = vst [vmem:[#allocation7 + $0x30] sm:$0xff] %v777_v55  ;;  %v319_v16 = vld [vmem:[#allocation5 + $0x1e8] sm:$0xff]  ;;  %v392_v55 = vld [vmem:[#allocation5 + $0x430] sm:$0xff] }
 0x224   :  { %v154_v58 = vmul.f32 %v152_v56, %v149_v57  ;;  %3514 = vmatpush1.msra.mxu0 %v336_v17  ;;  %v365_v56 = vld [vmem:[#allocation5 + $0x358] sm:$0xff]  ;;  %v779_v57 = vpop.f32.mrf.mxu0 }
 0x225   :  { %9579 = vmatmul.mubr.msk.f32.vlgmr.msra.gmra.mxu0 %vm45_vm0, %v9880_v1  ;;  %3667 = vmatprep.subr.mxu0 %v341_v21  ;;  %9034 = vst [vmem:[#allocation7 + $0x38] sm:$0xff] %v779_v57  ;;  %v376_v21 = vld [vmem:[#allocation5 + $0x3b0] sm:$0xff] }
 0x226   :  { %9740 = vmatprep.subr.mxu1 %v154_v58  ;;  %254 = vst.msk [vmem:[%s10637_s3 + $0x10] sm:$0xff] %vm129_vm1, %v154_v58  ;;  %9742 = vmatprep.mubr.msk.f32.mxu1 %vm129_vm1, %v154_v58  ;;  %v783_v59 = vpop.f32.mrf.mxu0 }
 0x227   :  { %9741 = vmatpush3.msra.mxu1 %v154_v58  ;;  %3553 = vmatprep.mubr.f32.mxu0 %v9837_v18  ;;  %v364_v58 = vld [vmem:[#allocation5 + $0x350] sm:$0xff]  ;;  %9255 = vst [vmem:[#allocation7 + $0x720] sm:$0xff] %v783_v59  ;;  %v339_v59 = vld [vmem:[#allocation5 + $0x288] sm:$0xff] }
 0x228   :  { %9743 = vmatmul.mubr.msk.f32.vlgmr.msra.gmra.mxu1 %vm129_vm1, %v155_v54  ;;  %510 = vmatprep.subr.mxu1 %v259_v61  ;;  %v307_v54 = vld [vmem:[#allocation5 + $0x188] sm:$0xff]  ;;  %v785_v60 = vpop.f32.mrf.mxu0  ;;  %v306_v61 = vld [vmem:[#allocation5 + $0x180] sm:$0xff] }
 0x229   :  { %511 = vmatpush1.msra.mxu1 %v258_v62  ;;  %544 = vmatprep.mubr.f32.mxu1 %v9837_v18  ;;  %9256 = vst [vmem:[#allocation7 + $0x728] sm:$0xff] %v785_v60  ;;  %v311_v62 = vld [vmem:[#allocation5 + $0x1a8] sm:$0xff] }
 0x22a   :  { %664 = vmatprep.subr.mxu1 %v263_v63  ;;  %3668 = vmatpush1.msra.mxu0 %v340_v22  ;;  %v931_v63 = vpop.f32.mrf.mxu0 }
 0x22b   :  { %9580 = vmatmul.mubr.msk.f32.gmra.mxu0 %vm45_vm0, %v9875_v0  ;;  %3821 = vmatprep.subr.mxu0 %v345_v25  ;;  %9037 = vst [vmem:[#allocation7 + $0x50] sm:$0xff] %v931_v63  ;;  %v323_v25 = vld [vmem:[#allocation5 + $0x208] sm:$0xff]  ;;  %v396_v63 = vld [vmem:[#allocation5 + $0x450] sm:$0xff] }
 0x22c   :  { %9501 = vmatmul.mubr.msk.f32.vlgmr.msra.gmra.mxu1 %vm45_vm0, %v9880_v1  ;;  %3701 = vmatprep.mubr.f32.mxu0 %v9837_v18 }
 0x22d   :  { %665 = vmatpush1.msra.mxu1 %v262_v2  ;;  %550 = vmatprep.mubr.f32.mxu1 %v9837_v18  ;;  %v369_v2 = vld [vmem:[#allocation5 + $0x378] sm:$0xff] }
 0x22e   :  { %818 = vmatprep.subr.mxu1 %v267_v3  ;;  %v933_v3 = vpop.f32.mrf.mxu0 }
 0x22f   :  { %9583 = vmatmul.mubr.msk.f32.vlgmr.msra.gmra.mxu0 %vm45_vm0, %v9880_v1  ;;  %9038 = vst [vmem:[#allocation7 + $0x58] sm:$0xff] %v933_v3 }
 0x230   :  { %9502 = vmatmul.mubr.msk.f32.gmra.mxu1 %vm45_vm0, %v9875_v0  ;;  %3707 = vmatprep.mubr.f32.mxu0 %v9837_v18  ;;  %v937_v5 = vpop.f32.mrf.mxu0 }
 0x231   :  { %698 = vmatprep.mubr.f32.mxu1 %v9837_v18  ;;  %3822 = vmatpush1.msra.mxu0 %v344_v26  ;;  %9259 = vst [vmem:[#allocation7 + $0x740] sm:$0xff] %v937_v5  ;;  %v343_v5 = vld [vmem:[#allocation5 + $0x2a8] sm:$0xff] }
 0x232   :  { %3975 = vmatprep.subr.mxu0 %v349_v29  ;;  %v380_v29 = vld [vmem:[#allocation5 + $0x3d0] sm:$0xff] }
 0x233   :  { %9584 = vmatmul.mubr.msk.f32.gmra.mxu0 %vm45_vm0, %v9875_v0 }
 0x234   :  { %9505 = vmatmul.mubr.msk.f32.vlgmr.msra.gmra.mxu1 %vm45_vm0, %v9880_v1  ;;  %3855 = vmatprep.mubr.f32.mxu0 %v9837_v18 }
 0x235   :  { %819 = vmatpush1.msra.mxu1 %v266_v6  ;;  %704 = vmatprep.mubr.f32.mxu1 %v9837_v18  ;;  %v939_v6 = vpop.f32.mrf.mxu0 }
 0x236   :  { %972 = vmatprep.subr.mxu1 %v271_v7  ;;  %v310_v7 = vld [vmem:[#allocation5 + $0x1a0] sm:$0xff]  ;;  %9260 = vst [vmem:[#allocation7 + $0x748] sm:$0xff] %v939_v6 }
 0x237   :  { %9587 = vmatmul.mubr.msk.f32.vlgmr.msra.gmra.mxu0 %vm45_vm0, %v9880_v1  ;;  %v1085_v9 = vpop.f32.mrf.mxu0 }
 0x238   :  { %9506 = vmatmul.mubr.msk.f32.gmra.mxu1 %vm45_vm0, %v9875_v0  ;;  %3861 = vmatprep.mubr.f32.mxu0 %v9837_v18  ;;  %9041 = vst [vmem:[#allocation7 + $0x70] sm:$0xff] %v1085_v9  ;;  %v400_v9 = vld [vmem:[#allocation5 + $0x470] sm:$0xff] }
 0x239   :  { %852 = vmatprep.mubr.f32.mxu1 %v9837_v18  ;;  %3976 = vmatpush1.msra.mxu0 %v348_v30 }
 0x23a   :  { %4129 = vmatprep.subr.mxu0 %v353_v34 }
 0x23b   :  { %9588 = vmatmul.mubr.msk.f32.gmra.mxu0 %vm45_vm0, %v9875_v0 }
 0x23c   :  { %9509 = vmatmul.mubr.msk.f32.vlgmr.msra.gmra.mxu1 %vm45_vm0, %v9880_v1  ;;  %4009 = vmatprep.mubr.f32.mxu0 %v9837_v18 }
 0x23d   :  { %973 = vmatpush1.msra.mxu1 %v270_v10  ;;  %858 = vmatprep.mubr.f32.mxu1 %v9837_v18  ;;  %v373_v10 = vld [vmem:[#allocation5 + $0x398] sm:$0xff] }
 0x23e   :  { %1126 = vmatprep.subr.mxu1 %v275_v11  ;;  %v1087_v11 = vpop.f32.mrf.mxu0 }
 0x23f   :  { %9591 = vmatmul.mubr.msk.f32.vlgmr.msra.gmra.mxu0 %vm45_vm0, %v9880_v1  ;;  %9042 = vst [vmem:[#allocation7 + $0x78] sm:$0xff] %v1087_v11 }
 0x240   :  { %9510 = vmatmul.mubr.msk.f32.gmra.mxu1 %vm45_vm0, %v9875_v0  ;;  %4015 = vmatprep.mubr.f32.mxu0 %v9837_v18  ;;  %v1091_v13 = vpop.f32.mrf.mxu0 }
 0x241   :  { %1006 = vmatprep.mubr.f32.mxu1 %v9837_v18  ;;  %4130 = vmatpush1.msra.mxu0 %v352_v35  ;;  %9263 = vst [vmem:[#allocation7 + $0x760] sm:$0xff] %v1091_v13  ;;  %v385_v35 = vld [vmem:[#allocation5 + $0x3f8] sm:$0xff]  ;;  %v347_v13 = vld [vmem:[#allocation5 + $0x2c8] sm:$0xff] }
 0x242   :  { %4283 = vmatprep.subr.mxu0 %v357_v43  ;;  %v331_v43 = vld [vmem:[#allocation5 + $0x248] sm:$0xff] }
 0x243   :  { %9592 = vmatmul.mubr.msk.f32.gmra.mxu0 %vm45_vm0, %v9875_v0 }
 0x244   :  { %9513 = vmatmul.mubr.msk.f32.vlgmr.msra.gmra.mxu1 %vm45_vm0, %v9880_v1  ;;  %4163 = vmatprep.mubr.f32.mxu0 %v9837_v18 }
 0x245   :  { %1127 = vmatpush1.msra.mxu1 %v274_v14  ;;  %1012 = vmatprep.mubr.f32.mxu1 %v9837_v18  ;;  %v1093_v14 = vpop.f32.mrf.mxu0 }
 0x246   :  { %1280 = vmatprep.subr.mxu1 %v279_v15  ;;  %v314_v15 = vld [vmem:[#allocation5 + $0x1c0] sm:$0xff]  ;;  %9264 = vst [vmem:[#allocation7 + $0x768] sm:$0xff] %v1093_v14 }
 0x247   :  { %9595 = vmatmul.mubr.msk.f32.vlgmr.msra.gmra.mxu0 %vm45_vm0, %v9880_v1  ;;  %v1239_v17 = vpop.f32.mrf.mxu0 }
 0x248   :  { %9514 = vmatmul.mubr.msk.f32.gmra.mxu1 %vm45_vm0, %v9875_v0  ;;  %4169 = vmatprep.mubr.f32.mxu0 %v9837_v18  ;;  %9045 = vst [vmem:[#allocation7 + $0x90] sm:$0xff] %v1239_v17  ;;  %v404_v17 = vld [vmem:[#allocation5 + $0x490] sm:$0xff] }
 0x249   :  { %1160 = vmatprep.mubr.f32.mxu1 %v9837_v18  ;;  %4284 = vmatpush1.msra.mxu0 %v356_v44 }
 0x24a   :  { %4437 = vmatprep.subr.mxu0 %v361_v49 }
 0x24b   :  { %9596 = vmatmul.mubr.msk.f32.gmra.mxu0 %vm45_vm0, %v9875_v0 }
 0x24c   :  { %9517 = vmatmul.mubr.msk.f32.vlgmr.msra.gmra.mxu1 %vm45_vm0, %v9880_v1  ;;  %4317 = vmatprep.mubr.f32.mxu0 %v9837_v18 }
 0x24d   :  { %1281 = vmatpush1.msra.mxu1 %v278_v19  ;;  %1166 = vmatprep.mubr.f32.mxu1 %v9837_v18  ;;  %v377_v19 = vld [vmem:[#allocation5 + $0x3b8] sm:$0xff] }
 0x24e   :  { %1434 = vmatprep.subr.mxu1 %v283_v20  ;;  %v1241_v20 = vpop.f32.mrf.mxu0 }
 0x24f   :  { %9599 = vmatmul.mubr.msk.f32.vlgmr.msra.gmra.mxu0 %vm45_vm0, %v9880_v1  ;;  %9046 = vst [vmem:[#allocation7 + $0x98] sm:$0xff] %v1241_v20 }
 0x250   :  { %9518 = vmatmul.mubr.msk.f32.gmra.mxu1 %vm45_vm0, %v9875_v0  ;;  %4323 = vmatprep.mubr.f32.mxu0 %v9837_v18  ;;  %v1245_v22 = vpop.f32.mrf.mxu0 }
 0x251   :  { %1314 = vmatprep.mubr.f32.mxu1 %v9837_v18  ;;  %4438 = vmatpush1.msra.mxu0 %v360_v50  ;;  %9267 = vst [vmem:[#allocation7 + $0x780] sm:$0xff] %v1245_v22  ;;  %v330_v50 = vld [vmem:[#allocation5 + $0x240] sm:$0xff]  ;;  %v351_v22 = vld [vmem:[#allocation5 + $0x2e8] sm:$0xff] }
 0x252   :  { %4591 = vmatprep.subr.mxu0 %v365_v56 }
 0x253   :  { %9600 = vmatmul.mubr.msk.f32.gmra.mxu0 %vm45_vm0, %v9875_v0 }
 0x254   :  { %9521 = vmatmul.mubr.msk.f32.vlgmr.msra.gmra.mxu1 %vm45_vm0, %v9880_v1  ;;  %4471 = vmatprep.mubr.f32.mxu0 %v9837_v18 }
 0x255   :  { %1435 = vmatpush1.msra.mxu1 %v282_v23  ;;  %1320 = vmatprep.mubr.f32.mxu1 %v9837_v18  ;;  %v1247_v23 = vpop.f32.mrf.mxu0 }
 0x256   :  { %1588 = vmatprep.subr.mxu1 %v287_v24  ;;  %v318_v24 = vld [vmem:[#allocation5 + $0x1e0] sm:$0xff]  ;;  %9268 = vst [vmem:[#allocation7 + $0x788] sm:$0xff] %v1247_v23 }
 0x257   :  { %9603 = vmatmul.mubr.msk.f32.vlgmr.msra.gmra.mxu0 %vm45_vm0, %v9880_v1  ;;  %v1393_v26 = vpop.f32.mrf.mxu0 }
 0x258   :  { %9522 = vmatmul.mubr.msk.f32.gmra.mxu1 %vm45_vm0, %v9875_v0  ;;  %4477 = vmatprep.mubr.f32.mxu0 %v9837_v18  ;;  %9049 = vst [vmem:[#allocation7 + $0xb0] sm:$0xff] %v1393_v26  ;;  %v408_v26 = vld [vmem:[#allocation5 + $0x4b0] sm:$0xff] }
 0x259   :  { %1468 = vmatprep.mubr.f32.mxu1 %v9837_v18  ;;  %4592 = vmatpush1.msra.mxu0 %v364_v58  ;;  %v334_v58 = vld [vmem:[#allocation5 + $0x260] sm:$0xff] }
 0x25a   :  { %4745 = vmatprep.subr.mxu0 %v369_v2 }
 0x25b   :  { %9604 = vmatmul.mubr.msk.f32.gmra.mxu0 %vm45_vm0, %v9875_v0 }
 0x25c   :  { %9525 = vmatmul.mubr.msk.f32.vlgmr.msra.gmra.mxu1 %vm45_vm0, %v9880_v1  ;;  %4625 = vmatprep.mubr.f32.mxu0 %v9837_v18 }
 0x25d   :  { %1589 = vmatpush1.msra.mxu1 %v286_v27  ;;  %1474 = vmatprep.mubr.f32.mxu1 %v9837_v18  ;;  %v381_v27 = vld [vmem:[#allocation5 + $0x3d8] sm:$0xff] }
 0x25e   :  { %1742 = vmatprep.subr.mxu1 %v291_v28  ;;  %v1395_v28 = vpop.f32.mrf.mxu0 }
 0x25f   :  { %9607 = vmatmul.mubr.msk.f32.vlgmr.msra.gmra.mxu0 %vm45_vm0, %v9880_v1  ;;  %9050 = vst [vmem:[#allocation7 + $0xb8] sm:$0xff] %v1395_v28 }
 0x260   :  { %9526 = vmatmul.mubr.msk.f32.gmra.mxu1 %vm45_vm0, %v9875_v0  ;;  %4631 = vmatprep.mubr.f32.mxu0 %v9837_v18  ;;  %v1399_v30 = vpop.f32.mrf.mxu0 }
 0x261   :  { %1622 = vmatprep.mubr.f32.mxu1 %v9837_v18  ;;  %4746 = vmatpush1.msra.mxu0 %v368_v4  ;;  %9271 = vst [vmem:[#allocation7 + $0x7a0] sm:$0xff] %v1399_v30  ;;  %v338_v4 = vld [vmem:[#allocation5 + $0x280] sm:$0xff]  ;;  %v355_v30 = vld [vmem:[#allocation5 + $0x308] sm:$0xff] }
 0x262   :  { %4899 = vmatprep.subr.mxu0 %v373_v10 }
 0x263   :  { %9608 = vmatmul.mubr.msk.f32.gmra.mxu0 %vm45_vm0, %v9875_v0 }
 0x264   :  { %9529 = vmatmul.mubr.msk.f32.vlgmr.msra.gmra.mxu1 %vm45_vm0, %v9880_v1  ;;  %4779 = vmatprep.mubr.f32.mxu0 %v9837_v18 }
 0x265   :  { %1743 = vmatpush1.msra.mxu1 %v290_v31  ;;  %1628 = vmatprep.mubr.f32.mxu1 %v9837_v18  ;;  %v1401_v31 = vpop.f32.mrf.mxu0 }
 0x266   :  { %1896 = vmatprep.subr.mxu1 %v295_v32  ;;  %v322_v32 = vld [vmem:[#allocation5 + $0x200] sm:$0xff]  ;;  %9272 = vst [vmem:[#allocation7 + $0x7a8] sm:$0xff] %v1401_v31 }
 0x267   :  { %9611 = vmatmul.mubr.msk.f32.vlgmr.msra.gmra.mxu0 %vm45_vm0, %v9880_v1  ;;  %v1547_v34 = vpop.f32.mrf.mxu0 }
 0x268   :  { %9530 = vmatmul.mubr.msk.f32.gmra.mxu1 %vm45_vm0, %v9875_v0  ;;  %4785 = vmatprep.mubr.f32.mxu0 %v9837_v18  ;;  %9053 = vst [vmem:[#allocation7 + $0xd0] sm:$0xff] %v1547_v34  ;;  %v412_v34 = vld [vmem:[#allocation5 + $0x4d0] sm:$0xff] }
 0x269   :  { %1776 = vmatprep.mubr.f32.mxu1 %v9837_v18  ;;  %4900 = vmatpush1.msra.mxu0 %v372_v12  ;;  %v1549_v36 = vpop.f32.mrf.mxu0  ;;  %v342_v12 = vld [vmem:[#allocation5 + $0x2a0] sm:$0xff] }
 0x26a   :  { %5053 = vmatprep.subr.mxu0 %v377_v19  ;;  %9054 = vst [vmem:[#allocation7 + $0xd8] sm:$0xff] %v1549_v36 }
 0x26b   :  { %9612 = vmatmul.mubr.msk.f32.gmra.mxu0 %vm45_vm0, %v9875_v0  ;;  %v1553_v38 = vpop.f32.mrf.mxu0 }
 0x26c   :  { %9533 = vmatmul.mubr.msk.f32.vlgmr.msra.gmra.mxu1 %vm45_vm0, %v9880_v1  ;;  %4933 = vmatprep.mubr.f32.mxu0 %v9837_v18  ;;  %9275 = vst [vmem:[#allocation7 + $0x7c0] sm:$0xff] %v1553_v38  ;;  %v359_v38 = vld [vmem:[#allocation5 + $0x328] sm:$0xff] }
 0x26d   :  { %1897 = vmatpush1.msra.mxu1 %v294_v39  ;;  %1782 = vmatprep.mubr.f32.mxu1 %v9837_v18  ;;  %v1555_v39 = vpop.f32.mrf.mxu0 }
 0x26e   :  { %2050 = vmatprep.subr.mxu1 %v299_v41  ;;  %v326_v41 = vld [vmem:[#allocation5 + $0x220] sm:$0xff]  ;;  %9276 = vst [vmem:[#allocation7 + $0x7c8] sm:$0xff] %v1555_v39 }
 0x26f   :  { %9615 = vmatmul.mubr.msk.f32.vlgmr.msra.gmra.mxu0 %vm45_vm0, %v9880_v1  ;;  %v1701_v44 = vpop.f32.mrf.mxu0 }
 0x270   :  { %9534 = vmatmul.mubr.msk.f32.gmra.mxu1 %vm45_vm0, %v9875_v0  ;;  %4939 = vmatprep.mubr.f32.mxu0 %v9837_v18  ;;  %9057 = vst [vmem:[#allocation7 + $0xf0] sm:$0xff] %v1701_v44  ;;  %v416_v44 = vld [vmem:[#allocation5 + $0x4f0] sm:$0xff] }
 0x271   :  { %1930 = vmatprep.mubr.f32.mxu1 %v9837_v18  ;;  %5054 = vmatpush1.msra.mxu0 %v376_v21  ;;  %v1703_v46 = vpop.f32.mrf.mxu0  ;;  %v346_v21 = vld [vmem:[#allocation5 + $0x2c0] sm:$0xff] }
 0x272   :  { %5207 = vmatprep.subr.mxu0 %v381_v27  ;;  %9058 = vst [vmem:[#allocation7 + $0xf8] sm:$0xff] %v1703_v46 }
 0x273   :  { %9616 = vmatmul.mubr.msk.f32.gmra.mxu0 %vm45_vm0, %v9875_v0 }
 0x274   :  { %9537 = vmatmul.mubr.msk.f32.vlgmr.msra.gmra.mxu1 %vm45_vm0, %v9880_v1  ;;  %5087 = vmatprep.mubr.f32.mxu0 %v9837_v18 }
 0x275   :  { %2051 = vmatpush1.msra.mxu1 %v298_v45  ;;  %1936 = vmatprep.mubr.f32.mxu1 %v9837_v18  ;;  %v389_v45 = vld [vmem:[#allocation5 + $0x418] sm:$0xff] }
 0x276   :  { %2204 = vmatprep.subr.mxu1 %v303_v47  ;;  %v388_v47 = vld [vmem:[#allocation5 + $0x410] sm:$0xff] }
 0x277   :  { %9619 = vmatmul.mubr.msk.f32.vlgmr.msra.gmra.mxu0 %vm45_vm0, %v9880_v1 }
 0x278   :  { %9538 = vmatmul.mubr.msk.f32.gmra.mxu1 %vm45_vm0, %v9875_v0  ;;  %5093 = vmatprep.mubr.f32.mxu0 %v9837_v18 }
 0x279   :  { %2084 = vmatprep.mubr.f32.mxu1 %v9837_v18  ;;  %5208 = vmatpush1.msra.mxu0 %v380_v29  ;;  %v350_v29 = vld [vmem:[#allocation5 + $0x2e0] sm:$0xff] }
 0x27a   :  { %5361 = vmatprep.subr.mxu0 %v385_v35 }
 0x27b   :  { %9620 = vmatmul.mubr.msk.f32.gmra.mxu0 %vm45_vm0, %v9875_v0 }
 0x27c   :  { %9541 = vmatmul.mubr.msk.f32.vlgmr.msra.gmra.mxu1 %vm45_vm0, %v9880_v1  ;;  %5241 = vmatprep.mubr.f32.mxu0 %v9837_v18 }
 0x27d   :  { %2205 = vmatpush1.msra.mxu1 %v302_v53  ;;  %2090 = vmatprep.mubr.f32.mxu1 %v9837_v18  ;;  %v393_v53 = vld [vmem:[#allocation5 + $0x438] sm:$0xff] }
 0x27e   :  { %2358 = vmatprep.subr.mxu1 %v307_v54 }
 0x27f   :  { %9623 = vmatmul.mubr.msk.f32.vlgmr.msra.gmra.mxu0 %vm45_vm0, %v9880_v1 }
 0x280   :  { %9542 = vmatmul.mubr.msk.f32.gmra.mxu1 %vm45_vm0, %v9875_v0  ;;  %5247 = vmatprep.mubr.f32.mxu0 %v9837_v18 }
 0x281   :  { %2238 = vmatprep.mubr.f32.mxu1 %v9837_v18  ;;  %5362 = vmatpush1.msra.mxu0 %v384_v37  ;;  %v354_v37 = vld [vmem:[#allocation5 + $0x300] sm:$0xff] }
 0x282   :  { %5515 = vmatprep.subr.mxu0 %v389_v45 }
 0x283   :  { %9624 = vmatmul.mubr.msk.f32.gmra.mxu0 %vm45_vm0, %v9875_v0 }
 0x284   :  { %9545 = vmatmul.mubr.msk.f32.vlgmr.msra.gmra.mxu1 %vm45_vm0, %v9880_v1  ;;  %5395 = vmatprep.mubr.f32.mxu0 %v9837_v18 }
 0x285   :  { %2359 = vmatpush1.msra.mxu1 %v306_v61  ;;  %2244 = vmatprep.mubr.f32.mxu1 %v9837_v18  ;;  %v397_v61 = vld [vmem:[#allocation5 + $0x458] sm:$0xff] }
 0x286   :  { %2512 = vmatprep.subr.mxu1 %v311_v62 }
 0x288   :  { %9546 = vmatmul.mubr.msk.f32.gmra.mxu1 %vm45_vm0, %v9875_v0 }
 0x289   :  { %2392 = vmatprep.mubr.f32.mxu1 %v9837_v18 }
 0x28c   :  { %9549 = vmatmul.mubr.msk.f32.vlgmr.msra.gmra.mxu1 %vm45_vm0, %v9880_v1 }
 0x28d   :  { %2513 = vmatpush1.msra.mxu1 %v310_v7  ;;  %2398 = vmatprep.mubr.f32.mxu1 %v9837_v18  ;;  %v401_v7 = vld [vmem:[#allocation5 + $0x478] sm:$0xff] }
 0x28e   :  { %2666 = vmatprep.subr.mxu1 %v315_v8 }
 0x290   :  { %9550 = vmatmul.mubr.msk.f32.gmra.mxu1 %vm45_vm0, %v9875_v0 }
 0x291   :  { %2546 = vmatprep.mubr.f32.mxu1 %v9837_v18 }
 0x294   :  { %9553 = vmatmul.mubr.msk.f32.vlgmr.msra.gmra.mxu1 %vm45_vm0, %v9880_v1 }
 0x295   :  { %2667 = vmatpush1.msra.mxu1 %v314_v15  ;;  %2552 = vmatprep.mubr.f32.mxu1 %v9837_v18  ;;  %v405_v15 = vld [vmem:[#allocation5 + $0x498] sm:$0xff] }
 0x296   :  { %2820 = vmatprep.subr.mxu1 %v319_v16 }
 0x298   :  { %9554 = vmatmul.mubr.msk.f32.gmra.mxu1 %vm45_vm0, %v9875_v0 }
 0x299   :  { %2700 = vmatprep.mubr.f32.mxu1 %v9837_v18 }
 0x29c   :  { %9557 = vmatmul.mubr.msk.f32.vlgmr.msra.gmra.mxu1 %vm45_vm0, %v9880_v1 }
 0x29d   :  { %2821 = vmatpush1.msra.mxu1 %v318_v24  ;;  %2706 = vmatprep.mubr.f32.mxu1 %v9837_v18  ;;  %v409_v24 = vld [vmem:[#allocation5 + $0x4b8] sm:$0xff] }
 0x29e   :  { %2974 = vmatprep.subr.mxu1 %v323_v25 }
 0x2a0   :  { %9558 = vmatmul.mubr.msk.f32.gmra.mxu1 %vm45_vm0, %v9875_v0 }
 0x2a1   :  { %2854 = vmatprep.mubr.f32.mxu1 %v9837_v18 }
 0x2a4   :  { %9561 = vmatmul.mubr.msk.f32.vlgmr.msra.gmra.mxu1 %vm45_vm0, %v9880_v1 }
 0x2a5   :  { %2975 = vmatpush1.msra.mxu1 %v322_v32  ;;  %2860 = vmatprep.mubr.f32.mxu1 %v9837_v18  ;;  %v413_v32 = vld [vmem:[#allocation5 + $0x4d8] sm:$0xff] }
 0x2a6   :  { %3128 = vmatprep.subr.mxu1 %v327_v33 }
 0x2a8   :  { %9562 = vmatmul.mubr.msk.f32.gmra.mxu1 %vm45_vm0, %v9875_v0  ;;  %v10222_v0 = vld [vmem:[%s10634_s0] sm:$0xff] }
 0x2a9   :  { %3008 = vmatprep.mubr.f32.mxu1 %v9837_v18  ;;  %9627 = vmatmul.mubr.msk.f32.vlgmr.msra.gmra.mxu0 %vm45_vm0, %v10222_v0 }
 0x2aa   :  { %5401 = vmatprep.mubr.f32.mxu0 %v9837_v18  ;;  %5516 = vmatpush1.msra.mxu0 %v388_v47 }
 0x2ab   :  { %5669 = vmatprep.subr.mxu0 %v393_v53 }
 0x2ac   :  { %9565 = vmatmul.mubr.msk.f32.vlgmr.msra.gmra.mxu1 %vm45_vm0, %v9880_v1  ;;  %v1707_v1 = vpop.f32.mrf.mxu0 }
 0x2ad   :  { %3129 = vmatpush1.msra.mxu1 %v326_v41  ;;  %3014 = vmatprep.mubr.f32.mxu1 %v9837_v18  ;;  %9279 = vst [vmem:[#allocation7 + $0x7e0] sm:$0xff] %v1707_v1  ;;  %v417_v41 = vld [vmem:[#allocation5 + $0x4f8] sm:$0xff]  ;;  %v358_v1 = vld [vmem:[#allocation5 + $0x320] sm:$0xff] }
 0x2ae   :  { %3282 = vmatprep.subr.mxu1 %v331_v43  ;;  %v1709_v49 = vpop.f32.mrf.mxu0  ;;  %9628 = vmatmul.mubr.msk.f32.gmra.mxu0 %vm45_vm0, %v10230_v48 }
 0x2af   :  { %9280 = vst [vmem:[#allocation7 + $0x7e8] sm:$0xff] %v1709_v49  ;;  %5549 = vmatprep.mubr.f32.mxu0 %v9837_v18 }
 0x2b0   :  { %9566 = vmatmul.mubr.msk.f32.gmra.mxu1 %vm45_vm0, %v10230_v48  ;;  %v1855_v52 = vpop.f32.mrf.mxu0 }
 0x2b1   :  { %3162 = vmatprep.mubr.f32.mxu1 %v9837_v18  ;;  %9061 = vst [vmem:[#allocation7 + $0x110] sm:$0xff] %v1855_v52  ;;  %v363_v52 = vld [vmem:[#allocation5 + $0x348] sm:$0xff] }
 0x2b2   :  { %v1857_v54 = vpop.f32.mrf.mxu0  ;;  %9631 = vmatmul.mubr.msk.f32.vlgmr.msra.gmra.mxu0 %vm45_vm0, %v10222_v0 }
 0x2b3   :  { %9062 = vst [vmem:[#allocation7 + $0x118] sm:$0xff] %v1857_v54  ;;  %5555 = vmatprep.mubr.f32.mxu0 %v9837_v18  ;;  %5670 = vmatpush1.msra.mxu0 %v392_v55 }
 0x2b4   :  { %9569 = vmatmul.mubr.msk.f32.vlgmr.msra.gmra.mxu1 %vm45_vm0, %v10222_v0  ;;  %v1861_v56 = vpop.f32.mrf.mxu0  ;;  %5823 = vmatprep.subr.mxu0 %v397_v61  ;;  %v362_v61 = vld [vmem:[#allocation5 + $0x340] sm:$0xff] }
 0x2b5   :  { %3283 = vmatpush1.msra.mxu1 %v330_v50  ;;  %3168 = vmatprep.mubr.f32.mxu1 %v9837_v18  ;;  %9283 = vst [vmem:[#allocation7 + $0x800] sm:$0xff] %v1861_v56  ;;  %v420_v56 = vld [vmem:[#allocation5 + $0x510] sm:$0xff] }
 0x2b6   :  { %3436 = vmatprep.subr.mxu1 %v335_v51  ;;  %v1863_v57 = vpop.f32.mrf.mxu0  ;;  %9632 = vmatmul.mubr.msk.f32.gmra.mxu0 %vm45_vm0, %v10230_v48 }
 0x2b7   :  { %9284 = vst [vmem:[#allocation7 + $0x808] sm:$0xff] %v1863_v57  ;;  %5703 = vmatprep.mubr.f32.mxu0 %v9837_v18 }
 0x2b8   :  { %9570 = vmatmul.mubr.msk.f32.gmra.mxu1 %vm45_vm0, %v10230_v48  ;;  %v2009_v60 = vpop.f32.mrf.mxu0 }
 0x2b9   :  { %3316 = vmatprep.mubr.f32.mxu1 %v9837_v18  ;;  %9065 = vst [vmem:[#allocation7 + $0x130] sm:$0xff] %v2009_v60 }
 0x2ba   :  { %v2011_v62 = vpop.f32.mrf.mxu0  ;;  %9635 = vmatmul.mubr.msk.f32.vlgmr.msra.gmra.mxu0 %vm45_vm0, %v10222_v0 }
 0x2bb   :  { %9066 = vst [vmem:[#allocation7 + $0x138] sm:$0xff] %v2011_v62  ;;  %5709 = vmatprep.mubr.f32.mxu0 %v9837_v18  ;;  %5824 = vmatpush1.msra.mxu0 %v396_v63  ;;  %v367_v63 = vld [vmem:[#allocation5 + $0x368] sm:$0xff] }
 0x2bc   :  { %9573 = vmatmul.mubr.msk.f32.vlgmr.msra.gmra.mxu1 %vm45_vm0, %v10222_v0  ;;  %v2015_v2 = vpop.f32.mrf.mxu0  ;;  %5977 = vmatprep.subr.mxu0 %v401_v7 }
 0x2bd   :  { %3437 = vmatpush1.msra.mxu1 %v334_v58  ;;  %3322 = vmatprep.mubr.f32.mxu1 %v9837_v18  ;;  %9287 = vst [vmem:[#allocation7 + $0x820] sm:$0xff] %v2015_v2 }
 0x2be   :  { %3590 = vmatprep.subr.mxu1 %v339_v59  ;;  %v2017_v3 = vpop.f32.mrf.mxu0  ;;  %9636 = vmatmul.mubr.msk.f32.gmra.mxu0 %vm45_vm0, %v10230_v48 }
 0x2bf   :  { %9288 = vst [vmem:[#allocation7 + $0x828] sm:$0xff] %v2017_v3  ;;  %5857 = vmatprep.mubr.f32.mxu0 %v9837_v18 }
 0x2c0   :  { %9574 = vmatmul.mubr.msk.f32.gmra.mxu1 %vm45_vm0, %v10230_v48  ;;  %v2163_v6 = vpop.f32.mrf.mxu0 }
 0x2c1   :  { %3470 = vmatprep.mubr.f32.mxu1 %v9837_v18  ;;  %9069 = vst [vmem:[#allocation7 + $0x150] sm:$0xff] %v2163_v6 }
 0x2c2   :  { %v2165_v8 = vpop.f32.mrf.mxu0  ;;  %9639 = vmatmul.mubr.msk.f32.vlgmr.msra.gmra.mxu0 %vm45_vm0, %v10222_v0 }
 0x2c3   :  { %9070 = vst [vmem:[#allocation7 + $0x158] sm:$0xff] %v2165_v8  ;;  %5863 = vmatprep.mubr.f32.mxu0 %v9837_v18  ;;  %5978 = vmatpush1.msra.mxu0 %v400_v9 }
 0x2c4   :  { %9577 = vmatmul.mubr.msk.f32.vlgmr.msra.gmra.mxu1 %vm45_vm0, %v10222_v0  ;;  %v2169_v10 = vpop.f32.mrf.mxu0  ;;  %6131 = vmatprep.subr.mxu0 %v405_v15 }
 0x2c5   :  { %3591 = vmatpush1.msra.mxu1 %v338_v4  ;;  %3476 = vmatprep.mubr.f32.mxu1 %v9837_v18  ;;  %9291 = vst [vmem:[#allocation7 + $0x840] sm:$0xff] %v2169_v10  ;;  %v425_v4 = vld [vmem:[#allocation5 + $0x538] sm:$0xff] }
 0x2c6   :  { %3744 = vmatprep.subr.mxu1 %v343_v5  ;;  %v2171_v11 = vpop.f32.mrf.mxu0  ;;  %9640 = vmatmul.mubr.msk.f32.gmra.mxu0 %vm45_vm0, %v10230_v48  ;;  %v424_v5 = vld [vmem:[#allocation5 + $0x530] sm:$0xff] }
 0x2c7   :  { %9292 = vst [vmem:[#allocation7 + $0x848] sm:$0xff] %v2171_v11  ;;  %6011 = vmatprep.mubr.f32.mxu0 %v9837_v18  ;;  %v366_v11 = vld [vmem:[#allocation5 + $0x360] sm:$0xff] }
 0x2c8   :  { %9578 = vmatmul.mubr.msk.f32.gmra.mxu1 %vm45_vm0, %v10230_v48  ;;  %v2317_v14 = vpop.f32.mrf.mxu0 }
 0x2c9   :  { %3624 = vmatprep.mubr.f32.mxu1 %v9837_v18  ;;  %9073 = vst [vmem:[#allocation7 + $0x170] sm:$0xff] %v2317_v14 }
 0x2ca   :  { %v2319_v16 = vpop.f32.mrf.mxu0  ;;  %9643 = vmatmul.mubr.msk.f32.vlgmr.msra.gmra.mxu0 %vm45_vm0, %v10222_v0 }
 0x2cb   :  { %9074 = vst [vmem:[#allocation7 + $0x178] sm:$0xff] %v2319_v16  ;;  %6017 = vmatprep.mubr.f32.mxu0 %v9837_v18  ;;  %6132 = vmatpush1.msra.mxu0 %v404_v17  ;;  %v429_v16 = vld [vmem:[#allocation5 + $0x558] sm:$0xff]  ;;  %v428_v17 = vld [vmem:[#allocation5 + $0x550] sm:$0xff] }
 0x2cc   :  { %9581 = vmatmul.mubr.msk.f32.vlgmr.msra.gmra.mxu1 %vm45_vm0, %v10222_v0  ;;  %v2323_v19 = vpop.f32.mrf.mxu0  ;;  %6285 = vmatprep.subr.mxu0 %v409_v24  ;;  %v370_v24 = vld [vmem:[#allocation5 + $0x380] sm:$0xff] }
 0x2cd   :  { %3745 = vmatpush1.msra.mxu1 %v342_v12  ;;  %3630 = vmatprep.mubr.f32.mxu1 %v9837_v18  ;;  %9295 = vst [vmem:[#allocation7 + $0x860] sm:$0xff] %v2323_v19 }
 0x2ce   :  { %3898 = vmatprep.subr.mxu1 %v347_v13  ;;  %v2325_v20 = vpop.f32.mrf.mxu0  ;;  %9644 = vmatmul.mubr.msk.f32.gmra.mxu0 %vm45_vm0, %v10230_v48  ;;  %v371_v13 = vld [vmem:[#allocation5 + $0x388] sm:$0xff] }
 0x2cf   :  { %9296 = vst [vmem:[#allocation7 + $0x868] sm:$0xff] %v2325_v20  ;;  %6165 = vmatprep.mubr.f32.mxu0 %v9837_v18 }
 0x2d0   :  { %9582 = vmatmul.mubr.msk.f32.gmra.mxu1 %vm45_vm0, %v10230_v48  ;;  %v2471_v23 = vpop.f32.mrf.mxu0 }
 0x2d1   :  { %3778 = vmatprep.mubr.f32.mxu1 %v9837_v18  ;;  %9077 = vst [vmem:[#allocation7 + $0x190] sm:$0xff] %v2471_v23 }
 0x2d2   :  { %v2473_v25 = vpop.f32.mrf.mxu0  ;;  %9647 = vmatmul.mubr.msk.f32.vlgmr.msra.gmra.mxu0 %vm45_vm0, %v10222_v0 }
 0x2d3   :  { %9078 = vst [vmem:[#allocation7 + $0x198] sm:$0xff] %v2473_v25  ;;  %6171 = vmatprep.mubr.f32.mxu0 %v9837_v18  ;;  %6286 = vmatpush1.msra.mxu0 %v408_v26  ;;  %v375_v26 = vld [vmem:[#allocation5 + $0x3a8] sm:$0xff] }
 0x2d4   :  { %9585 = vmatmul.mubr.msk.f32.vlgmr.msra.gmra.mxu1 %vm45_vm0, %v10222_v0  ;;  %v2477_v27 = vpop.f32.mrf.mxu0  ;;  %6439 = vmatprep.subr.mxu0 %v413_v32 }
 0x2d5   :  { %3899 = vmatpush1.msra.mxu1 %v346_v21  ;;  %3784 = vmatprep.mubr.f32.mxu1 %v9837_v18  ;;  %9299 = vst [vmem:[#allocation7 + $0x880] sm:$0xff] %v2477_v27 }
 0x2d6   :  { %4052 = vmatprep.subr.mxu1 %v351_v22  ;;  %v2479_v28 = vpop.f32.mrf.mxu0  ;;  %9648 = vmatmul.mubr.msk.f32.gmra.mxu0 %vm45_vm0, %v10230_v48 }
 0x2d7   :  { %9300 = vst [vmem:[#allocation7 + $0x888] sm:$0xff] %v2479_v28  ;;  %6319 = vmatprep.mubr.f32.mxu0 %v9837_v18 }
 0x2d8   :  { %9586 = vmatmul.mubr.msk.f32.gmra.mxu1 %vm45_vm0, %v10230_v48  ;;  %v2625_v31 = vpop.f32.mrf.mxu0 }
 0x2d9   :  { %3932 = vmatprep.mubr.f32.mxu1 %v9837_v18  ;;  %9081 = vst [vmem:[#allocation7 + $0x1b0] sm:$0xff] %v2625_v31 }
 0x2da   :  { %v2627_v33 = vpop.f32.mrf.mxu0  ;;  %9651 = vmatmul.mubr.msk.f32.vlgmr.msra.gmra.mxu0 %vm45_vm0, %v10222_v0 }
 0x2db   :  { %9082 = vst [vmem:[#allocation7 + $0x1b8] sm:$0xff] %v2627_v33  ;;  %6325 = vmatprep.mubr.f32.mxu0 %v9837_v18  ;;  %6440 = vmatpush1.msra.mxu0 %v412_v34 }
 0x2dc   :  { %9589 = vmatmul.mubr.msk.f32.vlgmr.msra.gmra.mxu1 %vm45_vm0, %v10222_v0  ;;  %v2631_v35 = vpop.f32.mrf.mxu0  ;;  %6593 = vmatprep.subr.mxu0 %v417_v41 }
 0x2dd   :  { %4053 = vmatpush1.msra.mxu1 %v350_v29  ;;  %3938 = vmatprep.mubr.f32.mxu1 %v9837_v18  ;;  %9303 = vst [vmem:[#allocation7 + $0x8a0] sm:$0xff] %v2631_v35  ;;  %v433_v29 = vld [vmem:[#allocation5 + $0x578] sm:$0xff] }
 0x2de   :  { %4206 = vmatprep.subr.mxu1 %v355_v30  ;;  %v2633_v36 = vpop.f32.mrf.mxu0  ;;  %9652 = vmatmul.mubr.msk.f32.gmra.mxu0 %vm45_vm0, %v10230_v48  ;;  %v432_v30 = vld [vmem:[#allocation5 + $0x570] sm:$0xff] }
 0x2df   :  { %9304 = vst [vmem:[#allocation7 + $0x8a8] sm:$0xff] %v2633_v36  ;;  %6473 = vmatprep.mubr.f32.mxu0 %v9837_v18  ;;  %v374_v36 = vld [vmem:[#allocation5 + $0x3a0] sm:$0xff] }
 0x2e0   :  { %9590 = vmatmul.mubr.msk.f32.gmra.mxu1 %vm45_vm0, %v10230_v48  ;;  %v2779_v39 = vpop.f32.mrf.mxu0 }
 0x2e1   :  { %4086 = vmatprep.mubr.f32.mxu1 %v9837_v18  ;;  %9085 = vst [vmem:[#allocation7 + $0x1d0] sm:$0xff] %v2779_v39 }
 0x2e2   :  { %v2781_v43 = vpop.f32.mrf.mxu0  ;;  %9655 = vmatmul.mubr.msk.f32.vlgmr.msra.gmra.mxu0 %vm45_vm0, %v10222_v0 }
 0x2e3   :  { %9086 = vst [vmem:[#allocation7 + $0x1d8] sm:$0xff] %v2781_v43  ;;  %6479 = vmatprep.mubr.f32.mxu0 %v9837_v18  ;;  %6594 = vmatpush1.msra.mxu0 %v416_v44  ;;  %v437_v43 = vld [vmem:[#allocation5 + $0x598] sm:$0xff]  ;;  %v436_v44 = vld [vmem:[#allocation5 + $0x590] sm:$0xff] }
 0x2e4   :  { %9593 = vmatmul.mubr.msk.f32.vlgmr.msra.gmra.mxu1 %vm45_vm0, %v10222_v0  ;;  %v2785_v49 = vpop.f32.mrf.mxu0 }
 0x2e5   :  { %4207 = vmatpush1.msra.mxu1 %v354_v37  ;;  %4092 = vmatprep.mubr.f32.mxu1 %v9837_v18  ;;  %9307 = vst [vmem:[#allocation7 + $0x8c0] sm:$0xff] %v2785_v49 }
 0x2e6   :  { %4360 = vmatprep.subr.mxu1 %v359_v38  ;;  %9656 = vmatmul.mubr.msk.f32.gmra.mxu0 %vm45_vm0, %v10230_v48  ;;  %v2787_v54 = vpop.f32.mrf.mxu0  ;;  %v379_v38 = vld [vmem:[#allocation5 + $0x3c8] sm:$0xff] }
 0x2e7   :  { %6627 = vmatprep.mubr.f32.mxu0 %v9837_v18  ;;  %9308 = vst [vmem:[#allocation7 + $0x8c8] sm:$0xff] %v2787_v54 }
 0x2e8   :  { %v9744_v45 = vpop.f32.mrf.mxu1  ;;  %9594 = vmatmul.mubr.msk.f32.gmra.mxu1 %vm45_vm0, %v10230_v48  ;;  %v2933_v58 = vpop.f32.mrf.mxu0 }
 0x2e9   :  { %v249_v46 = vmul.f32 2.0, %v9744_v45  ;;  %4240 = vmatprep.mubr.f32.mxu1 %v9837_v18  ;;  %9089 = vst [vmem:[#allocation7 + $0x1f0] sm:$0xff] %v2933_v58 }
 0x2ea   :  { %v239_v47 = vpop.f32.mrf.mxu1  ;;  %9659 = vmatmul.mubr.msk.f32.vlgmr.msra.gmra.mxu0 %vm45_vm0, %v10222_v0  ;;  %v2935_v59 = vpop.f32.mrf.mxu0 }
 0x2eb   :  { %v251_v50 = vsub.f32 %v249_v46, %v10104_v40  ;;  %v248_v51 = vmul.f32 2.0, %v239_v47  ;;  %v421_v40 = vld [vmem:[#allocation5 + $0x518] sm:$0xff]  ;;  %6633 = vmatprep.mubr.f32.mxu0 %v9837_v18  ;;  %9090 = vst [vmem:[#allocation7 + $0x1f8] sm:$0xff] %v2935_v59 }
 0x2ec   :  { %v546_v53 = vpop.f32.mrf.mxu1  ;;  %9597 = vmatmul.mubr.msk.f32.vlgmr.msra.gmra.mxu1 %vm45_vm0, %v10222_v0  ;;  %6747 = vmatprep.subr.mxu0 %v421_v40  ;;  %v2939_v62 = vpop.f32.mrf.mxu0  ;;  %v440_v40 = vld [vmem:[#allocation5 + $0x5b0] sm:$0xff] }
 0x2ed   :  { %257 = vst.msk [vmem:[%s10637_s3 + $0x28] sm:$0xff] %vm129_vm1, %v251_v50  ;;  %v250_v55 = vsub.f32 %v248_v51, %v10115_v42  ;;  %9027 = vst [vmem:[#allocation7] sm:$0xff] %v546_v53  ;;  %4361 = vmatpush1.msra.mxu1 %v358_v1  ;;  %4246 = vmatprep.mubr.f32.mxu1 %v9837_v18  ;;  %v378_v50 = vld [vmem:[#allocation5 + $0x3c0] sm:$0xff] }
 0x2ee   :  { %v548_v57 = vpop.f32.mrf.mxu1  ;;  %4514 = vmatprep.subr.mxu1 %v363_v52  ;;  %6748 = vmatpush1.msra.mxu0 %v420_v56  ;;  %9311 = vst [vmem:[#allocation7 + $0x8e0] sm:$0xff] %v2939_v62  ;;  %v2941_v3 = vpop.f32.mrf.mxu0  ;;  %v383_v52 = vld [vmem:[#allocation5 + $0x3e8] sm:$0xff] }
 0x2ef   :  { %256 = vst.msk [vmem:[%s10637_s3 + $0x20] sm:$0xff] %vm129_vm1, %v250_v55  ;;  %9028 = vst [vmem:[#allocation7 + $0x8] sm:$0xff] %v548_v57  ;;  %9660 = vmatmul.mubr.msk.f32.gmra.mxu0 %vm45_vm0, %v10230_v48  ;;  %6901 = vmatprep.subr.mxu0 %v425_v4  ;;  %v441_v55 = vld [vmem:[#allocation5 + $0x5b8] sm:$0xff]  ;;  %v387_v62 = vld [vmem:[#allocation5 + $0x408] sm:$0xff] }
 0x2f0   :  { %v552_v42 = vpop.f32.mrf.mxu1  ;;  %9598 = vmatmul.mubr.msk.f32.gmra.mxu1 %vm45_vm0, %v10230_v48  ;;  %6781 = vmatprep.mubr.f32.mxu0 %v9837_v18  ;;  %9312 = vst [vmem:[#allocation7 + $0x8e8] sm:$0xff] %v2941_v3  ;;  %v3087_v7 = vpop.f32.mrf.mxu0  ;;  %v445_v3 = vld [vmem:[#allocation5 + $0x5d8] sm:$0xff]  ;;  %v444_v4 = vld [vmem:[#allocation5 + $0x5d0] sm:$0xff] }
 0x2f1   :  { %9249 = vst [vmem:[#allocation7 + $0x6f0] sm:$0xff] %v552_v42  ;;  %4394 = vmatprep.mubr.f32.mxu1 %v9837_v18  ;;  %9093 = vst [vmem:[#allocation7 + $0x210] sm:$0xff] %v3087_v7 }
 0x2f2   :  { %v554_v60 = vpop.f32.mrf.mxu1  ;;  %v3089_v9 = vpop.f32.mrf.mxu0 }
 0x2f3   :  { %9250 = vst [vmem:[#allocation7 + $0x6f8] sm:$0xff] %v554_v60  ;;  %9663 = vmatmul.mubr.msk.f32.vlgmr.msra.gmra.mxu0 %vm45_vm0, %v10222_v0  ;;  %9094 = vst [vmem:[#allocation7 + $0x218] sm:$0xff] %v3089_v9  ;;  %v382_v60 = vld [vmem:[#allocation5 + $0x3e0] sm:$0xff] }
 0x2f4   :  { %v700_v2 = vpop.f32.mrf.mxu1  ;;  %9601 = vmatmul.mubr.msk.f32.vlgmr.msra.gmra.mxu1 %vm45_vm0, %v10222_v0  ;;  %6787 = vmatprep.mubr.f32.mxu0 %v9837_v18  ;;  %v3093_v12 = vpop.f32.mrf.mxu0 }
 0x2f5   :  { %9031 = vst [vmem:[#allocation7 + $0x20] sm:$0xff] %v700_v2  ;;  %4515 = vmatpush1.msra.mxu1 %v362_v61  ;;  %4400 = vmatprep.mubr.f32.mxu1 %v9837_v18  ;;  %9315 = vst [vmem:[#allocation7 + $0x900] sm:$0xff] %v3093_v12  ;;  %v391_v12 = vld [vmem:[#allocation5 + $0x428] sm:$0xff] }
 0x2f6   :  { %v702_v6 = vpop.f32.mrf.mxu1  ;;  %4668 = vmatprep.subr.mxu1 %v367_v63  ;;  %6902 = vmatpush1.msra.mxu0 %v424_v5  ;;  %v3095_v15 = vpop.f32.mrf.mxu0 }
 0x2f7   :  { %9032 = vst [vmem:[#allocation7 + $0x28] sm:$0xff] %v702_v6  ;;  %9664 = vmatmul.mubr.msk.f32.gmra.mxu0 %vm45_vm0, %v10230_v48  ;;  %9316 = vst [vmem:[#allocation7 + $0x908] sm:$0xff] %v3095_v15  ;;  %7055 = vmatprep.subr.mxu0 %v429_v16  ;;  %v449_v15 = vld [vmem:[#allocation5 + $0x5f8] sm:$0xff]  ;;  %v448_v16 = vld [vmem:[#allocation5 + $0x5f0] sm:$0xff] }
 0x2f8   :  { %v706_v8 = vpop.f32.mrf.mxu1  ;;  %9602 = vmatmul.mubr.msk.f32.gmra.mxu1 %vm45_vm0, %v10230_v48  ;;  %6935 = vmatprep.mubr.f32.mxu0 %v9837_v18  ;;  %v3241_v20 = vpop.f32.mrf.mxu0 }
 0x2f9   :  { %9253 = vst [vmem:[#allocation7 + $0x710] sm:$0xff] %v706_v8  ;;  %4548 = vmatprep.mubr.f32.mxu1 %v9837_v18  ;;  %9097 = vst [vmem:[#allocation7 + $0x230] sm:$0xff] %v3241_v20 }
 0x2fa   :  { %v708_v10 = vpop.f32.mrf.mxu1  ;;  %v3243_v22 = vpop.f32.mrf.mxu0 }
 0x2fb   :  { %9254 = vst [vmem:[#allocation7 + $0x718] sm:$0xff] %v708_v10  ;;  %9667 = vmatmul.mubr.msk.f32.vlgmr.msra.gmra.mxu0 %vm45_vm0, %v10222_v0  ;;  %9098 = vst [vmem:[#allocation7 + $0x238] sm:$0xff] %v3243_v22  ;;  %v386_v10 = vld [vmem:[#allocation5 + $0x400] sm:$0xff] }
 0x2fc   :  { %v854_v14 = vpop.f32.mrf.mxu1  ;;  %9605 = vmatmul.mubr.msk.f32.vlgmr.msra.gmra.mxu1 %vm45_vm0, %v10222_v0  ;;  %6941 = vmatprep.mubr.f32.mxu0 %v9837_v18  ;;  %v3247_v25 = vpop.f32.mrf.mxu0 }
 0x2fd   :  { %9035 = vst [vmem:[#allocation7 + $0x40] sm:$0xff] %v854_v14  ;;  %4669 = vmatpush1.msra.mxu1 %v366_v11  ;;  %4554 = vmatprep.mubr.f32.mxu1 %v9837_v18  ;;  %9319 = vst [vmem:[#allocation7 + $0x920] sm:$0xff] %v3247_v25  ;;  %v395_v25 = vld [vmem:[#allocation5 + $0x448] sm:$0xff] }
 0x2fe   :  { %v856_v19 = vpop.f32.mrf.mxu1  ;;  %4822 = vmatprep.subr.mxu1 %v371_v13  ;;  %7056 = vmatpush1.msra.mxu0 %v428_v17  ;;  %v3249_v28 = vpop.f32.mrf.mxu0 }
 0x2ff   :  { %9036 = vst [vmem:[#allocation7 + $0x48] sm:$0xff] %v856_v19  ;;  %9668 = vmatmul.mubr.msk.f32.gmra.mxu0 %vm45_vm0, %v10230_v48  ;;  %9320 = vst [vmem:[#allocation7 + $0x928] sm:$0xff] %v3249_v28  ;;  %7209 = vmatprep.subr.mxu0 %v433_v29  ;;  %v453_v28 = vld [vmem:[#allocation5 + $0x618] sm:$0xff]  ;;  %v452_v29 = vld [vmem:[#allocation5 + $0x610] sm:$0xff] }
 0x300   :  { %v860_v21 = vpop.f32.mrf.mxu1  ;;  %9606 = vmatmul.mubr.msk.f32.gmra.mxu1 %vm45_vm0, %v10230_v48  ;;  %7089 = vmatprep.mubr.f32.mxu0 %v9837_v18  ;;  %v3395_v32 = vpop.f32.mrf.mxu0 }
 0x301   :  { %9257 = vst [vmem:[#allocation7 + $0x730] sm:$0xff] %v860_v21  ;;  %4702 = vmatprep.mubr.f32.mxu1 %v9837_v18  ;;  %9101 = vst [vmem:[#allocation7 + $0x250] sm:$0xff] %v3395_v32 }
 0x302   :  { %v862_v23 = vpop.f32.mrf.mxu1  ;;  %v3397_v34 = vpop.f32.mrf.mxu0 }
 0x303   :  { %9258 = vst [vmem:[#allocation7 + $0x738] sm:$0xff] %v862_v23  ;;  %9671 = vmatmul.mubr.msk.f32.vlgmr.msra.gmra.mxu0 %vm45_vm0, %v10222_v0  ;;  %9102 = vst [vmem:[#allocation7 + $0x258] sm:$0xff] %v3397_v34  ;;  %v390_v23 = vld [vmem:[#allocation5 + $0x420] sm:$0xff] }
 0x304   :  { %v1008_v27 = vpop.f32.mrf.mxu1  ;;  %9609 = vmatmul.mubr.msk.f32.vlgmr.msra.gmra.mxu1 %vm45_vm0, %v10222_v0  ;;  %7095 = vmatprep.mubr.f32.mxu0 %v9837_v18  ;;  %v3401_v37 = vpop.f32.mrf.mxu0 }
 0x305   :  { %9039 = vst [vmem:[#allocation7 + $0x60] sm:$0xff] %v1008_v27  ;;  %4823 = vmatpush1.msra.mxu1 %v370_v24  ;;  %4708 = vmatprep.mubr.f32.mxu1 %v9837_v18  ;;  %9323 = vst [vmem:[#allocation7 + $0x940] sm:$0xff] %v3401_v37  ;;  %v399_v37 = vld [vmem:[#allocation5 + $0x468] sm:$0xff] }
 0x306   :  { %v1010_v31 = vpop.f32.mrf.mxu1  ;;  %4976 = vmatprep.subr.mxu1 %v375_v26  ;;  %7210 = vmatpush1.msra.mxu0 %v432_v30  ;;  %v3403_v41 = vpop.f32.mrf.mxu0 }
 0x307   :  { %9040 = vst [vmem:[#allocation7 + $0x68] sm:$0xff] %v1010_v31  ;;  %9672 = vmatmul.mubr.msk.f32.gmra.mxu0 %vm45_vm0, %v10230_v48  ;;  %9324 = vst [vmem:[#allocation7 + $0x948] sm:$0xff] %v3403_v41  ;;  %7363 = vmatprep.subr.mxu0 %v437_v43  ;;  %v457_v41 = vld [vmem:[#allocation5 + $0x638] sm:$0xff]  ;;  %v456_v43 = vld [vmem:[#allocation5 + $0x630] sm:$0xff] }
 0x308   :  { %v1014_v33 = vpop.f32.mrf.mxu1  ;;  %9610 = vmatmul.mubr.msk.f32.gmra.mxu1 %vm45_vm0, %v10230_v48  ;;  %7243 = vmatprep.mubr.f32.mxu0 %v9837_v18  ;;  %v3549_v46 = vpop.f32.mrf.mxu0 }
 0x309   :  { %9261 = vst [vmem:[#allocation7 + $0x750] sm:$0xff] %v1014_v33  ;;  %4856 = vmatprep.mubr.f32.mxu1 %v9837_v18  ;;  %9105 = vst [vmem:[#allocation7 + $0x270] sm:$0xff] %v3549_v46 }
 0x30a   :  { %v1016_v35 = vpop.f32.mrf.mxu1  ;;  %v3551_v1 = vpop.f32.mrf.mxu0 }
 0x30b   :  { %9262 = vst [vmem:[#allocation7 + $0x758] sm:$0xff] %v1016_v35  ;;  %9675 = vmatmul.mubr.msk.f32.vlgmr.msra.gmra.mxu0 %vm45_vm0, %v10222_v0  ;;  %9106 = vst [vmem:[#allocation7 + $0x278] sm:$0xff] %v3551_v1  ;;  %v394_v35 = vld [vmem:[#allocation5 + $0x440] sm:$0xff] }
 0x30c   :  { %v1162_v39 = vpop.f32.mrf.mxu1  ;;  %9613 = vmatmul.mubr.msk.f32.vlgmr.msra.gmra.mxu1 %vm45_vm0, %v10222_v0  ;;  %7249 = vmatprep.mubr.f32.mxu0 %v9837_v18  ;;  %v3555_v51 = vpop.f32.mrf.mxu0 }
 0x30d   :  { %9043 = vst [vmem:[#allocation7 + $0x80] sm:$0xff] %v1162_v39  ;;  %4977 = vmatpush1.msra.mxu1 %v374_v36  ;;  %4862 = vmatprep.mubr.f32.mxu1 %v9837_v18  ;;  %9327 = vst [vmem:[#allocation7 + $0x960] sm:$0xff] %v3555_v51  ;;  %v403_v51 = vld [vmem:[#allocation5 + $0x488] sm:$0xff] }
 0x30e   :  { %v1164_v45 = vpop.f32.mrf.mxu1  ;;  %5130 = vmatprep.subr.mxu1 %v379_v38  ;;  %7364 = vmatpush1.msra.mxu0 %v436_v44  ;;  %v3557_v54 = vpop.f32.mrf.mxu0 }
 0x30f   :  { %9044 = vst [vmem:[#allocation7 + $0x88] sm:$0xff] %v1164_v45  ;;  %9676 = vmatmul.mubr.msk.f32.gmra.mxu0 %vm45_vm0, %v10230_v48  ;;  %9328 = vst [vmem:[#allocation7 + $0x968] sm:$0xff] %v3557_v54  ;;  %7517 = vmatprep.subr.mxu0 %v441_v55  ;;  %v461_v54 = vld [vmem:[#allocation5 + $0x658] sm:$0xff]  ;;  %v460_v55 = vld [vmem:[#allocation5 + $0x650] sm:$0xff] }
 0x310   :  { %v1168_v47 = vpop.f32.mrf.mxu1  ;;  %9614 = vmatmul.mubr.msk.f32.gmra.mxu1 %vm45_vm0, %v10230_v48  ;;  %7397 = vmatprep.mubr.f32.mxu0 %v9837_v18  ;;  %v3703_v57 = vpop.f32.mrf.mxu0 }
 0x311   :  { %9265 = vst [vmem:[#allocation7 + $0x770] sm:$0xff] %v1168_v47  ;;  %5010 = vmatprep.mubr.f32.mxu1 %v9837_v18  ;;  %9109 = vst [vmem:[#allocation7 + $0x290] sm:$0xff] %v3703_v57  ;;  %v10466_v57 = vld [vmem:[%s10634_s0 + $0x8] sm:$0xff] }
 0x312   :  { %v1170_v49 = vpop.f32.mrf.mxu1  ;;  %v3705_v42 = vpop.f32.mrf.mxu0 }
 0x313   :  { %9266 = vst [vmem:[#allocation7 + $0x778] sm:$0xff] %v1170_v49  ;;  %9679 = vmatmul.mubr.msk.f32.vlgmr.msra.gmra.mxu0 %vm45_vm0, %v10222_v0  ;;  %9110 = vst [vmem:[#allocation7 + $0x298] sm:$0xff] %v3705_v42  ;;  %v398_v49 = vld [vmem:[#allocation5 + $0x460] sm:$0xff] }
 0x314   :  { %v1316_v53 = vpop.f32.mrf.mxu1  ;;  %9617 = vmatmul.mubr.msk.f32.vlgmr.msra.gmra.mxu1 %vm45_vm0, %v10222_v0  ;;  %7403 = vmatprep.mubr.f32.mxu0 %v9837_v18  ;;  %v3709_v61 = vpop.f32.mrf.mxu0 }
 0x315   :  { %9047 = vst [vmem:[#allocation7 + $0xa0] sm:$0xff] %v1316_v53  ;;  %5131 = vmatpush1.msra.mxu1 %v378_v50  ;;  %5016 = vmatprep.mubr.f32.mxu1 %v9837_v18  ;;  %9331 = vst [vmem:[#allocation7 + $0x980] sm:$0xff] %v3709_v61  ;;  %v407_v61 = vld [vmem:[#allocation5 + $0x4a8] sm:$0xff] }
 0x316   :  { %v1318_v56 = vpop.f32.mrf.mxu1  ;;  %5284 = vmatprep.subr.mxu1 %v383_v52  ;;  %7518 = vmatpush1.msra.mxu0 %v440_v40  ;;  %v3711_v2 = vpop.f32.mrf.mxu0 }
 0x317   :  { %9048 = vst [vmem:[#allocation7 + $0xa8] sm:$0xff] %v1318_v56  ;;  %9680 = vmatmul.mubr.msk.f32.gmra.mxu0 %vm45_vm0, %v10230_v48  ;;  %9332 = vst [vmem:[#allocation7 + $0x988] sm:$0xff] %v3711_v2  ;;  %7671 = vmatprep.subr.mxu0 %v445_v3  ;;  %v10458_v56 = vld [vmem:[%s10634_s0] sm:$0xff]  ;;  %v465_v2 = vld [vmem:[#allocation5 + $0x678] sm:$0xff] }
 0x318   :  { %v1322_v58 = vpop.f32.mrf.mxu1  ;;  %9618 = vmatmul.mubr.msk.f32.gmra.mxu1 %vm45_vm0, %v10230_v48  ;;  %7551 = vmatprep.mubr.f32.mxu0 %v9837_v18  ;;  %v3857_v6 = vpop.f32.mrf.mxu0  ;;  %v464_v3 = vld [vmem:[#allocation5 + $0x670] sm:$0xff] }
 0x319   :  { %9269 = vst [vmem:[#allocation7 + $0x790] sm:$0xff] %v1322_v58  ;;  %5164 = vmatprep.mubr.f32.mxu1 %v9837_v18  ;;  %9113 = vst [vmem:[#allocation7 + $0x2b0] sm:$0xff] %v3857_v6 }
 0x31a   :  { %v1324_v59 = vpop.f32.mrf.mxu1  ;;  %v3859_v8 = vpop.f32.mrf.mxu0 }
 0x31b   :  { %9270 = vst [vmem:[#allocation7 + $0x798] sm:$0xff] %v1324_v59  ;;  %9683 = vmatmul.mubr.msk.f32.vlgmr.msra.gmra.mxu0 %vm45_vm0, %v10222_v0  ;;  %9114 = vst [vmem:[#allocation7 + $0x2b8] sm:$0xff] %v3859_v8  ;;  %v402_v59 = vld [vmem:[#allocation5 + $0x480] sm:$0xff] }
 0x31c   :  { %v1470_v63 = vpop.f32.mrf.mxu1  ;;  %9621 = vmatmul.mubr.msk.f32.vlgmr.msra.gmra.mxu1 %vm45_vm0, %v10222_v0  ;;  %7557 = vmatprep.mubr.f32.mxu0 %v9837_v18  ;;  %v3863_v11 = vpop.f32.mrf.mxu0 }
 0x31d   :  { %9051 = vst [vmem:[#allocation7 + $0xc0] sm:$0xff] %v1470_v63  ;;  %5285 = vmatpush1.msra.mxu1 %v382_v60  ;;  %5170 = vmatprep.mubr.f32.mxu1 %v9837_v18  ;;  %9335 = vst [vmem:[#allocation7 + $0x9a0] sm:$0xff] %v3863_v11  ;;  %v411_v11 = vld [vmem:[#allocation5 + $0x4c8] sm:$0xff] }
 0x31e   :  { %v1472_v5 = vpop.f32.mrf.mxu1  ;;  %5438 = vmatprep.subr.mxu1 %v387_v62  ;;  %7672 = vmatpush1.msra.mxu0 %v444_v4  ;;  %v3865_v14 = vpop.f32.mrf.mxu0 }
 0x31f   :  { %9052 = vst [vmem:[#allocation7 + $0xc8] sm:$0xff] %v1472_v5  ;;  %9684 = vmatmul.mubr.msk.f32.gmra.mxu0 %vm45_vm0, %v10230_v48  ;;  %9336 = vst [vmem:[#allocation7 + $0x9a8] sm:$0xff] %v3865_v14  ;;  %7825 = vmatprep.subr.mxu0 %v449_v15  ;;  %v469_v14 = vld [vmem:[#allocation5 + $0x698] sm:$0xff]  ;;  %v468_v15 = vld [vmem:[#allocation5 + $0x690] sm:$0xff] }
 0x320   :  { %v1476_v7 = vpop.f32.mrf.mxu1  ;;  %9622 = vmatmul.mubr.msk.f32.gmra.mxu1 %vm45_vm0, %v10230_v48  ;;  %7705 = vmatprep.mubr.f32.mxu0 %v9837_v18  ;;  %v4011_v19 = vpop.f32.mrf.mxu0 }
 0x321   :  { %9273 = vst [vmem:[#allocation7 + $0x7b0] sm:$0xff] %v1476_v7  ;;  %5318 = vmatprep.mubr.f32.mxu1 %v9837_v18  ;;  %9117 = vst [vmem:[#allocation7 + $0x2d0] sm:$0xff] %v4011_v19 }
 0x322   :  { %v1478_v9 = vpop.f32.mrf.mxu1  ;;  %v4013_v21 = vpop.f32.mrf.mxu0 }
 0x323   :  { %9274 = vst [vmem:[#allocation7 + $0x7b8] sm:$0xff] %v1478_v9  ;;  %9687 = vmatmul.mubr.msk.f32.vlgmr.msra.gmra.mxu0 %vm45_vm0, %v10222_v0  ;;  %9118 = vst [vmem:[#allocation7 + $0x2d8] sm:$0xff] %v4013_v21  ;;  %v406_v9 = vld [vmem:[#allocation5 + $0x4a0] sm:$0xff] }
 0x324   :  { %v1624_v13 = vpop.f32.mrf.mxu1  ;;  %9625 = vmatmul.mubr.msk.f32.vlgmr.msra.gmra.mxu1 %vm45_vm0, %v10222_v0  ;;  %7711 = vmatprep.mubr.f32.mxu0 %v9837_v18  ;;  %v4017_v24 = vpop.f32.mrf.mxu0 }
 0x325   :  { %9055 = vst [vmem:[#allocation7 + $0xe0] sm:$0xff] %v1624_v13  ;;  %5439 = vmatpush1.msra.mxu1 %v386_v10  ;;  %5324 = vmatprep.mubr.f32.mxu1 %v9837_v18  ;;  %9339 = vst [vmem:[#allocation7 + $0x9c0] sm:$0xff] %v4017_v24  ;;  %v415_v24 = vld [vmem:[#allocation5 + $0x4e8] sm:$0xff] }
 0x326   :  { %v1626_v17 = vpop.f32.mrf.mxu1  ;;  %5592 = vmatprep.subr.mxu1 %v391_v12  ;;  %7826 = vmatpush1.msra.mxu0 %v448_v16  ;;  %v4019_v27 = vpop.f32.mrf.mxu0 }
 0x327   :  { %9056 = vst [vmem:[#allocation7 + $0xe8] sm:$0xff] %v1626_v17  ;;  %9688 = vmatmul.mubr.msk.f32.gmra.mxu0 %vm45_vm0, %v10230_v48  ;;  %9340 = vst [vmem:[#allocation7 + $0x9c8] sm:$0xff] %v4019_v27  ;;  %7979 = vmatprep.subr.mxu0 %v453_v28  ;;  %v473_v27 = vld [vmem:[#allocation5 + $0x6b8] sm:$0xff]  ;;  %v472_v28 = vld [vmem:[#allocation5 + $0x6b0] sm:$0xff] }
 0x328   :  { %v1630_v20 = vpop.f32.mrf.mxu1  ;;  %9626 = vmatmul.mubr.msk.f32.gmra.mxu1 %vm45_vm0, %v10230_v48  ;;  %7859 = vmatprep.mubr.f32.mxu0 %v9837_v18  ;;  %v4165_v31 = vpop.f32.mrf.mxu0 }
 0x329   :  { %9277 = vst [vmem:[#allocation7 + $0x7d0] sm:$0xff] %v1630_v20  ;;  %5472 = vmatprep.mubr.f32.mxu1 %v9837_v18  ;;  %9121 = vst [vmem:[#allocation7 + $0x2f0] sm:$0xff] %v4165_v31 }
 0x32a   :  { %v1632_v22 = vpop.f32.mrf.mxu1  ;;  %v4167_v33 = vpop.f32.mrf.mxu0 }
 0x32b   :  { %9278 = vst [vmem:[#allocation7 + $0x7d8] sm:$0xff] %v1632_v22  ;;  %9691 = vmatmul.mubr.msk.f32.vlgmr.msra.gmra.mxu0 %vm45_vm0, %v10222_v0  ;;  %9122 = vst [vmem:[#allocation7 + $0x2f8] sm:$0xff] %v4167_v33  ;;  %v410_v22 = vld [vmem:[#allocation5 + $0x4c0] sm:$0xff] }
 0x32c   :  { %v1778_v26 = vpop.f32.mrf.mxu1  ;;  %9629 = vmatmul.mubr.msk.f32.vlgmr.msra.gmra.mxu1 %vm45_vm0, %v10222_v0  ;;  %7865 = vmatprep.mubr.f32.mxu0 %v9837_v18  ;;  %v4171_v36 = vpop.f32.mrf.mxu0 }
 0x32d   :  { %9059 = vst [vmem:[#allocation7 + $0x100] sm:$0xff] %v1778_v26  ;;  %5593 = vmatpush1.msra.mxu1 %v390_v23  ;;  %5478 = vmatprep.mubr.f32.mxu1 %v9837_v18  ;;  %9343 = vst [vmem:[#allocation7 + $0x9e0] sm:$0xff] %v4171_v36  ;;  %v419_v36 = vld [vmem:[#allocation5 + $0x508] sm:$0xff] }
 0x32e   :  { %v1780_v30 = vpop.f32.mrf.mxu1  ;;  %5746 = vmatprep.subr.mxu1 %v395_v25  ;;  %7980 = vmatpush1.msra.mxu0 %v452_v29  ;;  %v4173_v39 = vpop.f32.mrf.mxu0 }
 0x32f   :  { %9060 = vst [vmem:[#allocation7 + $0x108] sm:$0xff] %v1780_v30  ;;  %9692 = vmatmul.mubr.msk.f32.gmra.mxu0 %vm45_vm0, %v10230_v48  ;;  %9344 = vst [vmem:[#allocation7 + $0x9e8] sm:$0xff] %v4173_v39  ;;  %8133 = vmatprep.subr.mxu0 %v457_v41  ;;  %v477_v39 = vld [vmem:[#allocation5 + $0x6d8] sm:$0xff]  ;;  %v476_v41 = vld [vmem:[#allocation5 + $0x6d0] sm:$0xff] }
 0x330   :  { %v1784_v32 = vpop.f32.mrf.mxu1  ;;  %9630 = vmatmul.mubr.msk.f32.gmra.mxu1 %vm45_vm0, %v10230_v48  ;;  %8013 = vmatprep.mubr.f32.mxu0 %v9837_v18  ;;  %v4319_v45 = vpop.f32.mrf.mxu0 }
 0x331   :  { %9281 = vst [vmem:[#allocation7 + $0x7f0] sm:$0xff] %v1784_v32  ;;  %5626 = vmatprep.mubr.f32.mxu1 %v9837_v18  ;;  %9125 = vst [vmem:[#allocation7 + $0x310] sm:$0xff] %v4319_v45 }
 0x332   :  { %v1786_v34 = vpop.f32.mrf.mxu1  ;;  %v4321_v47 = vpop.f32.mrf.mxu0 }
 0x333   :  { %9282 = vst [vmem:[#allocation7 + $0x7f8] sm:$0xff] %v1786_v34  ;;  %9695 = vmatmul.mubr.msk.f32.vlgmr.msra.gmra.mxu0 %vm45_vm0, %v10222_v0  ;;  %9126 = vst [vmem:[#allocation7 + $0x318] sm:$0xff] %v4321_v47  ;;  %v414_v34 = vld [vmem:[#allocation5 + $0x4e0] sm:$0xff] }
 0x334   :  { %v1932_v38 = vpop.f32.mrf.mxu1  ;;  %9633 = vmatmul.mubr.msk.f32.vlgmr.msra.gmra.mxu1 %vm45_vm0, %v10222_v0  ;;  %8019 = vmatprep.mubr.f32.mxu0 %v9837_v18  ;;  %v4325_v50 = vpop.f32.mrf.mxu0 }
 0x335   :  { %9063 = vst [vmem:[#allocation7 + $0x120] sm:$0xff] %v1932_v38  ;;  %5747 = vmatpush1.msra.mxu1 %v394_v35  ;;  %5632 = vmatprep.mubr.f32.mxu1 %v9837_v18  ;;  %9347 = vst [vmem:[#allocation7 + $0xa00] sm:$0xff] %v4325_v50  ;;  %v423_v50 = vld [vmem:[#allocation5 + $0x528] sm:$0xff] }
 0x336   :  { %v1934_v44 = vpop.f32.mrf.mxu1  ;;  %5900 = vmatprep.subr.mxu1 %v399_v37  ;;  %8134 = vmatpush1.msra.mxu0 %v456_v43  ;;  %v4327_v53 = vpop.f32.mrf.mxu0 }
 0x337   :  { %9064 = vst [vmem:[#allocation7 + $0x128] sm:$0xff] %v1934_v44  ;;  %9696 = vmatmul.mubr.msk.f32.gmra.mxu0 %vm45_vm0, %v10230_v48  ;;  %9348 = vst [vmem:[#allocation7 + $0xa08] sm:$0xff] %v4327_v53  ;;  %8287 = vmatprep.subr.mxu0 %v461_v54 }
 0x338   :  { %v1938_v46 = vpop.f32.mrf.mxu1  ;;  %9634 = vmatmul.mubr.msk.f32.gmra.mxu1 %vm45_vm0, %v10230_v48  ;;  %8167 = vmatprep.mubr.f32.mxu0 %v9837_v18  ;;  %v4473_v48 = vpop.f32.mrf.mxu0 }
 0x339   :  { %9285 = vst [vmem:[#allocation7 + $0x810] sm:$0xff] %v1938_v46  ;;  %5780 = vmatprep.mubr.f32.mxu1 %v9837_v18  ;;  %9129 = vst [vmem:[#allocation7 + $0x330] sm:$0xff] %v4473_v48 }
 0x33a   :  { %v1940_v1 = vpop.f32.mrf.mxu1  ;;  %v4475_v58 = vpop.f32.mrf.mxu0 }
 0x33b   :  { %9286 = vst [vmem:[#allocation7 + $0x818] sm:$0xff] %v1940_v1  ;;  %9699 = vmatmul.mubr.msk.f32.vlgmr.msra.gmra.mxu0 %vm45_vm0, %v10458_v56  ;;  %9130 = vst [vmem:[#allocation7 + $0x338] sm:$0xff] %v4475_v58  ;;  %v418_v1 = vld [vmem:[#allocation5 + $0x500] sm:$0xff] }
 0x33c   :  { %v2086_v52 = vpop.f32.mrf.mxu1  ;;  %9637 = vmatmul.mubr.msk.f32.vlgmr.msra.gmra.mxu1 %vm45_vm0, %v10222_v0  ;;  %8173 = vmatprep.mubr.f32.mxu0 %v9837_v18  ;;  %v4479_v60 = vpop.f32.mrf.mxu0 }
 0x33d   :  { %9067 = vst [vmem:[#allocation7 + $0x140] sm:$0xff] %v2086_v52  ;;  %5901 = vmatpush1.msra.mxu1 %v398_v49  ;;  %5786 = vmatprep.mubr.f32.mxu1 %v9837_v18  ;;  %9351 = vst [vmem:[#allocation7 + $0xa20] sm:$0xff] %v4479_v60 }
 0x33e   :  { %v2088_v40 = vpop.f32.mrf.mxu1  ;;  %6054 = vmatprep.subr.mxu1 %v403_v51  ;;  %8288 = vmatpush1.msra.mxu0 %v460_v55  ;;  %v4481_v63 = vpop.f32.mrf.mxu0 }
 0x33f   :  { %9068 = vst [vmem:[#allocation7 + $0x148] sm:$0xff] %v2088_v40  ;;  %9700 = vmatmul.mubr.msk.f32.gmra.mxu0 %vm45_vm0, %v10466_v57  ;;  %9352 = vst [vmem:[#allocation7 + $0xa28] sm:$0xff] %v4481_v63  ;;  %8441 = vmatprep.subr.mxu0 %v465_v2 }
 0x340   :  { %v2092_v0 = vpop.f32.mrf.mxu1  ;;  %9638 = vmatmul.mubr.msk.f32.gmra.mxu1 %vm45_vm0, %v10466_v57  ;;  %8321 = vmatprep.mubr.f32.mxu0 %v9837_v18  ;;  %v4627_v5 = vpop.f32.mrf.mxu0 }
 0x341   :  { %9289 = vst [vmem:[#allocation7 + $0x830] sm:$0xff] %v2092_v0  ;;  %5934 = vmatprep.mubr.f32.mxu1 %v9837_v18  ;;  %9133 = vst [vmem:[#allocation7 + $0x350] sm:$0xff] %v4627_v5  ;;  %v422_v0 = vld [vmem:[#allocation5 + $0x520] sm:$0xff] }
 0x342   :  { %v2094_v42 = vpop.f32.mrf.mxu1  ;;  %v4629_v7 = vpop.f32.mrf.mxu0 }
 0x343   :  { %9290 = vst [vmem:[#allocation7 + $0x838] sm:$0xff] %v2094_v42  ;;  %9703 = vmatmul.mubr.msk.f32.vlgmr.msra.gmra.mxu0 %vm45_vm0, %v10458_v56  ;;  %9134 = vst [vmem:[#allocation7 + $0x358] sm:$0xff] %v4629_v7  ;;  %v427_v42 = vld [vmem:[#allocation5 + $0x548] sm:$0xff] }
 0x344   :  { %v2240_v62 = vpop.f32.mrf.mxu1  ;;  %9641 = vmatmul.mubr.msk.f32.vlgmr.msra.gmra.mxu1 %vm45_vm0, %v10458_v56  ;;  %8327 = vmatprep.mubr.f32.mxu0 %v9837_v18  ;;  %v4633_v10 = vpop.f32.mrf.mxu0 }
 0x345   :  { %9071 = vst [vmem:[#allocation7 + $0x160] sm:$0xff] %v2240_v62  ;;  %6055 = vmatpush1.msra.mxu1 %v402_v59  ;;  %5940 = vmatprep.mubr.f32.mxu1 %v9837_v18  ;;  %9355 = vst [vmem:[#allocation7 + $0xa40] sm:$0xff] %v4633_v10 }
 0x346   :  { %v2242_v4 = vpop.f32.mrf.mxu1  ;;  %6208 = vmatprep.subr.mxu1 %v407_v61  ;;  %8442 = vmatpush1.msra.mxu0 %v464_v3  ;;  %v4635_v13 = vpop.f32.mrf.mxu0 }
 0x347   :  { %9072 = vst [vmem:[#allocation7 + $0x168] sm:$0xff] %v2242_v4  ;;  %9704 = vmatmul.mubr.msk.f32.gmra.mxu0 %vm45_vm0, %v10466_v57  ;;  %9356 = vst [vmem:[#allocation7 + $0xa48] sm:$0xff] %v4635_v13  ;;  %8595 = vmatprep.subr.mxu0 %v469_v14  ;;  %v426_v4 = vld [vmem:[#allocation5 + $0x540] sm:$0xff] }
 0x348   :  { %v2246_v6 = vpop.f32.mrf.mxu1  ;;  %9642 = vmatmul.mubr.msk.f32.gmra.mxu1 %vm45_vm0, %v10466_v57  ;;  %8475 = vmatprep.mubr.f32.mxu0 %v9837_v18  ;;  %v4781_v17 = vpop.f32.mrf.mxu0  ;;  %v430_v14 = vld [vmem:[#allocation5 + $0x560] sm:$0xff] }
 0x349   :  { %9293 = vst [vmem:[#allocation7 + $0x850] sm:$0xff] %v2246_v6  ;;  %6088 = vmatprep.mubr.f32.mxu1 %v9837_v18  ;;  %9137 = vst [vmem:[#allocation7 + $0x370] sm:$0xff] %v4781_v17  ;;  %v431_v6 = vld [vmem:[#allocation5 + $0x568] sm:$0xff] }
 0x34a   :  { %v2248_v8 = vpop.f32.mrf.mxu1  ;;  %v4783_v20 = vpop.f32.mrf.mxu0 }
 0x34b   :  { %9294 = vst [vmem:[#allocation7 + $0x858] sm:$0xff] %v2248_v8  ;;  %9707 = vmatmul.mubr.msk.f32.vlgmr.msra.gmra.mxu0 %vm45_vm0, %v10458_v56  ;;  %9138 = vst [vmem:[#allocation7 + $0x378] sm:$0xff] %v4783_v20 }
 0x34c   :  { %v2394_v12 = vpop.f32.mrf.mxu1  ;;  %9645 = vmatmul.mubr.msk.f32.vlgmr.msra.gmra.mxu1 %vm45_vm0, %v10458_v56  ;;  %8481 = vmatprep.mubr.f32.mxu0 %v9837_v18  ;;  %v4787_v23 = vpop.f32.mrf.mxu0 }
 0x34d   :  { %9075 = vst [vmem:[#allocation7 + $0x180] sm:$0xff] %v2394_v12  ;;  %6209 = vmatpush1.msra.mxu1 %v406_v9  ;;  %6094 = vmatprep.mubr.f32.mxu1 %v9837_v18  ;;  %9359 = vst [vmem:[#allocation7 + $0xa60] sm:$0xff] %v4787_v23 }
 0x34e   :  { %v2396_v16 = vpop.f32.mrf.mxu1  ;;  %6362 = vmatprep.subr.mxu1 %v411_v11  ;;  %8596 = vmatpush1.msra.mxu0 %v468_v15  ;;  %v4789_v26 = vpop.f32.mrf.mxu0 }
 0x34f   :  { %9076 = vst [vmem:[#allocation7 + $0x188] sm:$0xff] %v2396_v16  ;;  %9708 = vmatmul.mubr.msk.f32.gmra.mxu0 %vm45_vm0, %v10466_v57  ;;  %9360 = vst [vmem:[#allocation7 + $0xa68] sm:$0xff] %v4789_v26  ;;  %8749 = vmatprep.subr.mxu0 %v473_v27  ;;  %v435_v16 = vld [vmem:[#allocation5 + $0x588] sm:$0xff] }
 0x350   :  { %v2400_v19 = vpop.f32.mrf.mxu1  ;;  %9646 = vmatmul.mubr.msk.f32.gmra.mxu1 %vm45_vm0, %v10466_v57  ;;  %8629 = vmatprep.mubr.f32.mxu0 %v9837_v18  ;;  %v4935_v30 = vpop.f32.mrf.mxu0  ;;  %v439_v27 = vld [vmem:[#allocation5 + $0x5a8] sm:$0xff] }
 0x351   :  { %9297 = vst [vmem:[#allocation7 + $0x870] sm:$0xff] %v2400_v19  ;;  %6242 = vmatprep.mubr.f32.mxu1 %v9837_v18  ;;  %9141 = vst [vmem:[#allocation7 + $0x390] sm:$0xff] %v4935_v30 }
 0x352   :  { %v2402_v21 = vpop.f32.mrf.mxu1  ;;  %v4937_v32 = vpop.f32.mrf.mxu0 }
 0x353   :  { %9298 = vst [vmem:[#allocation7 + $0x878] sm:$0xff] %v2402_v21  ;;  %9711 = vmatmul.mubr.msk.f32.vlgmr.msra.gmra.mxu0 %vm45_vm0, %v10458_v56  ;;  %9142 = vst [vmem:[#allocation7 + $0x398] sm:$0xff] %v4937_v32 }
 0x354   :  { %v2548_v25 = vpop.f32.mrf.mxu1  ;;  %9649 = vmatmul.mubr.msk.f32.vlgmr.msra.gmra.mxu1 %vm45_vm0, %v10458_v56  ;;  %8635 = vmatprep.mubr.f32.mxu0 %v9837_v18  ;;  %v4941_v35 = vpop.f32.mrf.mxu0 }
 0x355   :  { %9079 = vst [vmem:[#allocation7 + $0x1a0] sm:$0xff] %v2548_v25  ;;  %6363 = vmatpush1.msra.mxu1 %v410_v22  ;;  %6248 = vmatprep.mubr.f32.mxu1 %v9837_v18  ;;  %9363 = vst [vmem:[#allocation7 + $0xa80] sm:$0xff] %v4941_v35  ;;  %v434_v25 = vld [vmem:[#allocation5 + $0x580] sm:$0xff] }
 0x356   :  { %v2550_v29 = vpop.f32.mrf.mxu1  ;;  %6516 = vmatprep.subr.mxu1 %v415_v24  ;;  %8750 = vmatpush1.msra.mxu0 %v472_v28  ;;  %v4943_v38 = vpop.f32.mrf.mxu0  ;;  %v438_v35 = vld [vmem:[#allocation5 + $0x5a0] sm:$0xff] }
 0x357   :  { %9080 = vst [vmem:[#allocation7 + $0x1a8] sm:$0xff] %v2550_v29  ;;  %9712 = vmatmul.mubr.msk.f32.gmra.mxu0 %vm45_vm0, %v10466_v57  ;;  %9364 = vst [vmem:[#allocation7 + $0xa88] sm:$0xff] %v4943_v38  ;;  %8903 = vmatprep.subr.mxu0 %v477_v39 }
 0x358   :  { %v2554_v31 = vpop.f32.mrf.mxu1  ;;  %9650 = vmatmul.mubr.msk.f32.gmra.mxu1 %vm45_vm0, %v10466_v57  ;;  %8783 = vmatprep.mubr.f32.mxu0 %v9837_v18  ;;  %v5089_v44 = vpop.f32.mrf.mxu0 }
 0x359   :  { %9301 = vst [vmem:[#allocation7 + $0x890] sm:$0xff] %v2554_v31  ;;  %6396 = vmatprep.mubr.f32.mxu1 %v9837_v18  ;;  %9145 = vst [vmem:[#allocation7 + $0x3b0] sm:$0xff] %v5089_v44 }
 0x35a   :  { %v2556_v33 = vpop.f32.mrf.mxu1  ;;  %v5091_v46 = vpop.f32.mrf.mxu0 }
 0x35b   :  { %9302 = vst [vmem:[#allocation7 + $0x898] sm:$0xff] %v2556_v33  ;;  %9715 = vmatmul.mubr.msk.f32.vlgmr.msra.gmra.mxu0 %vm45_vm0, %v10458_v56  ;;  %9146 = vst [vmem:[#allocation7 + $0x3b8] sm:$0xff] %v5091_v46 }
 0x35c   :  { %v2702_v37 = vpop.f32.mrf.mxu1  ;;  %9653 = vmatmul.mubr.msk.f32.vlgmr.msra.gmra.mxu1 %vm45_vm0, %v10458_v56  ;;  %8789 = vmatprep.mubr.f32.mxu0 %v9837_v18  ;;  %v5095_v49 = vpop.f32.mrf.mxu0 }
 0x35d   :  { %9083 = vst [vmem:[#allocation7 + $0x1c0] sm:$0xff] %v2702_v37  ;;  %6517 = vmatpush1.msra.mxu1 %v414_v34  ;;  %6402 = vmatprep.mubr.f32.mxu1 %v9837_v18  ;;  %9367 = vst [vmem:[#allocation7 + $0xaa0] sm:$0xff] %v5095_v49  ;;  %v443_v37 = vld [vmem:[#allocation5 + $0x5c8] sm:$0xff] }
 0x35e   :  { %v2704_v43 = vpop.f32.mrf.mxu1  ;;  %6670 = vmatprep.subr.mxu1 %v419_v36  ;;  %8904 = vmatpush1.msra.mxu0 %v476_v41  ;;  %v5097_v52 = vpop.f32.mrf.mxu0  ;;  %v447_v49 = vld [vmem:[#allocation5 + $0x5e8] sm:$0xff] }
 0x35f   :  { %9084 = vst [vmem:[#allocation7 + $0x1c8] sm:$0xff] %v2704_v43  ;;  %9716 = vmatmul.mubr.msk.f32.gmra.mxu0 %vm45_vm0, %v10466_v57  ;;  %9368 = vst [vmem:[#allocation7 + $0xaa8] sm:$0xff] %v5097_v52 }
 0x360   :  { %v2708_v45 = vpop.f32.mrf.mxu1  ;;  %9654 = vmatmul.mubr.msk.f32.gmra.mxu1 %vm45_vm0, %v10466_v57  ;;  %8937 = vmatprep.mubr.f32.mxu0 %v9837_v18  ;;  %v5243_v54 = vpop.f32.mrf.mxu0 }
 0x361   :  { %9305 = vst [vmem:[#allocation7 + $0x8b0] sm:$0xff] %v2708_v45  ;;  %6550 = vmatprep.mubr.f32.mxu1 %v9837_v18  ;;  %9149 = vst [vmem:[#allocation7 + $0x3d0] sm:$0xff] %v5243_v54 }
 0x362   :  { %v2710_v47 = vpop.f32.mrf.mxu1  ;;  %v5245_v40 = vpop.f32.mrf.mxu0 }
 0x363   :  { %9306 = vst [vmem:[#allocation7 + $0x8b8] sm:$0xff] %v2710_v47  ;;  %9719 = vmatmul.mubr.msk.f32.vlgmr.msra.gmra.mxu0 %vm45_vm0, %v10458_v56  ;;  %9150 = vst [vmem:[#allocation7 + $0x3d8] sm:$0xff] %v5245_v40  ;;  %v442_v47 = vld [vmem:[#allocation5 + $0x5c0] sm:$0xff] }
 0x364   :  { %v2856_v51 = vpop.f32.mrf.mxu1  ;;  %9657 = vmatmul.mubr.msk.f32.vlgmr.msra.gmra.mxu1 %vm45_vm0, %v10458_v56  ;;  %8943 = vmatprep.mubr.f32.mxu0 %v9837_v18  ;;  %v5249_v58 = vpop.f32.mrf.mxu0 }
 0x365   :  { %9087 = vst [vmem:[#allocation7 + $0x1e0] sm:$0xff] %v2856_v51  ;;  %6671 = vmatpush1.msra.mxu1 %v418_v1  ;;  %6556 = vmatprep.mubr.f32.mxu1 %v9837_v18  ;;  %9371 = vst [vmem:[#allocation7 + $0xac0] sm:$0xff] %v5249_v58  ;;  %v451_v58 = vld [vmem:[#allocation5 + $0x608] sm:$0xff] }
 0x366   :  { %v2858_v53 = vpop.f32.mrf.mxu1  ;;  %6824 = vmatprep.subr.mxu1 %v423_v50  ;;  %v5251_v60 = vpop.f32.mrf.mxu0 }
 0x367   :  { %9088 = vst [vmem:[#allocation7 + $0x1e8] sm:$0xff] %v2858_v53  ;;  %9720 = vmatmul.mubr.msk.f32.gmra.mxu0 %vm45_vm0, %v10466_v57  ;;  %9372 = vst [vmem:[#allocation7 + $0xac8] sm:$0xff] %v5251_v60 }
 0x368   :  { %v2862_v55 = vpop.f32.mrf.mxu1  ;;  %9658 = vmatmul.mubr.msk.f32.gmra.mxu1 %vm45_vm0, %v10466_v57 }
 0x369   :  { %9309 = vst [vmem:[#allocation7 + $0x8d0] sm:$0xff] %v2862_v55  ;;  %6704 = vmatprep.mubr.f32.mxu1 %v9837_v18  ;;  %v5397_v62 = vpop.f32.mrf.mxu0 }
 0x36a   :  { %v2864_v48 = vpop.f32.mrf.mxu1  ;;  %9153 = vst [vmem:[#allocation7 + $0x3f0] sm:$0xff] %v5397_v62 }
 0x36b   :  { %9310 = vst [vmem:[#allocation7 + $0x8d8] sm:$0xff] %v2864_v48  ;;  %v5399_v2 = vpop.f32.mrf.mxu0  ;;  %v446_v48 = vld [vmem:[#allocation5 + $0x5e0] sm:$0xff] }
 0x36c   :  { %v3010_v59 = vpop.f32.mrf.mxu1  ;;  %9661 = vmatmul.mubr.msk.f32.vlgmr.msra.gmra.mxu1 %vm45_vm0, %v10458_v56  ;;  %9154 = vst [vmem:[#allocation7 + $0x3f8] sm:$0xff] %v5399_v2 }
 0x36d   :  { %9091 = vst [vmem:[#allocation7 + $0x200] sm:$0xff] %v3010_v59  ;;  %6825 = vmatpush1.msra.mxu1 %v422_v0  ;;  %6710 = vmatprep.mubr.f32.mxu1 %v9837_v18 }
 0x36e   :  { %v3012_v61 = vpop.f32.mrf.mxu1  ;;  %6978 = vmatprep.subr.mxu1 %v427_v42  ;;  %v5403_v5 = vpop.f32.mrf.mxu0 }
 0x36f   :  { %9092 = vst [vmem:[#allocation7 + $0x208] sm:$0xff] %v3012_v61  ;;  %9375 = vst [vmem:[#allocation7 + $0xae0] sm:$0xff] %v5403_v5  ;;  %v455_v5 = vld [vmem:[#allocation5 + $0x628] sm:$0xff] }
 0x370   :  { %v3016_v63 = vpop.f32.mrf.mxu1  ;;  %9662 = vmatmul.mubr.msk.f32.gmra.mxu1 %vm45_vm0, %v10466_v57  ;;  %v5405_v8 = vpop.f32.mrf.mxu0 }
 0x371   :  { %9313 = vst [vmem:[#allocation7 + $0x8f0] sm:$0xff] %v3016_v63  ;;  %6858 = vmatprep.mubr.f32.mxu1 %v9837_v18  ;;  %9376 = vst [vmem:[#allocation7 + $0xae8] sm:$0xff] %v5405_v8 }
 0x372   :  { %v3018_v3 = vpop.f32.mrf.mxu1  ;;  %v5551_v10 = vpop.f32.mrf.mxu0 }
 0x373   :  { %9314 = vst [vmem:[#allocation7 + $0x8f8] sm:$0xff] %v3018_v3  ;;  %9157 = vst [vmem:[#allocation7 + $0x410] sm:$0xff] %v5551_v10  ;;  %v450_v3 = vld [vmem:[#allocation5 + $0x600] sm:$0xff] }
 0x374   :  { %v3164_v7 = vpop.f32.mrf.mxu1  ;;  %9665 = vmatmul.mubr.msk.f32.vlgmr.msra.gmra.mxu1 %vm45_vm0, %v10458_v56  ;;  %v5553_v12 = vpop.f32.mrf.mxu0 }
 0x375   :  { %9095 = vst [vmem:[#allocation7 + $0x220] sm:$0xff] %v3164_v7  ;;  %6979 = vmatpush1.msra.mxu1 %v426_v4  ;;  %6864 = vmatprep.mubr.f32.mxu1 %v9837_v18  ;;  %9158 = vst [vmem:[#allocation7 + $0x418] sm:$0xff] %v5553_v12 }
 0x376   :  { %v3166_v9 = vpop.f32.mrf.mxu1  ;;  %7132 = vmatprep.subr.mxu1 %v431_v6  ;;  %v5557_v15 = vpop.f32.mrf.mxu0 }
 0x377   :  { %9096 = vst [vmem:[#allocation7 + $0x228] sm:$0xff] %v3166_v9  ;;  %9379 = vst [vmem:[#allocation7 + $0xb00] sm:$0xff] %v5557_v15  ;;  %v459_v15 = vld [vmem:[#allocation5 + $0x648] sm:$0xff] }
 0x378   :  { %v3170_v11 = vpop.f32.mrf.mxu1  ;;  %9666 = vmatmul.mubr.msk.f32.gmra.mxu1 %vm45_vm0, %v10466_v57  ;;  %v5559_v19 = vpop.f32.mrf.mxu0 }
 0x379   :  { %9317 = vst [vmem:[#allocation7 + $0x910] sm:$0xff] %v3170_v11  ;;  %7012 = vmatprep.mubr.f32.mxu1 %v9837_v18  ;;  %9380 = vst [vmem:[#allocation7 + $0xb08] sm:$0xff] %v5559_v19 }
 0x37a   :  { %v3172_v13 = vpop.f32.mrf.mxu1  ;;  %v5705_v21 = vpop.f32.mrf.mxu0 }
 0x37b   :  { %9318 = vst [vmem:[#allocation7 + $0x918] sm:$0xff] %v3172_v13  ;;  %9161 = vst [vmem:[#allocation7 + $0x430] sm:$0xff] %v5705_v21  ;;  %v454_v13 = vld [vmem:[#allocation5 + $0x620] sm:$0xff] }
 0x37c   :  { %v3318_v17 = vpop.f32.mrf.mxu1  ;;  %9669 = vmatmul.mubr.msk.f32.vlgmr.msra.gmra.mxu1 %vm45_vm0, %v10458_v56  ;;  %v5707_v23 = vpop.f32.mrf.mxu0 }
 0x37d   :  { %9099 = vst [vmem:[#allocation7 + $0x240] sm:$0xff] %v3318_v17  ;;  %7133 = vmatpush1.msra.mxu1 %v430_v14  ;;  %7018 = vmatprep.mubr.f32.mxu1 %v9837_v18  ;;  %9162 = vst [vmem:[#allocation7 + $0x438] sm:$0xff] %v5707_v23 }
 0x37e   :  { %v3320_v20 = vpop.f32.mrf.mxu1  ;;  %7286 = vmatprep.subr.mxu1 %v435_v16  ;;  %v5711_v26 = vpop.f32.mrf.mxu0 }
 0x37f   :  { %9100 = vst [vmem:[#allocation7 + $0x248] sm:$0xff] %v3320_v20  ;;  %9383 = vst [vmem:[#allocation7 + $0xb20] sm:$0xff] %v5711_v26  ;;  %v463_v26 = vld [vmem:[#allocation5 + $0x668] sm:$0xff] }
 0x380   :  { %v3324_v22 = vpop.f32.mrf.mxu1  ;;  %9670 = vmatmul.mubr.msk.f32.gmra.mxu1 %vm45_vm0, %v10466_v57  ;;  %v5713_v29 = vpop.f32.mrf.mxu0 }
 0x381   :  { %9321 = vst [vmem:[#allocation7 + $0x930] sm:$0xff] %v3324_v22  ;;  %7166 = vmatprep.mubr.f32.mxu1 %v9837_v18  ;;  %9384 = vst [vmem:[#allocation7 + $0xb28] sm:$0xff] %v5713_v29 }
 0x382   :  { %v3326_v24 = vpop.f32.mrf.mxu1  ;;  %v5859_v31 = vpop.f32.mrf.mxu0 }
 0x383   :  { %9322 = vst [vmem:[#allocation7 + $0x938] sm:$0xff] %v3326_v24  ;;  %9165 = vst [vmem:[#allocation7 + $0x450] sm:$0xff] %v5859_v31  ;;  %v458_v24 = vld [vmem:[#allocation5 + $0x640] sm:$0xff] }
 0x384   :  { %v3472_v28 = vpop.f32.mrf.mxu1  ;;  %9673 = vmatmul.mubr.msk.f32.vlgmr.msra.gmra.mxu1 %vm45_vm0, %v10458_v56  ;;  %v5861_v33 = vpop.f32.mrf.mxu0 }
 0x385   :  { %9103 = vst [vmem:[#allocation7 + $0x260] sm:$0xff] %v3472_v28  ;;  %7287 = vmatpush1.msra.mxu1 %v434_v25  ;;  %7172 = vmatprep.mubr.f32.mxu1 %v9837_v18  ;;  %9166 = vst [vmem:[#allocation7 + $0x458] sm:$0xff] %v5861_v33 }
 0x386   :  { %v3474_v30 = vpop.f32.mrf.mxu1  ;;  %7440 = vmatprep.subr.mxu1 %v439_v27  ;;  %v5865_v36 = vpop.f32.mrf.mxu0 }
 0x387   :  { %9104 = vst [vmem:[#allocation7 + $0x268] sm:$0xff] %v3474_v30  ;;  %9387 = vst [vmem:[#allocation7 + $0xb40] sm:$0xff] %v5865_v36  ;;  %v467_v36 = vld [vmem:[#allocation5 + $0x688] sm:$0xff] }
 0x388   :  { %v3478_v32 = vpop.f32.mrf.mxu1  ;;  %9674 = vmatmul.mubr.msk.f32.gmra.mxu1 %vm45_vm0, %v10466_v57  ;;  %v5867_v39 = vpop.f32.mrf.mxu0 }
 0x389   :  { %9325 = vst [vmem:[#allocation7 + $0x950] sm:$0xff] %v3478_v32  ;;  %7320 = vmatprep.mubr.f32.mxu1 %v9837_v18  ;;  %9388 = vst [vmem:[#allocation7 + $0xb48] sm:$0xff] %v5867_v39 }
 0x38a   :  { %v3480_v34 = vpop.f32.mrf.mxu1  ;;  %v6013_v43 = vpop.f32.mrf.mxu0 }
 0x38b   :  { %9326 = vst [vmem:[#allocation7 + $0x958] sm:$0xff] %v3480_v34  ;;  %9169 = vst [vmem:[#allocation7 + $0x470] sm:$0xff] %v6013_v43  ;;  %v462_v34 = vld [vmem:[#allocation5 + $0x660] sm:$0xff] }
 0x38c   :  { %v3626_v38 = vpop.f32.mrf.mxu1  ;;  %9677 = vmatmul.mubr.msk.f32.vlgmr.msra.gmra.mxu1 %vm45_vm0, %v10458_v56  ;;  %v6015_v45 = vpop.f32.mrf.mxu0 }
 0x38d   :  { %9107 = vst [vmem:[#allocation7 + $0x280] sm:$0xff] %v3626_v38  ;;  %7441 = vmatpush1.msra.mxu1 %v438_v35  ;;  %7326 = vmatprep.mubr.f32.mxu1 %v9837_v18  ;;  %9170 = vst [vmem:[#allocation7 + $0x478] sm:$0xff] %v6015_v45 }
 0x38e   :  { %v3628_v41 = vpop.f32.mrf.mxu1  ;;  %7594 = vmatprep.subr.mxu1 %v443_v37  ;;  %v6019_v1 = vpop.f32.mrf.mxu0 }
 0x38f   :  { %9108 = vst [vmem:[#allocation7 + $0x288] sm:$0xff] %v3628_v41  ;;  %9391 = vst [vmem:[#allocation7 + $0xb60] sm:$0xff] %v6019_v1  ;;  %v471_v1 = vld [vmem:[#allocation5 + $0x6a8] sm:$0xff] }
 0x390   :  { %v3632_v44 = vpop.f32.mrf.mxu1  ;;  %9678 = vmatmul.mubr.msk.f32.gmra.mxu1 %vm45_vm0, %v10466_v57  ;;  %v6021_v51 = vpop.f32.mrf.mxu0 }
 0x391   :  { %9329 = vst [vmem:[#allocation7 + $0x970] sm:$0xff] %v3632_v44  ;;  %7474 = vmatprep.mubr.f32.mxu1 %v9837_v18  ;;  %9392 = vst [vmem:[#allocation7 + $0xb68] sm:$0xff] %v6021_v51 }
 0x392   :  { %v3634_v46 = vpop.f32.mrf.mxu1  ;;  %v6167_v53 = vpop.f32.mrf.mxu0 }
 0x393   :  { %9330 = vst [vmem:[#allocation7 + $0x978] sm:$0xff] %v3634_v46  ;;  %9173 = vst [vmem:[#allocation7 + $0x490] sm:$0xff] %v6167_v53  ;;  %v466_v46 = vld [vmem:[#allocation5 + $0x680] sm:$0xff] }
 0x394   :  { %v3780_v50 = vpop.f32.mrf.mxu1  ;;  %9681 = vmatmul.mubr.msk.f32.vlgmr.msra.gmra.mxu1 %vm45_vm0, %v10458_v56  ;;  %v6169_v55 = vpop.f32.mrf.mxu0 }
 0x395   :  { %9111 = vst [vmem:[#allocation7 + $0x2a0] sm:$0xff] %v3780_v50  ;;  %7595 = vmatpush1.msra.mxu1 %v442_v47  ;;  %7480 = vmatprep.mubr.f32.mxu1 %v9837_v18  ;;  %9174 = vst [vmem:[#allocation7 + $0x498] sm:$0xff] %v6169_v55 }
 0x396   :  { %v3782_v52 = vpop.f32.mrf.mxu1  ;;  %7748 = vmatprep.subr.mxu1 %v447_v49  ;;  %v6173_v0 = vpop.f32.mrf.mxu0 }
 0x397   :  { %9112 = vst [vmem:[#allocation7 + $0x2a8] sm:$0xff] %v3782_v52  ;;  %9395 = vst [vmem:[#allocation7 + $0xb80] sm:$0xff] %v6173_v0  ;;  %v475_v0 = vld [vmem:[#allocation5 + $0x6c8] sm:$0xff] }
 0x398   :  { %v3786_v54 = vpop.f32.mrf.mxu1  ;;  %9682 = vmatmul.mubr.msk.f32.gmra.mxu1 %vm45_vm0, %v10466_v57  ;;  %v6175_v59 = vpop.f32.mrf.mxu0 }
 0x399   :  { %9333 = vst [vmem:[#allocation7 + $0x990] sm:$0xff] %v3786_v54  ;;  %7628 = vmatprep.mubr.f32.mxu1 %v9837_v18  ;;  %9396 = vst [vmem:[#allocation7 + $0xb88] sm:$0xff] %v6175_v59 }
 0x39a   :  { %v3788_v40 = vpop.f32.mrf.mxu1  ;;  %v6321_v61 = vpop.f32.mrf.mxu0 }
 0x39b   :  { %9334 = vst [vmem:[#allocation7 + $0x998] sm:$0xff] %v3788_v40  ;;  %9177 = vst [vmem:[#allocation7 + $0x4b0] sm:$0xff] %v6321_v61  ;;  %v470_v40 = vld [vmem:[#allocation5 + $0x6a0] sm:$0xff] }
 0x39c   :  { %v3934_v42 = vpop.f32.mrf.mxu1  ;;  %9685 = vmatmul.mubr.msk.f32.vlgmr.msra.gmra.mxu1 %vm45_vm0, %v10458_v56  ;;  %v6323_v63 = vpop.f32.mrf.mxu0 }
 0x39d   :  { %9115 = vst [vmem:[#allocation7 + $0x2c0] sm:$0xff] %v3934_v42  ;;  %7749 = vmatpush1.msra.mxu1 %v446_v48  ;;  %7634 = vmatprep.mubr.f32.mxu1 %v9837_v18  ;;  %9178 = vst [vmem:[#allocation7 + $0x4b8] sm:$0xff] %v6323_v63 }
 0x39e   :  { %v3936_v60 = vpop.f32.mrf.mxu1  ;;  %7902 = vmatprep.subr.mxu1 %v451_v58  ;;  %v6327_v4 = vpop.f32.mrf.mxu0 }
 0x39f   :  { %9116 = vst [vmem:[#allocation7 + $0x2c8] sm:$0xff] %v3936_v60  ;;  %9399 = vst [vmem:[#allocation7 + $0xba0] sm:$0xff] %v6327_v4  ;;  %v479_v4 = vld [vmem:[#allocation5 + $0x6e8] sm:$0xff] }
 0x3a0   :  { %v3940_v62 = vpop.f32.mrf.mxu1  ;;  %9686 = vmatmul.mubr.msk.f32.gmra.mxu1 %vm45_vm0, %v10466_v57  ;;  %v6329_v7 = vpop.f32.mrf.mxu0 }
 0x3a1   :  { %9337 = vst [vmem:[#allocation7 + $0x9b0] sm:$0xff] %v3940_v62  ;;  %7782 = vmatprep.mubr.f32.mxu1 %v9837_v18  ;;  %9400 = vst [vmem:[#allocation7 + $0xba8] sm:$0xff] %v6329_v7 }
 0x3a2   :  { %v3942_v2 = vpop.f32.mrf.mxu1  ;;  %v6475_v9 = vpop.f32.mrf.mxu0 }
 0x3a3   :  { %9338 = vst [vmem:[#allocation7 + $0x9b8] sm:$0xff] %v3942_v2  ;;  %9181 = vst [vmem:[#allocation7 + $0x4d0] sm:$0xff] %v6475_v9  ;;  %v474_v2 = vld [vmem:[#allocation5 + $0x6c0] sm:$0xff] }
 0x3a4   :  { %v4088_v6 = vpop.f32.mrf.mxu1  ;;  %9689 = vmatmul.mubr.msk.f32.vlgmr.msra.gmra.mxu1 %vm45_vm0, %v10458_v56  ;;  %v6477_v11 = vpop.f32.mrf.mxu0 }
 0x3a5   :  { %9119 = vst [vmem:[#allocation7 + $0x2e0] sm:$0xff] %v4088_v6  ;;  %7903 = vmatpush1.msra.mxu1 %v450_v3  ;;  %7788 = vmatprep.mubr.f32.mxu1 %v9837_v18  ;;  %9182 = vst [vmem:[#allocation7 + $0x4d8] sm:$0xff] %v6477_v11 }
 0x3a6   :  { %v4090_v8 = vpop.f32.mrf.mxu1  ;;  %8056 = vmatprep.subr.mxu1 %v455_v5  ;;  %v6481_v14 = vpop.f32.mrf.mxu0 }
 0x3a7   :  { %9120 = vst [vmem:[#allocation7 + $0x2e8] sm:$0xff] %v4090_v8  ;;  %9403 = vst [vmem:[#allocation7 + $0xbc0] sm:$0xff] %v6481_v14 }
 0x3a8   :  { %v4094_v10 = vpop.f32.mrf.mxu1  ;;  %9690 = vmatmul.mubr.msk.f32.gmra.mxu1 %vm45_vm0, %v10466_v57  ;;  %v6483_v17 = vpop.f32.mrf.mxu0 }
 0x3a9   :  { %9341 = vst [vmem:[#allocation7 + $0x9d0] sm:$0xff] %v4094_v10  ;;  %7936 = vmatprep.mubr.f32.mxu1 %v9837_v18  ;;  %9404 = vst [vmem:[#allocation7 + $0xbc8] sm:$0xff] %v6483_v17 }
 0x3aa   :  { %v4096_v12 = vpop.f32.mrf.mxu1  ;;  %v6629_v20 = vpop.f32.mrf.mxu0 }
 0x3ab   :  { %9342 = vst [vmem:[#allocation7 + $0x9d8] sm:$0xff] %v4096_v12  ;;  %9185 = vst [vmem:[#allocation7 + $0x4f0] sm:$0xff] %v6629_v20  ;;  %v478_v12 = vld [vmem:[#allocation5 + $0x6e0] sm:$0xff] }
 0x3ac   :  { %v4242_v16 = vpop.f32.mrf.mxu1  ;;  %9693 = vmatmul.mubr.msk.f32.vlgmr.msra.gmra.mxu1 %vm45_vm0, %v10458_v56  ;;  %v6631_v22 = vpop.f32.mrf.mxu0 }
 0x3ad   :  { %9123 = vst [vmem:[#allocation7 + $0x300] sm:$0xff] %v4242_v16  ;;  %8057 = vmatpush1.msra.mxu1 %v454_v13  ;;  %7942 = vmatprep.mubr.f32.mxu1 %v9837_v18  ;;  %9186 = vst [vmem:[#allocation7 + $0x4f8] sm:$0xff] %v6631_v22 }
 0x3ae   :  { %v4244_v19 = vpop.f32.mrf.mxu1  ;;  %8210 = vmatprep.subr.mxu1 %v459_v15 }
 0x3af   :  { %9124 = vst [vmem:[#allocation7 + $0x308] sm:$0xff] %v4244_v19  ;;  %v6635_v25 = vpop.f32.mrf.mxu0  ;;  %v9765_v19 = vld [vmem:[%s10634_s0 + $0x8] sm:$0xff] }
 0x3b0   :  { %v4248_v21 = vpop.f32.mrf.mxu1  ;;  %9694 = vmatmul.mubr.msk.f32.gmra.mxu1 %vm45_vm0, %v10466_v57  ;;  %9407 = vst [vmem:[#allocation7 + $0xbe0] sm:$0xff] %v6635_v25 }
 0x3b1   :  { %9345 = vst [vmem:[#allocation7 + $0x9f0] sm:$0xff] %v4248_v21  ;;  %8090 = vmatprep.mubr.f32.mxu1 %v9837_v18  ;;  %v6637_v28 = vpop.f32.mrf.mxu0 }
 0x3b2   :  { %v4250_v23 = vpop.f32.mrf.mxu1  ;;  %9408 = vst [vmem:[#allocation7 + $0xbe8] sm:$0xff] %v6637_v28 }
 0x3b3   :  { %9346 = vst [vmem:[#allocation7 + $0x9f8] sm:$0xff] %v4250_v23  ;;  %v6783_v30 = vpop.f32.mrf.mxu0  ;;  %v9766_v23 = vld [vmem:[%s10634_s0] sm:$0xff]  ;;  %s9838_s0 = smov [#allocation7]  }
 0x3b4   :  { %v4396_v27 = vpop.f32.mrf.mxu1  ;;  %9697 = vmatmul.mubr.msk.f32.vlgmr.msra.gmra.mxu1 %vm45_vm0, %v10458_v56  ;;  %9189 = vst [vmem:[#allocation7 + $0x510] sm:$0xff] %v6783_v30  ;;  %s9478_s26 = sshll.u32 %s9838_s0, 4  ;;  %s9479_s26 = int_to_ptr.vmem [resolvable:$true] %s9478_s26 }
 0x3b5   :  { %9127 = vst [vmem:[#allocation7 + $0x320] sm:$0xff] %v4396_v27  ;;  %8211 = vmatpush1.msra.mxu1 %v458_v24  ;;  %8096 = vmatprep.mubr.f32.mxu1 %v9837_v18  ;;  %v6785_v32 = vpop.f32.mrf.mxu0  ;;  %s9807_s1 = scalar_lea.vmem %s9479_s26, 56832  ;;  %p9812_p11 = scmp.lt.s32.totalorder %s9479_s26, %s9479_s26 }
 0x3b6   :  { %v4398_v29 = vpop.f32.mrf.mxu1  ;;  %8364 = vmatprep.subr.mxu1 %v463_v26  ;;  %9190 = vst [vmem:[#allocation7 + $0x518] sm:$0xff] %v6785_v32  ;;  %p9808_p10 = scmp.ne.s32.totalorder %s9479_s26, %s9807_s1  ;;  %p9813_p12 = scmp.lt.s32.totalorder %s9807_s1, %s9807_s1 }
 0x3b7   :  { %9128 = vst [vmem:[#allocation7 + $0x328] sm:$0xff] %v4398_v29  ;;  %v6789_v35 = vpop.f32.mrf.mxu0 }
 0x3b8   :  { %v4402_v31 = vpop.f32.mrf.mxu1  ;;  %9698 = vmatmul.mubr.msk.f32.gmra.mxu1 %vm45_vm0, %v10466_v57  ;;  %9411 = vst [vmem:[#allocation7 + $0xc00] sm:$0xff] %v6789_v35  ;;  %p9814_p13 = por %p9813_p12, %p9812_p11 }
 0x3b9   :  { %9349 = vst [vmem:[#allocation7 + $0xa10] sm:$0xff] %v4402_v31  ;;  %8244 = vmatprep.mubr.f32.mxu1 %v9837_v18  ;;  %v6791_v38 = vpop.f32.mrf.mxu0 }
 0x3ba   :  { %v4404_v33 = vpop.f32.mrf.mxu1  ;;  %9412 = vst [vmem:[#allocation7 + $0xc08] sm:$0xff] %v6791_v38  ;;  %p9815_p0 = pnand %p9814_p13, %p9808_p10 }
 0x3bb   :  { %9350 = vst [vmem:[#allocation7 + $0xa18] sm:$0xff] %v4404_v33  ;;  %v6937_v41 = vpop.f32.mrf.mxu0 }
 0x3bc   :  { %v4550_v37 = vpop.f32.mrf.mxu1  ;;  %9701 = vmatmul.mubr.msk.f32.vlgmr.msra.gmra.mxu1 %vm45_vm0, %v10458_v56  ;;  %9193 = vst [vmem:[#allocation7 + $0x530] sm:$0xff] %v6937_v41 }
 0x3bd   :  { %9131 = vst [vmem:[#allocation7 + $0x340] sm:$0xff] %v4550_v37  ;;  %8365 = vmatpush1.msra.mxu1 %v462_v34  ;;  %8250 = vmatprep.mubr.f32.mxu1 %v9837_v18  ;;  %v6939_v44 = vpop.f32.mrf.mxu0 }
 0x3be   :  { %v4552_v39 = vpop.f32.mrf.mxu1  ;;  %8518 = vmatprep.subr.mxu1 %v467_v36  ;;  %9194 = vst [vmem:[#allocation7 + $0x538] sm:$0xff] %v6939_v44 }
 0x3bf   :  { %9132 = vst [vmem:[#allocation7 + $0x348] sm:$0xff] %v4552_v39  ;;  %v6943_v47 = vpop.f32.mrf.mxu0 }
 0x3c0   :  { %v4556_v43 = vpop.f32.mrf.mxu1  ;;  %9702 = vmatmul.mubr.msk.f32.gmra.mxu1 %vm45_vm0, %v10466_v57  ;;  %9415 = vst [vmem:[#allocation7 + $0xc20] sm:$0xff] %v6943_v47 }
 0x3c1   :  { %9353 = vst [vmem:[#allocation7 + $0xa30] sm:$0xff] %v4556_v43  ;;  %8398 = vmatprep.mubr.f32.mxu1 %v9837_v18  ;;  %v6945_v50 = vpop.f32.mrf.mxu0 }
 0x3c2   :  { %v4558_v45 = vpop.f32.mrf.mxu1  ;;  %9416 = vst [vmem:[#allocation7 + $0xc28] sm:$0xff] %v6945_v50 }
 0x3c3   :  { %9354 = vst [vmem:[#allocation7 + $0xa38] sm:$0xff] %v4558_v45  ;;  %v7091_v52 = vpop.f32.mrf.mxu0 }
 0x3c4   :  { %v4704_v49 = vpop.f32.mrf.mxu1  ;;  %9705 = vmatmul.mubr.msk.f32.vlgmr.msra.gmra.mxu1 %vm45_vm0, %v10458_v56  ;;  %9197 = vst [vmem:[#allocation7 + $0x550] sm:$0xff] %v7091_v52 }
 0x3c5   :  { %9135 = vst [vmem:[#allocation7 + $0x360] sm:$0xff] %v4704_v49  ;;  %8519 = vmatpush1.msra.mxu1 %v466_v46  ;;  %8404 = vmatprep.mubr.f32.mxu1 %v9837_v18  ;;  %v7093_v54 = vpop.f32.mrf.mxu0 }
 0x3c6   :  { %v4706_v51 = vpop.f32.mrf.mxu1  ;;  %8672 = vmatprep.subr.mxu1 %v471_v1  ;;  %9198 = vst [vmem:[#allocation7 + $0x558] sm:$0xff] %v7093_v54 }
 0x3c7   :  { %9136 = vst [vmem:[#allocation7 + $0x368] sm:$0xff] %v4706_v51  ;;  %v7097_v48 = vpop.f32.mrf.mxu0 }
 0x3c8   :  { %v4710_v53 = vpop.f32.mrf.mxu1  ;;  %9706 = vmatmul.mubr.msk.f32.gmra.mxu1 %vm45_vm0, %v10466_v57  ;;  %9419 = vst [vmem:[#allocation7 + $0xc40] sm:$0xff] %v7097_v48 }
 0x3c9   :  { %9357 = vst [vmem:[#allocation7 + $0xa50] sm:$0xff] %v4710_v53  ;;  %8552 = vmatprep.mubr.f32.mxu1 %v9837_v18  ;;  %v7099_v42 = vpop.f32.mrf.mxu0 }
 0x3ca   :  { %v4712_v55 = vpop.f32.mrf.mxu1  ;;  %9420 = vst [vmem:[#allocation7 + $0xc48] sm:$0xff] %v7099_v42 }
 0x3cb   :  { %9358 = vst [vmem:[#allocation7 + $0xa58] sm:$0xff] %v4712_v55  ;;  %v7245_v60 = vpop.f32.mrf.mxu0 }
 0x3cc   :  { %v4858_v58 = vpop.f32.mrf.mxu1  ;;  %9709 = vmatmul.mubr.msk.f32.vlgmr.msra.gmra.mxu1 %vm45_vm0, %v10458_v56  ;;  %9201 = vst [vmem:[#allocation7 + $0x570] sm:$0xff] %v7245_v60 }
 0x3cd   :  { %9139 = vst [vmem:[#allocation7 + $0x380] sm:$0xff] %v4858_v58  ;;  %8673 = vmatpush1.msra.mxu1 %v470_v40  ;;  %8558 = vmatprep.mubr.f32.mxu1 %v9837_v18  ;;  %v7247_v62 = vpop.f32.mrf.mxu0 }
 0x3ce   :  { %v4860_v59 = vpop.f32.mrf.mxu1  ;;  %8826 = vmatprep.subr.mxu1 %v475_v0  ;;  %9202 = vst [vmem:[#allocation7 + $0x578] sm:$0xff] %v7247_v62 }
 0x3cf   :  { %9140 = vst [vmem:[#allocation7 + $0x388] sm:$0xff] %v4860_v59  ;;  %v7251_v3 = vpop.f32.mrf.mxu0 }
 0x3d0   :  { %v4864_v61 = vpop.f32.mrf.mxu1  ;;  %9710 = vmatmul.mubr.msk.f32.gmra.mxu1 %vm45_vm0, %v10466_v57  ;;  %9423 = vst [vmem:[#allocation7 + $0xc60] sm:$0xff] %v7251_v3 }
 0x3d1   :  { %9361 = vst [vmem:[#allocation7 + $0xa70] sm:$0xff] %v4864_v61  ;;  %8706 = vmatprep.mubr.f32.mxu1 %v9837_v18  ;;  %v7253_v6 = vpop.f32.mrf.mxu0 }
 0x3d2   :  { %v4866_v63 = vpop.f32.mrf.mxu1  ;;  %9424 = vst [vmem:[#allocation7 + $0xc68] sm:$0xff] %v7253_v6 }
 0x3d3   :  { %9362 = vst [vmem:[#allocation7 + $0xa78] sm:$0xff] %v4866_v63  ;;  %v7399_v8 = vpop.f32.mrf.mxu0 }
 0x3d4   :  { %v5012_v5 = vpop.f32.mrf.mxu1  ;;  %9713 = vmatmul.mubr.msk.f32.vlgmr.msra.gmra.mxu1 %vm45_vm0, %v10458_v56  ;;  %9205 = vst [vmem:[#allocation7 + $0x590] sm:$0xff] %v7399_v8 }
 0x3d5   :  { %9143 = vst [vmem:[#allocation7 + $0x3a0] sm:$0xff] %v5012_v5  ;;  %8827 = vmatpush1.msra.mxu1 %v474_v2  ;;  %8712 = vmatprep.mubr.f32.mxu1 %v9837_v18  ;;  %v7401_v10 = vpop.f32.mrf.mxu0 }
 0x3d6   :  { %v5014_v7 = vpop.f32.mrf.mxu1  ;;  %8980 = vmatprep.subr.mxu1 %v479_v4  ;;  %9206 = vst [vmem:[#allocation7 + $0x598] sm:$0xff] %v7401_v10 }
 0x3d7   :  { %9144 = vst [vmem:[#allocation7 + $0x3a8] sm:$0xff] %v5014_v7  ;;  %v7405_v13 = vpop.f32.mrf.mxu0 }
 0x3d8   :  { %v5018_v9 = vpop.f32.mrf.mxu1  ;;  %9714 = vmatmul.mubr.msk.f32.gmra.mxu1 %vm45_vm0, %v10466_v57  ;;  %9427 = vst [vmem:[#allocation7 + $0xc80] sm:$0xff] %v7405_v13 }
 0x3d9   :  { %9365 = vst [vmem:[#allocation7 + $0xa90] sm:$0xff] %v5018_v9  ;;  %8860 = vmatprep.mubr.f32.mxu1 %v9837_v18  ;;  %v7407_v15 = vpop.f32.mrf.mxu0 }
 0x3da   :  { %v5020_v11 = vpop.f32.mrf.mxu1  ;;  %9428 = vst [vmem:[#allocation7 + $0xc88] sm:$0xff] %v7407_v15 }
 0x3db   :  { %9366 = vst [vmem:[#allocation7 + $0xa98] sm:$0xff] %v5020_v11  ;;  %v7553_v16 = vpop.f32.mrf.mxu0 }
 0x3dc   :  { %v5166_v14 = vpop.f32.mrf.mxu1  ;;  %9717 = vmatmul.mubr.msk.f32.vlgmr.msra.gmra.mxu1 %vm45_vm0, %v10458_v56  ;;  %9209 = vst [vmem:[#allocation7 + $0x5b0] sm:$0xff] %v7553_v16 }
 0x3dd   :  { %9147 = vst [vmem:[#allocation7 + $0x3c0] sm:$0xff] %v5166_v14  ;;  %8981 = vmatpush1.msra.mxu1 %v478_v12  ;;  %8866 = vmatprep.mubr.f32.mxu1 %v9837_v18  ;;  %v7555_v20 = vpop.f32.mrf.mxu0 }
 0x3de   :  { %v5168_v57 = vpop.f32.mrf.mxu1  ;;  %9210 = vst [vmem:[#allocation7 + $0x5b8] sm:$0xff] %v7555_v20 }
 0x3df   :  { %9148 = vst [vmem:[#allocation7 + $0x3c8] sm:$0xff] %v5168_v57  ;;  %v7559_v21 = vpop.f32.mrf.mxu0 }
 0x3e0   :  { %v5172_v17 = vpop.f32.mrf.mxu1  ;;  %9718 = vmatmul.mubr.msk.f32.gmra.mxu1 %vm45_vm0, %v9765_v19  ;;  %9431 = vst [vmem:[#allocation7 + $0xca0] sm:$0xff] %v7559_v21 }
 0x3e1   :  { %9369 = vst [vmem:[#allocation7 + $0xab0] sm:$0xff] %v5172_v17  ;;  %9014 = vmatprep.mubr.f32.mxu1 %v9837_v18  ;;  %v7561_v24 = vpop.f32.mrf.mxu0 }
 0x3e2   :  { %v5174_v56 = vpop.f32.mrf.mxu1  ;;  %9432 = vst [vmem:[#allocation7 + $0xca8] sm:$0xff] %v7561_v24 }
 0x3e3   :  { %9370 = vst [vmem:[#allocation7 + $0xab8] sm:$0xff] %v5174_v56  ;;  %v7707_v26 = vpop.f32.mrf.mxu0 }
 0x3e4   :  { %v5320_v22 = vpop.f32.mrf.mxu1  ;;  %9721 = vmatmul.mubr.msk.f32.vlgmr.msra.gmra.mxu1 %vm45_vm0, %v9766_v23  ;;  %9213 = vst [vmem:[#allocation7 + $0x5d0] sm:$0xff] %v7707_v26 }
 0x3e5   :  { %9151 = vst [vmem:[#allocation7 + $0x3e0] sm:$0xff] %v5320_v22  ;;  %9020 = vmatprep.mubr.f32.mxu1 %v9837_v18  ;;  %v7709_v28 = vpop.f32.mrf.mxu0 }
 0x3e6   :  { %v5322_v25 = vpop.f32.mrf.mxu1  ;;  %9214 = vst [vmem:[#allocation7 + $0x5d8] sm:$0xff] %v7709_v28 }
 0x3e7   :  { %9152 = vst [vmem:[#allocation7 + $0x3e8] sm:$0xff] %v5322_v25  ;;  %v7713_v30 = vpop.f32.mrf.mxu0 }
 0x3e8   :  { %v5326_v27 = vpop.f32.mrf.mxu1  ;;  %9722 = vmatmul.mubr.msk.f32.gmra.mxu1 %vm45_vm0, %v9765_v19  ;;  %9435 = vst [vmem:[#allocation7 + $0xcc0] sm:$0xff] %v7713_v30 }
 0x3e9   :  { %9373 = vst [vmem:[#allocation7 + $0xad0] sm:$0xff] %v5326_v27  ;;  %v7715_v32 = vpop.f32.mrf.mxu0 }
 0x3ea   :  { %v5328_v29 = vpop.f32.mrf.mxu1  ;;  %9436 = vst [vmem:[#allocation7 + $0xcc8] sm:$0xff] %v7715_v32 }
 0x3eb   :  { %9374 = vst [vmem:[#allocation7 + $0xad8] sm:$0xff] %v5328_v29  ;;  %v7861_v33 = vpop.f32.mrf.mxu0 }
 0x3ec   :  { %v5474_v31 = vpop.f32.mrf.mxu1  ;;  %9217 = vst [vmem:[#allocation7 + $0x5f0] sm:$0xff] %v7861_v33 }
 0x3ed   :  { %9155 = vst [vmem:[#allocation7 + $0x400] sm:$0xff] %v5474_v31  ;;  %v7863_v35 = vpop.f32.mrf.mxu0 }
 0x3ee   :  { %v5476_v18 = vpop.f32.mrf.mxu1  ;;  %9218 = vst [vmem:[#allocation7 + $0x5f8] sm:$0xff] %v7863_v35 }
 0x3ef   :  { %9156 = vst [vmem:[#allocation7 + $0x408] sm:$0xff] %v5476_v18  ;;  %v7867_v37 = vpop.f32.mrf.mxu0 }
 0x3f0   :  { %v5480_v34 = vpop.f32.mrf.mxu1  ;;  %9439 = vst [vmem:[#allocation7 + $0xce0] sm:$0xff] %v7867_v37 }
 0x3f1   :  { %9377 = vst [vmem:[#allocation7 + $0xaf0] sm:$0xff] %v5480_v34  ;;  %v7869_v39 = vpop.f32.mrf.mxu0 }
 0x3f2   :  { %v5482_v36 = vpop.f32.mrf.mxu1  ;;  %9440 = vst [vmem:[#allocation7 + $0xce8] sm:$0xff] %v7869_v39 }
 0x3f3   :  { %9378 = vst [vmem:[#allocation7 + $0xaf8] sm:$0xff] %v5482_v36  ;;  %v8015_v43 = vpop.f32.mrf.mxu0 }
 0x3f4   :  { %v5628_v38 = vpop.f32.mrf.mxu1  ;;  %9221 = vst [vmem:[#allocation7 + $0x610] sm:$0xff] %v8015_v43 }
 0x3f5   :  { %9159 = vst [vmem:[#allocation7 + $0x420] sm:$0xff] %v5628_v38  ;;  %v8017_v45 = vpop.f32.mrf.mxu0 }
 0x3f6   :  { %v5630_v41 = vpop.f32.mrf.mxu1  ;;  %9222 = vst [vmem:[#allocation7 + $0x618] sm:$0xff] %v8017_v45 }
 0x3f7   :  { %9160 = vst [vmem:[#allocation7 + $0x428] sm:$0xff] %v5630_v41  ;;  %v8021_v47 = vpop.f32.mrf.mxu0 }
 0x3f8   :  { %v5634_v44 = vpop.f32.mrf.mxu1  ;;  %9443 = vst [vmem:[#allocation7 + $0xd00] sm:$0xff] %v8021_v47 }
 0x3f9   :  { %9381 = vst [vmem:[#allocation7 + $0xb10] sm:$0xff] %v5634_v44  ;;  %v8023_v49 = vpop.f32.mrf.mxu0 }
 0x3fa   :  { %v5636_v46 = vpop.f32.mrf.mxu1  ;;  %9444 = vst [vmem:[#allocation7 + $0xd08] sm:$0xff] %v8023_v49 }
 0x3fb   :  { %9382 = vst [vmem:[#allocation7 + $0xb18] sm:$0xff] %v5636_v46  ;;  %v8169_v51 = vpop.f32.mrf.mxu0 }
 0x3fc   :  { %v5782_v1 = vpop.f32.mrf.mxu1  ;;  %9225 = vst [vmem:[#allocation7 + $0x630] sm:$0xff] %v8169_v51 }
 0x3fd   :  { %9163 = vst [vmem:[#allocation7 + $0x440] sm:$0xff] %v5782_v1  ;;  %v8171_v53 = vpop.f32.mrf.mxu0 }
 0x3fe   :  { %v5784_v50 = vpop.f32.mrf.mxu1  ;;  %9226 = vst [vmem:[#allocation7 + $0x638] sm:$0xff] %v8171_v53 }
 0x3ff   :  { %9164 = vst [vmem:[#allocation7 + $0x448] sm:$0xff] %v5784_v50  ;;  %v8175_v55 = vpop.f32.mrf.mxu0 }
 0x400   :  { %v5788_v52 = vpop.f32.mrf.mxu1  ;;  %9447 = vst [vmem:[#allocation7 + $0xd20] sm:$0xff] %v8175_v55 }
 0x401   :  { %9385 = vst [vmem:[#allocation7 + $0xb30] sm:$0xff] %v5788_v52  ;;  %v8177_v48 = vpop.f32.mrf.mxu0 }
 0x402   :  { %v5790_v54 = vpop.f32.mrf.mxu1  ;;  %9448 = vst [vmem:[#allocation7 + $0xd28] sm:$0xff] %v8177_v48 }
 0x403   :  { %9386 = vst [vmem:[#allocation7 + $0xb38] sm:$0xff] %v5790_v54  ;;  %v8323_v58 = vpop.f32.mrf.mxu0 }
 0x404   :  { %v5936_v40 = vpop.f32.mrf.mxu1  ;;  %9229 = vst [vmem:[#allocation7 + $0x650] sm:$0xff] %v8323_v58 }
 0x405   :  { %9167 = vst [vmem:[#allocation7 + $0x460] sm:$0xff] %v5936_v40  ;;  %v8325_v59 = vpop.f32.mrf.mxu0 }
 0x406   :  { %v5938_v0 = vpop.f32.mrf.mxu1  ;;  %9230 = vst [vmem:[#allocation7 + $0x658] sm:$0xff] %v8325_v59 }
 0x407   :  { %9168 = vst [vmem:[#allocation7 + $0x468] sm:$0xff] %v5938_v0  ;;  %v8329_v61 = vpop.f32.mrf.mxu0 }
 0x408   :  { %v5942_v42 = vpop.f32.mrf.mxu1  ;;  %9451 = vst [vmem:[#allocation7 + $0xd40] sm:$0xff] %v8329_v61 }
 0x409   :  { %9389 = vst [vmem:[#allocation7 + $0xb50] sm:$0xff] %v5942_v42  ;;  %v8331_v63 = vpop.f32.mrf.mxu0 }
 0x40a   :  { %v5944_v60 = vpop.f32.mrf.mxu1  ;;  %9452 = vst [vmem:[#allocation7 + $0xd48] sm:$0xff] %v8331_v63 }
 0x40b   :  { %9390 = vst [vmem:[#allocation7 + $0xb58] sm:$0xff] %v5944_v60  ;;  %v8477_v3 = vpop.f32.mrf.mxu0 }
 0x40c   :  { %v6090_v62 = vpop.f32.mrf.mxu1  ;;  %9233 = vst [vmem:[#allocation7 + $0x670] sm:$0xff] %v8477_v3 }
 0x40d   :  { %9171 = vst [vmem:[#allocation7 + $0x480] sm:$0xff] %v6090_v62  ;;  %v8479_v5 = vpop.f32.mrf.mxu0 }
 0x40e   :  { %v6092_v2 = vpop.f32.mrf.mxu1  ;;  %9234 = vst [vmem:[#allocation7 + $0x678] sm:$0xff] %v8479_v5 }
 0x40f   :  { %9172 = vst [vmem:[#allocation7 + $0x488] sm:$0xff] %v6092_v2  ;;  %v8483_v7 = vpop.f32.mrf.mxu0 }
 0x410   :  { %v6096_v4 = vpop.f32.mrf.mxu1  ;;  %9455 = vst [vmem:[#allocation7 + $0xd60] sm:$0xff] %v8483_v7 }
 0x411   :  { %9393 = vst [vmem:[#allocation7 + $0xb70] sm:$0xff] %v6096_v4  ;;  %v8485_v9 = vpop.f32.mrf.mxu0 }
 0x412   :  { %v6098_v6 = vpop.f32.mrf.mxu1  ;;  %9456 = vst [vmem:[#allocation7 + $0xd68] sm:$0xff] %v8485_v9 }
 0x413   :  { %9394 = vst [vmem:[#allocation7 + $0xb78] sm:$0xff] %v6098_v6  ;;  %v8631_v11 = vpop.f32.mrf.mxu0 }
 0x414   :  { %v6244_v8 = vpop.f32.mrf.mxu1  ;;  %9237 = vst [vmem:[#allocation7 + $0x690] sm:$0xff] %v8631_v11 }
 0x415   :  { %9175 = vst [vmem:[#allocation7 + $0x4a0] sm:$0xff] %v6244_v8  ;;  %v8633_v13 = vpop.f32.mrf.mxu0 }
 0x416   :  { %v6246_v10 = vpop.f32.mrf.mxu1  ;;  %9238 = vst [vmem:[#allocation7 + $0x698] sm:$0xff] %v8633_v13 }
 0x417   :  { %9176 = vst [vmem:[#allocation7 + $0x4a8] sm:$0xff] %v6246_v10  ;;  %v8637_v15 = vpop.f32.mrf.mxu0 }
 0x418   :  { %v6250_v12 = vpop.f32.mrf.mxu1  ;;  %9459 = vst [vmem:[#allocation7 + $0xd80] sm:$0xff] %v8637_v15 }
 0x419   :  { %9397 = vst [vmem:[#allocation7 + $0xb90] sm:$0xff] %v6250_v12  ;;  %v8639_v16 = vpop.f32.mrf.mxu0 }
 0x41a   :  { %v6252_v14 = vpop.f32.mrf.mxu1  ;;  %9460 = vst [vmem:[#allocation7 + $0xd88] sm:$0xff] %v8639_v16 }
 0x41b   :  { %9398 = vst [vmem:[#allocation7 + $0xb98] sm:$0xff] %v6252_v14  ;;  %v8785_v19 = vpop.f32.mrf.mxu0 }
 0x41c   :  { %v6398_v57 = vpop.f32.mrf.mxu1  ;;  %9241 = vst [vmem:[#allocation7 + $0x6b0] sm:$0xff] %v8785_v19 }
 0x41d   :  { %9179 = vst [vmem:[#allocation7 + $0x4c0] sm:$0xff] %v6398_v57  ;;  %v8787_v56 = vpop.f32.mrf.mxu0 }
 0x41e   :  { %v6400_v17 = vpop.f32.mrf.mxu1  ;;  %9242 = vst [vmem:[#allocation7 + $0x6b8] sm:$0xff] %v8787_v56 }
 0x41f   :  { %9180 = vst [vmem:[#allocation7 + $0x4c8] sm:$0xff] %v6400_v17  ;;  %v8791_v22 = vpop.f32.mrf.mxu0 }
 0x420   :  { %v6404_v20 = vpop.f32.mrf.mxu1  ;;  %9463 = vst [vmem:[#allocation7 + $0xda0] sm:$0xff] %v8791_v22 }
 0x421   :  { %9401 = vst [vmem:[#allocation7 + $0xbb0] sm:$0xff] %v6404_v20  ;;  %v8793_v24 = vpop.f32.mrf.mxu0 }
 0x422   :  { %v6406_v21 = vpop.f32.mrf.mxu1  ;;  %9464 = vst [vmem:[#allocation7 + $0xda8] sm:$0xff] %v8793_v24 }
 0x423   :  { %9402 = vst [vmem:[#allocation7 + $0xbb8] sm:$0xff] %v6406_v21  ;;  %v8939_v26 = vpop.f32.mrf.mxu0 }
 0x424   :  { %v6552_v23 = vpop.f32.mrf.mxu1  ;;  %9245 = vst [vmem:[#allocation7 + $0x6d0] sm:$0xff] %v8939_v26 }
 0x425   :  { %9183 = vst [vmem:[#allocation7 + $0x4e0] sm:$0xff] %v6552_v23  ;;  %v8941_v28 = vpop.f32.mrf.mxu0 }
 0x426   :  { %v6554_v25 = vpop.f32.mrf.mxu1  ;;  %9246 = vst [vmem:[#allocation7 + $0x6d8] sm:$0xff] %v8941_v28 }
 0x427   :  { %9184 = vst [vmem:[#allocation7 + $0x4e8] sm:$0xff] %v6554_v25  ;;  %v8945_v30 = vpop.f32.mrf.mxu0 }
 0x428   :  { %v6558_v27 = vpop.f32.mrf.mxu1  ;;  %9467 = vst [vmem:[#allocation7 + $0xdc0] sm:$0xff] %v8945_v30 }
 0x429   :  { %9405 = vst [vmem:[#allocation7 + $0xbd0] sm:$0xff] %v6558_v27  ;;  %v8947_v32 = vpop.f32.mrf.mxu0 }
 0x42a   :  { %v6560_v29 = vpop.f32.mrf.mxu1  ;;  %9468 = vst [vmem:[#allocation7 + $0xdc8] sm:$0xff] %v8947_v32 }
 0x42b   :  { %9406 = vst [vmem:[#allocation7 + $0xbd8] sm:$0xff] %v6560_v29 }
 0x42c   :  { %v6706_v31 = vpop.f32.mrf.mxu1 }
 0x42d   :  { %9187 = vst [vmem:[#allocation7 + $0x500] sm:$0xff] %v6706_v31 }
 0x42e   :  { %v6708_v18 = vpop.f32.mrf.mxu1 }
 0x42f   :  { %9188 = vst [vmem:[#allocation7 + $0x508] sm:$0xff] %v6708_v18 }
 0x430   :  { %v6712_v33 = vpop.f32.mrf.mxu1 }
 0x431   :  { %9409 = vst [vmem:[#allocation7 + $0xbf0] sm:$0xff] %v6712_v33 }
 0x432   :  { %v6714_v34 = vpop.f32.mrf.mxu1 }
 0x433   :  { %9410 = vst [vmem:[#allocation7 + $0xbf8] sm:$0xff] %v6714_v34 }
 0x434   :  { %v6860_v35 = vpop.f32.mrf.mxu1 }
 0x435   :  { %9191 = vst [vmem:[#allocation7 + $0x520] sm:$0xff] %v6860_v35 }
 0x436   :  { %v6862_v36 = vpop.f32.mrf.mxu1 }
 0x437   :  { %9192 = vst [vmem:[#allocation7 + $0x528] sm:$0xff] %v6862_v36 }
 0x438   :  { %v6866_v37 = vpop.f32.mrf.mxu1 }
 0x439   :  { %9413 = vst [vmem:[#allocation7 + $0xc10] sm:$0xff] %v6866_v37 }
 0x43a   :  { %v6868_v38 = vpop.f32.mrf.mxu1 }
 0x43b   :  { %9414 = vst [vmem:[#allocation7 + $0xc18] sm:$0xff] %v6868_v38 }
 0x43c   :  { %v7014_v39 = vpop.f32.mrf.mxu1 }
 0x43d   :  { %9195 = vst [vmem:[#allocation7 + $0x540] sm:$0xff] %v7014_v39 }
 0x43e   :  { %v7016_v41 = vpop.f32.mrf.mxu1 }
 0x43f   :  { %9196 = vst [vmem:[#allocation7 + $0x548] sm:$0xff] %v7016_v41 }
 0x440   :  { %v7020_v43 = vpop.f32.mrf.mxu1 }
 0x441   :  { %9417 = vst [vmem:[#allocation7 + $0xc30] sm:$0xff] %v7020_v43 }
 0x442   :  { %v7022_v44 = vpop.f32.mrf.mxu1 }
 0x443   :  { %9418 = vst [vmem:[#allocation7 + $0xc38] sm:$0xff] %v7022_v44 }
 0x444   :  { %v7168_v45 = vpop.f32.mrf.mxu1 }
 0x445   :  { %9199 = vst [vmem:[#allocation7 + $0x560] sm:$0xff] %v7168_v45 }
 0x446   :  { %v7170_v46 = vpop.f32.mrf.mxu1 }
 0x447   :  { %9200 = vst [vmem:[#allocation7 + $0x568] sm:$0xff] %v7170_v46 }
 0x448   :  { %v7174_v47 = vpop.f32.mrf.mxu1 }
 0x449   :  { %9421 = vst [vmem:[#allocation7 + $0xc50] sm:$0xff] %v7174_v47 }
 0x44a   :  { %v7176_v1 = vpop.f32.mrf.mxu1 }
 0x44b   :  { %9422 = vst [vmem:[#allocation7 + $0xc58] sm:$0xff] %v7176_v1 }
 0x44c   :  { %v7322_v49 = vpop.f32.mrf.mxu1 }
 0x44d   :  { %9203 = vst [vmem:[#allocation7 + $0x580] sm:$0xff] %v7322_v49 }
 0x44e   :  { %v7324_v50 = vpop.f32.mrf.mxu1 }
 0x44f   :  { %9204 = vst [vmem:[#allocation7 + $0x588] sm:$0xff] %v7324_v50 }
 0x450   :  { %v7328_v51 = vpop.f32.mrf.mxu1 }
 0x451   :  { %9425 = vst [vmem:[#allocation7 + $0xc70] sm:$0xff] %v7328_v51 }
 0x452   :  { %v7330_v52 = vpop.f32.mrf.mxu1 }
 0x453   :  { %9426 = vst [vmem:[#allocation7 + $0xc78] sm:$0xff] %v7330_v52 }
 0x454   :  { %v7476_v53 = vpop.f32.mrf.mxu1 }
 0x455   :  { %9207 = vst [vmem:[#allocation7 + $0x5a0] sm:$0xff] %v7476_v53 }
 0x456   :  { %v7478_v54 = vpop.f32.mrf.mxu1 }
 0x457   :  { %9208 = vst [vmem:[#allocation7 + $0x5a8] sm:$0xff] %v7478_v54 }
 0x458   :  { %v7482_v55 = vpop.f32.mrf.mxu1 }
 0x459   :  { %9429 = vst [vmem:[#allocation7 + $0xc90] sm:$0xff] %v7482_v55 }
 0x45a   :  { %v7484_v40 = vpop.f32.mrf.mxu1 }
 0x45b   :  { %9430 = vst [vmem:[#allocation7 + $0xc98] sm:$0xff] %v7484_v40 }
 0x45c   :  { %v7630_v48 = vpop.f32.mrf.mxu1 }
 0x45d   :  { %9211 = vst [vmem:[#allocation7 + $0x5c0] sm:$0xff] %v7630_v48 }
 0x45e   :  { %v7632_v0 = vpop.f32.mrf.mxu1 }
 0x45f   :  { %9212 = vst [vmem:[#allocation7 + $0x5c8] sm:$0xff] %v7632_v0 }
 0x460   :  { %v7636_v58 = vpop.f32.mrf.mxu1 }
 0x461   :  { %9433 = vst [vmem:[#allocation7 + $0xcb0] sm:$0xff] %v7636_v58 }
 0x462   :  { %v7638_v42 = vpop.f32.mrf.mxu1 }
 0x463   :  { %9434 = vst [vmem:[#allocation7 + $0xcb8] sm:$0xff] %v7638_v42 }
 0x464   :  { %v7784_v59 = vpop.f32.mrf.mxu1 }
 0x465   :  { %9215 = vst [vmem:[#allocation7 + $0x5e0] sm:$0xff] %v7784_v59 }
 0x466   :  { %v7786_v60 = vpop.f32.mrf.mxu1 }
 0x467   :  { %9216 = vst [vmem:[#allocation7 + $0x5e8] sm:$0xff] %v7786_v60 }
 0x468   :  { %v7790_v61 = vpop.f32.mrf.mxu1 }
 0x469   :  { %9437 = vst [vmem:[#allocation7 + $0xcd0] sm:$0xff] %v7790_v61 }
 0x46a   :  { %v7792_v62 = vpop.f32.mrf.mxu1 }
 0x46b   :  { %9438 = vst [vmem:[#allocation7 + $0xcd8] sm:$0xff] %v7792_v62 }
 0x46c   :  { %v7938_v63 = vpop.f32.mrf.mxu1 }
 0x46d   :  { %9219 = vst [vmem:[#allocation7 + $0x600] sm:$0xff] %v7938_v63 }
 0x46e   :  { %v7940_v2 = vpop.f32.mrf.mxu1 }
 0x46f   :  { %9220 = vst [vmem:[#allocation7 + $0x608] sm:$0xff] %v7940_v2 }
 0x470   :  { %v7944_v3 = vpop.f32.mrf.mxu1 }
 0x471   :  { %9441 = vst [vmem:[#allocation7 + $0xcf0] sm:$0xff] %v7944_v3 }
 0x472   :  { %v7946_v4 = vpop.f32.mrf.mxu1 }
 0x473   :  { %9442 = vst [vmem:[#allocation7 + $0xcf8] sm:$0xff] %v7946_v4 }
 0x474   :  { %v8092_v5 = vpop.f32.mrf.mxu1 }
 0x475   :  { %9223 = vst [vmem:[#allocation7 + $0x620] sm:$0xff] %v8092_v5 }
 0x476   :  { %v8094_v6 = vpop.f32.mrf.mxu1 }
 0x477   :  { %9224 = vst [vmem:[#allocation7 + $0x628] sm:$0xff] %v8094_v6 }
 0x478   :  { %v8098_v7 = vpop.f32.mrf.mxu1 }
 0x479   :  { %9445 = vst [vmem:[#allocation7 + $0xd10] sm:$0xff] %v8098_v7 }
 0x47a   :  { %v8100_v8 = vpop.f32.mrf.mxu1 }
 0x47b   :  { %9446 = vst [vmem:[#allocation7 + $0xd18] sm:$0xff] %v8100_v8 }
 0x47c   :  { %v8246_v9 = vpop.f32.mrf.mxu1 }
 0x47d   :  { %9227 = vst [vmem:[#allocation7 + $0x640] sm:$0xff] %v8246_v9 }
 0x47e   :  { %v8248_v10 = vpop.f32.mrf.mxu1 }
 0x47f   :  { %9228 = vst [vmem:[#allocation7 + $0x648] sm:$0xff] %v8248_v10 }
 0x480   :  { %v8252_v11 = vpop.f32.mrf.mxu1 }
 0x481   :  { %9449 = vst [vmem:[#allocation7 + $0xd30] sm:$0xff] %v8252_v11 }
 0x482   :  { %v8254_v12 = vpop.f32.mrf.mxu1 }
 0x483   :  { %9450 = vst [vmem:[#allocation7 + $0xd38] sm:$0xff] %v8254_v12 }
 0x484   :  { %v8400_v13 = vpop.f32.mrf.mxu1 }
 0x485   :  { %9231 = vst [vmem:[#allocation7 + $0x660] sm:$0xff] %v8400_v13 }
 0x486   :  { %v8402_v14 = vpop.f32.mrf.mxu1 }
 0x487   :  { %9232 = vst [vmem:[#allocation7 + $0x668] sm:$0xff] %v8402_v14 }
 0x488   :  { %v8406_v15 = vpop.f32.mrf.mxu1 }
 0x489   :  { %9453 = vst [vmem:[#allocation7 + $0xd50] sm:$0xff] %v8406_v15 }
 0x48a   :  { %v8408_v57 = vpop.f32.mrf.mxu1 }
 0x48b   :  { %9454 = vst [vmem:[#allocation7 + $0xd58] sm:$0xff] %v8408_v57 }
 0x48c   :  { %v8554_v16 = vpop.f32.mrf.mxu1 }
 0x48d   :  { %9235 = vst [vmem:[#allocation7 + $0x680] sm:$0xff] %v8554_v16 }
 0x48e   :  { %v8556_v17 = vpop.f32.mrf.mxu1 }
 0x48f   :  { %9236 = vst [vmem:[#allocation7 + $0x688] sm:$0xff] %v8556_v17 }
 0x490   :  { %v8560_v19 = vpop.f32.mrf.mxu1 }
 0x491   :  { %9457 = vst [vmem:[#allocation7 + $0xd70] sm:$0xff] %v8560_v19 }
 0x492   :  { %v8562_v20 = vpop.f32.mrf.mxu1 }
 0x493   :  { %9458 = vst [vmem:[#allocation7 + $0xd78] sm:$0xff] %v8562_v20 }
 0x494   :  { %v8708_v56 = vpop.f32.mrf.mxu1 }
 0x495   :  { %9239 = vst [vmem:[#allocation7 + $0x6a0] sm:$0xff] %v8708_v56 }
 0x496   :  { %v8710_v21 = vpop.f32.mrf.mxu1 }
 0x497   :  { %9240 = vst [vmem:[#allocation7 + $0x6a8] sm:$0xff] %v8710_v21 }
 0x498   :  { %v8714_v22 = vpop.f32.mrf.mxu1 }
 0x499   :  { %9461 = vst [vmem:[#allocation7 + $0xd90] sm:$0xff] %v8714_v22 }
 0x49a   :  { %v8716_v23 = vpop.f32.mrf.mxu1 }
 0x49b   :  { %9462 = vst [vmem:[#allocation7 + $0xd98] sm:$0xff] %v8716_v23 }
 0x49c   :  { %v8862_v24 = vpop.f32.mrf.mxu1 }
 0x49d   :  { %9243 = vst [vmem:[#allocation7 + $0x6c0] sm:$0xff] %v8862_v24 }
 0x49e   :  { %v8864_v25 = vpop.f32.mrf.mxu1 }
 0x49f   :  { %9244 = vst [vmem:[#allocation7 + $0x6c8] sm:$0xff] %v8864_v25 }
 0x4a0   :  { %v8868_v26 = vpop.f32.mrf.mxu1 }
 0x4a1   :  { %9465 = vst [vmem:[#allocation7 + $0xdb0] sm:$0xff] %v8868_v26 }
 0x4a2   :  { %v8870_v27 = vpop.f32.mrf.mxu1 }
 0x4a3   :  { %9466 = vst [vmem:[#allocation7 + $0xdb8] sm:$0xff] %v8870_v27 }
 0x4a4   :  { %v9016_v28 = vpop.f32.mrf.mxu1 }
 0x4a5   :  { %9247 = vst [vmem:[#allocation7 + $0x6e0] sm:$0xff] %v9016_v28 }
 0x4a6   :  { %v9018_v29 = vpop.f32.mrf.mxu1 }
 0x4a7   :  { %9248 = vst [vmem:[#allocation7 + $0x6e8] sm:$0xff] %v9018_v29 }
 0x4a8   :  { %v9022_v30 = vpop.f32.mrf.mxu1 }
 0x4a9   :  { %9469 = vst [vmem:[#allocation7 + $0xdd0] sm:$0xff] %v9022_v30 }
 0x4aa   :  { %v9024_v31 = vpop.f32.mrf.mxu1 }
 0x4ab   :  { %9470 = vst [vmem:[#allocation7 + $0xdd8] sm:$0xff] %v9024_v31 }
 0x4ac   :  { %9818 = shalt.err (!%p9815_p0)
}
 0x4ad   :  { %s9839_s27 = smov 28416   ;;  %s9840_s28 = smov 1776  }
 0x4ae   :  { %9484 = dma.vmem_to_hbm [thread:$0]  %s9479_s26, 56832, %s10638_s4, [#allocation4], %s9839_s27, %s9839_s27, %s9840_s28  }
 0x4af   :  { %9831 = dma.done.wait [#allocation4], 56832  }
 0x4b0   :  { %9832 = vsyncadd [#allocation4], 4294910464 }
 0x4b1   :  { %9490 = vsyncpa [#allocation3], 1 }
 0x4b2   :  { %9491 = vsyncpa [#allocation6], 1 }
 0x4b3   :  { %9492 = vsyncpa [#allocation4], 1 }

</bundles_post_ra>
